<compile_context>
chip_gen: v7x
topology: tpu7x:2x2x1
jax: 0.10.0
libtpu: 0.0.40
codegen_flags: <defaults>
</compile_context>

<pallas_src>
import functools

import jax
import jax.numpy as jnp
import numpy as np
from jax.experimental import pallas as pl
from jax.experimental.pallas import tpu as pltpu

BN_EPS = 1e-5
_VMEM_LIMIT = 48 * 1024 * 1024
_MAX_TB = 8          # images per grid step (upper bound)


def _pick_tb(batch, max_tb=_MAX_TB):
    """Largest divisor of `batch` <= max_tb, preferring an even grid (v7x)."""
    divs = [d for d in range(1, min(batch, max_tb) + 1) if batch % d == 0]
    even = [d for d in divs if (batch // d) % 2 == 0]
    return max(even) if even else max(divs)


def _conv_compiler_params():
    return pltpu.CompilerParams(dimension_semantics=("parallel",),
                                vmem_limit_bytes=_VMEM_LIMIT)


# ----------------------------------------------------------------------------
# Pallas kernels
# ----------------------------------------------------------------------------
def conv_stats_kernel(x_ref, w_ref, m_ref, o_ref, *, tb):
    # Pass A: per-grid-step partial BN statistics of the (pre-BN) conv output.
    # x_ref: (tb, rows_out, K) bf16 tap-concatenated activations
    # w_ref: (K, 4*Cout) bf16      m_ref: (rows_out, 1) f32 junk-column mask
    # o_ref: (1, 2, 4*Cout) f32    [row 0: sum, row 1: sum of squares]
    c4out = w_ref.shape[-1]
    w = w_ref[...]
    m = m_ref[...]
    s = jnp.zeros((1, c4out), jnp.float32)
    ss = jnp.zeros((1, c4out), jnp.float32)
    for b in range(tb):                      # statically unrolled, tb <= 8
        acc = jnp.dot(x_ref[b], w, preferred_element_type=jnp.float32)
        v = acc * m                          # zero the junk columns
        s = s + jnp.sum(v, axis=0, keepdims=True)
        ss = ss + jnp.sum(v * v, axis=0, keepdims=True)
    o_ref[0, 0:1, :] = s
    o_ref[0, 1:2, :] = ss


def conv_apply_kernel(x_ref, w_ref, sc_ref, sh_ref, o_ref, *, tb):
    # Pass B: conv + BN scale/shift + ReLU + fused 2x2 max-pool epilogue.
    w = w_ref[...]
    sc = sc_ref[...]
    sh = sh_ref[...]
    c = o_ref.shape[-1]                      # Cout; 4 lane groups == 2x2 window
    for b in range(tb):                      # statically unrolled, tb <= 8
        acc = jnp.dot(x_ref[b], w, preferred_element_type=jnp.float32)
        y = jnp.maximum(acc * sc + sh, 0.0)
        pooled = jnp.maximum(jnp.maximum(y[:, 0:c], y[:, c:2 * c]),
                             jnp.maximum(y[:, 2 * c:3 * c], y[:, 3 * c:4 * c]))
        o_ref[b] = pooled.astype(o_ref.dtype)


def fc_logsoftmax_kernel(x_ref, w_ref, b_ref, o_ref):
    logits = jnp.dot(x_ref[...], w_ref[...],
                     preferred_element_type=jnp.float32) + b_ref[...]
    # F.log_softmax(x, dim=0): normalization over the BATCH dimension,
    # exactly as written in the reference module.
    m = jnp.max(logits, axis=0, keepdims=True)
    lse = m + jnp.log(jnp.sum(jnp.exp(logits - m), axis=0, keepdims=True))
    o_ref[...] = logits - lse


# ----------------------------------------------------------------------------
# pallas_call wrappers (grid tiled over the batch axis, "parallel")
# ----------------------------------------------------------------------------
def conv_stats(x_taps, w_flat, row_mask, *, tb):
    B, rows_out, K = x_taps.shape
    c4out = w_flat.shape[-1]
    nb = B // tb
    kern = functools.partial(conv_stats_kernel, tb=tb)
    return pl.pallas_call(
        kern,
        out_shape=jax.ShapeDtypeStruct((nb, 2, c4out), jnp.float32),
        grid=(nb,),
        in_specs=[
            pl.BlockSpec((tb, rows_out, K), lambda i: (i, 0, 0)),
            pl.BlockSpec((K, c4out), lambda i: (0, 0)),
            pl.BlockSpec((rows_out, 1), lambda i: (0, 0)),
        ],
        out_specs=pl.BlockSpec((1, 2, c4out), lambda i: (i, 0, 0)),
        compiler_params=_conv_compiler_params(),
    )(x_taps, w_flat, row_mask)


def conv_apply(x_taps, w_flat, scale4, shift4, *, tb):
    B, rows_out, K = x_taps.shape
    c4out = w_flat.shape[-1]
    c_out = c4out // 4
    nb = B // tb
    kern = functools.partial(conv_apply_kernel, tb=tb)
    return pl.pallas_call(
        kern,
        out_shape=jax.ShapeDtypeStruct((B, rows_out, c_out), jnp.bfloat16),
        grid=(nb,),
        in_specs=[
            pl.BlockSpec((tb, rows_out, K), lambda i: (i, 0, 0)),
            pl.BlockSpec((K, c4out), lambda i: (0, 0)),
            pl.BlockSpec((1, c4out), lambda i: (0, 0)),
            pl.BlockSpec((1, c4out), lambda i: (0, 0)),
        ],
        out_specs=pl.BlockSpec((tb, rows_out, c_out), lambda i: (i, 0, 0)),
        compiler_params=_conv_compiler_params(),
    )(x_taps, w_flat, scale4, shift4)


def fc_logsoftmax(x, w, b):
    # log_softmax couples all batch rows (dim=0) and the whole problem is a
    # few hundred KB, so a single full block is the right choice here.
    B, K = x.shape
    N = w.shape[1]
    return pl.pallas_call(
        fc_logsoftmax_kernel,
        out_shape=jax.ShapeDtypeStruct((B, N), jnp.float32),
        grid=(1,),
        in_specs=[pl.BlockSpec((B, K), lambda i: (0, 0)),
                  pl.BlockSpec((K, N), lambda i: (0, 0)),
                  pl.BlockSpec((1, N), lambda i: (0, 0))],
        out_specs=pl.BlockSpec((B, N), lambda i: (0, 0)),
        compiler_params=pltpu.CompilerParams(vmem_limit_bytes=_VMEM_LIMIT),
    )(x, w, b)


# ----------------------------------------------------------------------------
# Cheap XLA layout prep: pad + 2x2 space-to-depth + tap concatenation
# ----------------------------------------------------------------------------
def pack_taps(x_nhwc, pad=2):
    """Zero-pad, 2x2 space-to-depth, flatten rows, concat the 9 conv taps.

    Returns (x_taps, rows_out, w2) with x_taps of shape (B, rows_out, 9*4*C)
    bf16: row r holds the 9 shifted tap vectors of output-block row r, so the
    5x5/stride-1 conv becomes ONE K-dense matmul per image.
    """
    B, H, W, C = x_nhwc.shape
    xp = jnp.pad(x_nhwc, ((0, 0), (pad, pad), (pad, pad), (0, 0)))
    h2, w2 = (H + 2 * pad) // 2, (W + 2 * pad) // 2
    xs = xp.reshape(B, h2, 2, w2, 2, C)
    xs = xs.transpose(0, 1, 3, 2, 4, 5).reshape(B, h2 * w2, 4 * C)
    # guard rows so every shifted tap slice stays in bounds
    xs = jnp.pad(xs, ((0, 0), (0, w2), (0, 0))).astype(jnp.bfloat16)
    rows_out = (H // 2) * w2
    offs = [ah * w2 + aw for ah in range(3) for aw in range(3)]
    x_taps = jnp.concatenate([xs[:, o:o + rows_out, :] for o in offs], axis=-1)
    return x_taps, rows_out, w2


def conv_bn_relu_pool(x_nhwc, w_flat, gamma, beta, *, tb):
    """5x5 conv (pad 2) + BatchNorm (batch stats) + ReLU + 2x2 max-pool.

    Returns (y, HO, WO, w2); y is (B, HO*w2, Cout) bf16 where columns
    wo' in [WO, w2) of each row block are junk (handled by the caller).
    """
    B, H, W, _ = x_nhwc.shape
    c_out = w_flat.shape[-1] // 4
    HO, WO = H // 2, W // 2
    x_taps, rows_out, w2 = pack_taps(x_nhwc)
    row_mask = ((jnp.arange(rows_out) % w2) < WO)
    row_mask = row_mask.astype(jnp.float32).reshape(rows_out, 1)

    # Pass A: per-block partial sums -> global batch statistics (training BN).
    stats = conv_stats(x_taps, w_flat, row_mask, tb=tb)             # (B//tb, 2, 4*Cout)
    tot = jnp.sum(stats, axis=0).reshape(2, 4, c_out).sum(axis=1)   # (2, Cout)
    n = B * H * W                                                   # positions per channel
    mean = tot[0] / n
    var = jnp.maximum(tot[1] / n - mean * mean, 0.0)                # biased variance
    scale = gamma * jax.lax.rsqrt(var + BN_EPS)
    shift = beta - mean * scale
    scale4 = jnp.tile(scale, 4).reshape(1, 4 * c_out)
    shift4 = jnp.tile(shift, 4).reshape(1, 4 * c_out)

    # Pass B: conv + BN + ReLU + fused pool, bf16 hand-off.
    y = conv_apply(x_taps, w_flat, scale4, shift4, tb=tb)           # (B, HO*w2, Cout)
    return y, HO, WO, w2


def convnet_forward(x_nchw, params):
    # external layout: (B, 1, 28, 28) NCHW like PyTorch; internally NHWC.
    x = jnp.transpose(x_nchw, (0, 2, 3, 1)).astype(jnp.float32)
    B = x.shape[0]
    tb = _pick_tb(B)
    y1, HO1, WO1, w2_1 = conv_bn_relu_pool(x, params["w1p"], params["g1"],
                                           params["bt1"], tb=tb)
    # strip layer-1 junk columns; (B,14,14,16) bf16 feeds layer-2 packing
    y1 = y1.reshape(B, HO1, w2_1, -1)[:, :, :WO1, :]
    y2, HO2, WO2, w2_2 = conv_bn_relu_pool(y1, params["w2p"], params["g2"],
                                           params["bt2"], tb=tb)
    # FC: the NCHW flatten permutation AND the junk-column strip are folded
    # into the packed FC weights, so a plain reshape feeds the FC kernel.
    feat = y2.reshape(B, HO2 * w2_2 * y2.shape[-1])                 # (B, 7*9*32) bf16
    return fc_logsoftmax(feat, params["wfc_p"], params["bfc"])      # (B, 10)


# ----------------------------------------------------------------------------
# Parameters (PyTorch layout) and packing into the kernel layout
# ----------------------------------------------------------------------------
def pack_conv_weight(w):
    """(Cout, Cin, 5, 5) conv weight -> (9*4*Cin, 4*Cout) tap-concatenated matmul weight.

    Folds 2x2 space-to-depth on the input (r, q sub-pixels) and on the output
    (s, p sub-pixels == the max-pool window) into channels, and stacks the 9
    (ah, aw) taps along K so the conv is a single K-dense matmul per image.
    """
    w_np = np.asarray(jax.device_get(w), np.float32)
    co, ci = w_np.shape[0], w_np.shape[1]
    wt = np.transpose(w_np, (2, 3, 1, 0))                    # (ki, kj, ci, co)
    w4 = np.zeros((3, 3, 2, 2, ci, 2, 2, co), np.float32)    # ah,aw,r,q,ci,s,p,co
    for ah in range(3):
        for aw in range(3):
            for r in range(2):
                for q in range(2):
                    for s in range(2):
                        for p in range(2):
                            ki = 2 * ah + r - s
                            kj = 2 * aw + q - p
                            if 0 <= ki < 5 and 0 <= kj < 5:
                                w4[ah, aw, r, q, :, s, p, :] = wt[ki, kj]
    return jnp.asarray(w4.reshape(9 * 4 * ci, 4 * co), dtype=jnp.bfloat16)


def pack_fc_weight(wfc, *, c=32, ho=7, wo=7, w2=9):
    """(10, 32*7*7) NCHW-flatten FC weight -> (7*9*32, 10) weight that consumes
    the layer-2 kernel output directly (NHWC row-major incl. junk columns,
    which get zero weight rows)."""
    w_np = np.asarray(jax.device_get(wfc), np.float32)            # cols: ch*49 + h*7 + w
    n_cls = w_np.shape[0]
    w_r = w_np.reshape(n_cls, c, ho, wo).transpose(2, 3, 1, 0)    # (h, w, ch, n_cls)
    w_e = np.zeros((ho, w2, c, n_cls), np.float32)
    w_e[:, :wo] = w_r
    return jnp.asarray(w_e.reshape(ho * w2 * c, n_cls), dtype=jnp.bfloat16)


def init_params(key):
    k1, k2, k3, k4, k5, k6 = jax.random.split(key, 6)
    w1 = 0.1 * jax.random.normal(k1, (16, 1, 5, 5), jnp.float32)
    b1 = 0.1 * jax.random.normal(k2, (16,), jnp.float32)    # dead: cancelled by BN mean
    w2 = 0.05 * jax.random.normal(k3, (32, 16, 5, 5), jnp.float32)
    b2 = 0.05 * jax.random.normal(k4, (32,), jnp.float32)   # dead: cancelled by BN mean
    wfc = 0.02 * jax.random.normal(k5, (10, 7 * 7 * 32), jnp.float32)
    bfc = 0.02 * jax.random.normal(k6, (10,), jnp.float32)
    return {
        "w1": w1, "b1": b1, "w2": w2, "b2": b2, "wfc": wfc, "bfc": bfc,
        "g1": jnp.ones((16,), jnp.float32), "bt1": jnp.zeros((16,), jnp.float32),
        "g2": jnp.ones((32,), jnp.float32), "bt2": jnp.zeros((32,), jnp.float32),
    }


def pack_params(p):
    # Conv biases are intentionally dropped: a per-channel constant added
    # before training-mode BatchNorm is exactly cancelled by mean subtraction.
    return {
        "w1p": pack_conv_weight(p["w1"]),
        "w2p": pack_conv_weight(p["w2"]),
        "g1": p["g1"], "bt1": p["bt1"],
        "g2": p["g2"], "bt2": p["bt2"],
        "wfc_p": pack_fc_weight(p["wfc"]),
        "bfc": jnp.asarray(p["bfc"]).reshape(1, 10).astype(jnp.float32),
    }


if __name__ == "__main__":
    key = jax.random.PRNGKey(0)
    kx, kp = jax.random.split(key)
    # fc expects 7*7*32 features -> the module implies 1x28x28 inputs; batch=2.
    x = jax.random.normal(kx, (2, 1, 28, 28), jnp.float32)
    params = pack_params(init_params(kp))

    out = jax.jit(convnet_forward)(x, params)
    out = jax.block_until_ready(out)

    assert out.shape == (2, 10), out.shape
    assert bool(jnp.all(jnp.isfinite(out)))
    print("KERNEL_OK")
</pallas_src>

<mosaic_0001>
module attributes {stable_mosaic.version = 11 : i64} {
  func.func @conv_stats_kernel(%arg0: i32, %arg1: memref<1x224x36xbf16, #tpu.memory_space<vmem>>, %arg2: memref<36x64xbf16, #tpu.memory_space<vmem>>, %arg3: memref<224x1xf32, #tpu.memory_space<vmem>>, %arg4: memref<1x2x64xf32, #tpu.memory_space<vmem>>) attributes {dimension_semantics = [#tpu.dimension_semantics<parallel>], iteration_bounds = array<i64: 2>, scalar_prefetch = 0 : i64, scratch_operands = 0 : i64, tpu.core_type = #tpu.core_type<tc>, window_params = [{transform_indices = @transform_0, window_bounds = array<i64: 1, 224, 36>}, {pipeline_mode = #tpu.pipeline_mode<synchronous>, transform_indices = @transform_1, window_bounds = array<i64: 36, 64>}, {pipeline_mode = #tpu.pipeline_mode<synchronous>, transform_indices = @transform_2, window_bounds = array<i64: 224, 1>}, {transform_indices = @transform_3, window_bounds = array<i64: 1, 2, 64>}]} {
    %c0 = arith.constant 0 : index
    %c0_0 = arith.constant 0 : index
    %0 = vector.load %arg2[%c0, %c0_0] : memref<36x64xbf16, #tpu.memory_space<vmem>>, vector<36x64xbf16>
    %c0_1 = arith.constant 0 : index
    %c0_2 = arith.constant 0 : index
    %1 = vector.load %arg3[%c0_1, %c0_2] : memref<224x1xf32, #tpu.memory_space<vmem>>, vector<224x1xf32>
    %cst = arith.constant 0.000000e+00 : f32
    %2 = vector.broadcast %cst : f32 to vector<1x64xf32>
    %cst_3 = arith.constant 0.000000e+00 : f32
    %3 = vector.broadcast %cst_3 : f32 to vector<1x64xf32>
    %c0_4 = arith.constant 0 : index
    %c0_5 = arith.constant 0 : index
    %c0_6 = arith.constant 0 : index
    %4 = vector.load %arg1[%c0_4, %c0_5, %c0_6] : memref<1x224x36xbf16, #tpu.memory_space<vmem>>, vector<1x224x36xbf16>
    %5 = vector.shape_cast %4 : vector<1x224x36xbf16> to vector<224x36xbf16>
    %cst_7 = arith.constant dense<0.000000e+00> : vector<224x64xf32>
    %6 = tpu.matmul %5, %0, %cst_7 {dimension_numbers = #tpu.dot_dimension_numbers<[1], [0], [0], [1], [0, 0, 1, 1], [], []>} : vector<224x36xbf16>, vector<36x64xbf16>, vector<224x64xf32> -> vector<224x64xf32>
    %7 = vector.broadcast %1 : vector<224x1xf32> to vector<224x64xf32>
    %8 = arith.mulf %6, %7 : vector<224x64xf32>
    %cst_8 = arith.constant dense<0.000000e+00> : vector<64xf32>
    %9 = vector.multi_reduction <add>, %8, %cst_8 [0] : vector<224x64xf32> to vector<64xf32>
    %10 = vector.shape_cast %9 : vector<64xf32> to vector<1x64xf32>
    %11 = arith.addf %2, %10 : vector<1x64xf32>
    %12 = arith.mulf %8, %8 : vector<224x64xf32>
    %cst_9 = arith.constant dense<0.000000e+00> : vector<64xf32>
    %13 = vector.multi_reduction <add>, %12, %cst_9 [0] : vector<224x64xf32> to vector<64xf32>
    %14 = vector.shape_cast %13 : vector<64xf32> to vector<1x64xf32>
    %15 = arith.addf %3, %14 : vector<1x64xf32>
    %c0_10 = arith.constant 0 : index
    %c0_11 = arith.constant 0 : index
    %c0_12 = arith.constant 0 : index
    %16 = vector.load %arg4[%c0_10, %c0_11, %c0_12] : memref<1x2x64xf32, #tpu.memory_space<vmem>>, vector<1x1x64xf32>
    %17 = vector.shape_cast %16 : vector<1x1x64xf32> to vector<1x64xf32>
    %18 = vector.shape_cast %11 : vector<1x64xf32> to vector<1x1x64xf32>
    tpu.vector_store %arg4[%c0_10, %c0_11, %c0_12], %18 {strides = array<i32>} : memref<1x2x64xf32, #tpu.memory_space<vmem>>, vector<1x1x64xf32>,
    %c0_13 = arith.constant 0 : index
    %c1 = arith.constant 1 : index
    %c0_14 = arith.constant 0 : index
    %19 = vector.load %arg4[%c0_13, %c1, %c0_14] : memref<1x2x64xf32, #tpu.memory_space<vmem>>, vector<1x1x64xf32>
    %20 = vector.shape_cast %19 : vector<1x1x64xf32> to vector<1x64xf32>
    %21 = vector.shape_cast %15 : vector<1x64xf32> to vector<1x1x64xf32>
    tpu.vector_store %arg4[%c0_13, %c1, %c0_14], %21 {strides = array<i32>} : memref<1x2x64xf32, #tpu.memory_space<vmem>>, vector<1x1x64xf32>,
    return
  }
  func.func @transform_0(%arg0: i32) -> (i32, i32, i32) {
    %c0_i32 = arith.constant 0 : i32
    %c0_i32_0 = arith.constant 0 : i32
    %c0_i32_1 = arith.constant 0 : i32
    return %arg0, %c0_i32, %c0_i32_0 : i32, i32, i32
  }
  func.func @transform_1(%arg0: i32) -> (i32, i32) {
    %c0_i32 = arith.constant 0 : i32
    %c0_i32_0 = arith.constant 0 : i32
    %c0_i32_1 = arith.constant 0 : i32
    return %c0_i32, %c0_i32_0 : i32, i32
  }
  func.func @transform_2(%arg0: i32) -> (i32, i32) {
    %c0_i32 = arith.constant 0 : i32
    %c0_i32_0 = arith.constant 0 : i32
    %c0_i32_1 = arith.constant 0 : i32
    return %c0_i32, %c0_i32_0 : i32, i32
  }
  func.func @transform_3(%arg0: i32) -> (i32, i32, i32) {
    %c0_i32 = arith.constant 0 : i32
    %c0_i32_0 = arith.constant 0 : i32
    %c0_i32_1 = arith.constant 0 : i32
    return %arg0, %c0_i32, %c0_i32_0 : i32, i32, i32
  }
}

module attributes {stable_mosaic.version = 11 : i64} {
  func.func @conv_apply_kernel(%arg0: i32, %arg1: memref<1x224x36xbf16, #tpu.memory_space<vmem>>, %arg2: memref<36x64xbf16, #tpu.memory_space<vmem>>, %arg3: memref<1x64xf32, #tpu.memory_space<vmem>>, %arg4: memref<1x64xf32, #tpu.memory_space<vmem>>, %arg5: memref<1x224x16xbf16, #tpu.memory_space<vmem>>) attributes {dimension_semantics = [#tpu.dimension_semantics<parallel>], iteration_bounds = array<i64: 2>, scalar_prefetch = 0 : i64, scratch_operands = 0 : i64, tpu.core_type = #tpu.core_type<tc>, window_params = [{transform_indices = @transform_0, window_bounds = array<i64: 1, 224, 36>}, {pipeline_mode = #tpu.pipeline_mode<synchronous>, transform_indices = @transform_1, window_bounds = array<i64: 36, 64>}, {pipeline_mode = #tpu.pipeline_mode<synchronous>, transform_indices = @transform_2, window_bounds = array<i64: 1, 64>}, {pipeline_mode = #tpu.pipeline_mode<synchronous>, transform_indices = @transform_3, window_bounds = array<i64: 1, 64>}, {transform_indices = @transform_4, window_bounds = array<i64: 1, 224, 16>}]} {
    %c0 = arith.constant 0 : index
    %c0_0 = arith.constant 0 : index
    %0 = vector.load %arg2[%c0, %c0_0] : memref<36x64xbf16, #tpu.memory_space<vmem>>, vector<36x64xbf16>
    %c0_1 = arith.constant 0 : index
    %c0_2 = arith.constant 0 : index
    %1 = vector.load %arg3[%c0_1, %c0_2] : memref<1x64xf32, #tpu.memory_space<vmem>>, vector<1x64xf32>
    %c0_3 = arith.constant 0 : index
    %c0_4 = arith.constant 0 : index
    %2 = vector.load %arg4[%c0_3, %c0_4] : memref<1x64xf32, #tpu.memory_space<vmem>>, vector<1x64xf32>
    %c0_5 = arith.constant 0 : index
    %c0_6 = arith.constant 0 : index
    %c0_7 = arith.constant 0 : index
    %3 = vector.load %arg1[%c0_5, %c0_6, %c0_7] : memref<1x224x36xbf16, #tpu.memory_space<vmem>>, vector<1x224x36xbf16>
    %4 = vector.shape_cast %3 : vector<1x224x36xbf16> to vector<224x36xbf16>
    %cst = arith.constant dense<0.000000e+00> : vector<224x64xf32>
    %5 = tpu.matmul %4, %0, %cst {dimension_numbers = #tpu.dot_dimension_numbers<[1], [0], [0], [1], [0, 0, 1, 1], [], []>} : vector<224x36xbf16>, vector<36x64xbf16>, vector<224x64xf32> -> vector<224x64xf32>
    %6 = vector.broadcast %1 : vector<1x64xf32> to vector<224x64xf32>
    %7 = arith.mulf %5, %6 : vector<224x64xf32>
    %8 = vector.broadcast %2 : vector<1x64xf32> to vector<224x64xf32>
    %9 = arith.addf %7, %8 : vector<224x64xf32>
    %cst_8 = arith.constant 0.000000e+00 : f32
    %10 = vector.broadcast %cst_8 : f32 to vector<224x64xf32>
    %11 = arith.maximumf %9, %10 : vector<224x64xf32>
    %12 = vector.extract_strided_slice %11 {offsets = [0, 0], sizes = [224, 16], strides = [1, 1]} : vector<224x64xf32> to vector<224x16xf32>
    %13 = vector.extract_strided_slice %11 {offsets = [0, 16], sizes = [224, 16], strides = [1, 1]} : vector<224x64xf32> to vector<224x16xf32>
    %14 = arith.maximumf %12, %13 : vector<224x16xf32>
    %15 = vector.extract_strided_slice %11 {offsets = [0, 32], sizes = [224, 16], strides = [1, 1]} : vector<224x64xf32> to vector<224x16xf32>
    %16 = vector.extract_strided_slice %11 {offsets = [0, 48], sizes = [224, 16], strides = [1, 1]} : vector<224x64xf32> to vector<224x16xf32>
    %17 = arith.maximumf %15, %16 : vector<224x16xf32>
    %18 = arith.maximumf %14, %17 : vector<224x16xf32>
    %19 = arith.truncf %18 : vector<224x16xf32> to vector<224x16xbf16>
    %c0_9 = arith.constant 0 : index
    %c0_10 = arith.constant 0 : index
    %c0_11 = arith.constant 0 : index
    %20 = vector.load %arg5[%c0_9, %c0_10, %c0_11] : memref<1x224x16xbf16, #tpu.memory_space<vmem>>, vector<1x224x16xbf16>
    %21 = vector.shape_cast %20 : vector<1x224x16xbf16> to vector<224x16xbf16>
    %22 = vector.shape_cast %19 : vector<224x16xbf16> to vector<1x224x16xbf16>
    tpu.vector_store %arg5[%c0_9, %c0_10, %c0_11], %22 {strides = array<i32>} : memref<1x224x16xbf16, #tpu.memory_space<vmem>>, vector<1x224x16xbf16>,
    return
  }
  func.func @transform_0(%arg0: i32) -> (i32, i32, i32) {
    %c0_i32 = arith.constant 0 : i32
    %c0_i32_0 = arith.constant 0 : i32
    %c0_i32_1 = arith.constant 0 : i32
    return %arg0, %c0_i32, %c0_i32_0 : i32, i32, i32
  }
  func.func @transform_1(%arg0: i32) -> (i32, i32) {
    %c0_i32 = arith.constant 0 : i32
    %c0_i32_0 = arith.constant 0 : i32
    %c0_i32_1 = arith.constant 0 : i32
    return %c0_i32, %c0_i32_0 : i32, i32
  }
  func.func @transform_2(%arg0: i32) -> (i32, i32) {
    %c0_i32 = arith.constant 0 : i32
    %c0_i32_0 = arith.constant 0 : i32
    %c0_i32_1 = arith.constant 0 : i32
    return %c0_i32, %c0_i32_0 : i32, i32
  }
  func.func @transform_3(%arg0: i32) -> (i32, i32) {
    %c0_i32 = arith.constant 0 : i32
    %c0_i32_0 = arith.constant 0 : i32
    %c0_i32_1 = arith.constant 0 : i32
    return %c0_i32, %c0_i32_0 : i32, i32
  }
  func.func @transform_4(%arg0: i32) -> (i32, i32, i32) {
    %c0_i32 = arith.constant 0 : i32
    %c0_i32_0 = arith.constant 0 : i32
    %c0_i32_1 = arith.constant 0 : i32
    return %arg0, %c0_i32, %c0_i32_0 : i32, i32, i32
  }
}

module attributes {stable_mosaic.version = 11 : i64} {
  func.func @conv_stats_kernel(%arg0: i32, %arg1: memref<1x63x576xbf16, #tpu.memory_space<vmem>>, %arg2: memref<576x128xbf16, #tpu.memory_space<vmem>>, %arg3: memref<63x1xf32, #tpu.memory_space<vmem>>, %arg4: memref<1x2x128xf32, #tpu.memory_space<vmem>>) attributes {dimension_semantics = [#tpu.dimension_semantics<parallel>], iteration_bounds = array<i64: 2>, scalar_prefetch = 0 : i64, scratch_operands = 0 : i64, tpu.core_type = #tpu.core_type<tc>, window_params = [{transform_indices = @transform_0, window_bounds = array<i64: 1, 63, 576>}, {pipeline_mode = #tpu.pipeline_mode<synchronous>, transform_indices = @transform_1, window_bounds = array<i64: 576, 128>}, {pipeline_mode = #tpu.pipeline_mode<synchronous>, transform_indices = @transform_2, window_bounds = array<i64: 63, 1>}, {transform_indices = @transform_3, window_bounds = array<i64: 1, 2, 128>}]} {
    %c0 = arith.constant 0 : index
    %c0_0 = arith.constant 0 : index
    %0 = vector.load %arg2[%c0, %c0_0] : memref<576x128xbf16, #tpu.memory_space<vmem>>, vector<576x128xbf16>
    %c0_1 = arith.constant 0 : index
    %c0_2 = arith.constant 0 : index
    %1 = vector.load %arg3[%c0_1, %c0_2] : memref<63x1xf32, #tpu.memory_space<vmem>>, vector<63x1xf32>
    %cst = arith.constant 0.000000e+00 : f32
    %2 = vector.broadcast %cst : f32 to vector<1x128xf32>
    %cst_3 = arith.constant 0.000000e+00 : f32
    %3 = vector.broadcast %cst_3 : f32 to vector<1x128xf32>
    %c0_4 = arith.constant 0 : index
    %c0_5 = arith.constant 0 : index
    %c0_6 = arith.constant 0 : index
    %4 = vector.load %arg1[%c0_4, %c0_5, %c0_6] : memref<1x63x576xbf16, #tpu.memory_space<vmem>>, vector<1x63x576xbf16>
    %5 = vector.shape_cast %4 : vector<1x63x576xbf16> to vector<63x576xbf16>
    %cst_7 = arith.constant dense<0.000000e+00> : vector<63x128xf32>
    %6 = tpu.matmul %5, %0, %cst_7 {dimension_numbers = #tpu.dot_dimension_numbers<[1], [0], [0], [1], [0, 0, 1, 1], [], []>} : vector<63x576xbf16>, vector<576x128xbf16>, vector<63x128xf32> -> vector<63x128xf32>
    %7 = vector.broadcast %1 : vector<63x1xf32> to vector<63x128xf32>
    %8 = arith.mulf %6, %7 : vector<63x128xf32>
    %cst_8 = arith.constant dense<0.000000e+00> : vector<128xf32>
    %9 = vector.multi_reduction <add>, %8, %cst_8 [0] : vector<63x128xf32> to vector<128xf32>
    %10 = vector.shape_cast %9 : vector<128xf32> to vector<1x128xf32>
    %11 = arith.addf %2, %10 : vector<1x128xf32>
    %12 = arith.mulf %8, %8 : vector<63x128xf32>
    %cst_9 = arith.constant dense<0.000000e+00> : vector<128xf32>
    %13 = vector.multi_reduction <add>, %12, %cst_9 [0] : vector<63x128xf32> to vector<128xf32>
    %14 = vector.shape_cast %13 : vector<128xf32> to vector<1x128xf32>
    %15 = arith.addf %3, %14 : vector<1x128xf32>
    %c0_10 = arith.constant 0 : index
    %c0_11 = arith.constant 0 : index
    %c0_12 = arith.constant 0 : index
    %16 = vector.load %arg4[%c0_10, %c0_11, %c0_12] : memref<1x2x128xf32, #tpu.memory_space<vmem>>, vector<1x1x128xf32>
    %17 = vector.shape_cast %16 : vector<1x1x128xf32> to vector<1x128xf32>
    %18 = vector.shape_cast %11 : vector<1x128xf32> to vector<1x1x128xf32>
    tpu.vector_store %arg4[%c0_10, %c0_11, %c0_12], %18 {strides = array<i32>} : memref<1x2x128xf32, #tpu.memory_space<vmem>>, vector<1x1x128xf32>,
    %c0_13 = arith.constant 0 : index
    %c1 = arith.constant 1 : index
    %c0_14 = arith.constant 0 : index
    %19 = vector.load %arg4[%c0_13, %c1, %c0_14] : memref<1x2x128xf32, #tpu.memory_space<vmem>>, vector<1x1x128xf32>
    %20 = vector.shape_cast %19 : vector<1x1x128xf32> to vector<1x128xf32>
    %21 = vector.shape_cast %15 : vector<1x128xf32> to vector<1x1x128xf32>
    tpu.vector_store %arg4[%c0_13, %c1, %c0_14], %21 {strides = array<i32>} : memref<1x2x128xf32, #tpu.memory_space<vmem>>, vector<1x1x128xf32>,
    return
  }
  func.func @transform_0(%arg0: i32) -> (i32, i32, i32) {
    %c0_i32 = arith.constant 0 : i32
    %c0_i32_0 = arith.constant 0 : i32
    %c0_i32_1 = arith.constant 0 : i32
    return %arg0, %c0_i32, %c0_i32_0 : i32, i32, i32
  }
  func.func @transform_1(%arg0: i32) -> (i32, i32) {
    %c0_i32 = arith.constant 0 : i32
    %c0_i32_0 = arith.constant 0 : i32
    %c0_i32_1 = arith.constant 0 : i32
    return %c0_i32, %c0_i32_0 : i32, i32
  }
  func.func @transform_2(%arg0: i32) -> (i32, i32) {
    %c0_i32 = arith.constant 0 : i32
    %c0_i32_0 = arith.constant 0 : i32
    %c0_i32_1 = arith.constant 0 : i32
    return %c0_i32, %c0_i32_0 : i32, i32
  }
  func.func @transform_3(%arg0: i32) -> (i32, i32, i32) {
    %c0_i32 = arith.constant 0 : i32
    %c0_i32_0 = arith.constant 0 : i32
    %c0_i32_1 = arith.constant 0 : i32
    return %arg0, %c0_i32, %c0_i32_0 : i32, i32, i32
  }
}

module attributes {stable_mosaic.version = 11 : i64} {
  func.func @conv_apply_kernel(%arg0: i32, %arg1: memref<1x63x576xbf16, #tpu.memory_space<vmem>>, %arg2: memref<576x128xbf16, #tpu.memory_space<vmem>>, %arg3: memref<1x128xf32, #tpu.memory_space<vmem>>, %arg4: memref<1x128xf32, #tpu.memory_space<vmem>>, %arg5: memref<1x63x32xbf16, #tpu.memory_space<vmem>>) attributes {dimension_semantics = [#tpu.dimension_semantics<parallel>], iteration_bounds = array<i64: 2>, scalar_prefetch = 0 : i64, scratch_operands = 0 : i64, tpu.core_type = #tpu.core_type<tc>, window_params = [{transform_indices = @transform_0, window_bounds = array<i64: 1, 63, 576>}, {pipeline_mode = #tpu.pipeline_mode<synchronous>, transform_indices = @transform_1, window_bounds = array<i64: 576, 128>}, {pipeline_mode = #tpu.pipeline_mode<synchronous>, transform_indices = @transform_2, window_bounds = array<i64: 1, 128>}, {pipeline_mode = #tpu.pipeline_mode<synchronous>, transform_indices = @transform_3, window_bounds = array<i64: 1, 128>}, {transform_indices = @transform_4, window_bounds = array<i64: 1, 63, 32>}]} {
    %c0 = arith.constant 0 : index
    %c0_0 = arith.constant 0 : index
    %0 = vector.load %arg2[%c0, %c0_0] : memref<576x128xbf16, #tpu.memory_space<vmem>>, vector<576x128xbf16>
    %c0_1 = arith.constant 0 : index
    %c0_2 = arith.constant 0 : index
    %1 = vector.load %arg3[%c0_1, %c0_2] : memref<1x128xf32, #tpu.memory_space<vmem>>, vector<1x128xf32>
    %c0_3 = arith.constant 0 : index
    %c0_4 = arith.constant 0 : index
    %2 = vector.load %arg4[%c0_3, %c0_4] : memref<1x128xf32, #tpu.memory_space<vmem>>, vector<1x128xf32>
    %c0_5 = arith.constant 0 : index
    %c0_6 = arith.constant 0 : index
    %c0_7 = arith.constant 0 : index
    %3 = vector.load %arg1[%c0_5, %c0_6, %c0_7] : memref<1x63x576xbf16, #tpu.memory_space<vmem>>, vector<1x63x576xbf16>
    %4 = vector.shape_cast %3 : vector<1x63x576xbf16> to vector<63x576xbf16>
    %cst = arith.constant dense<0.000000e+00> : vector<63x128xf32>
    %5 = tpu.matmul %4, %0, %cst {dimension_numbers = #tpu.dot_dimension_numbers<[1], [0], [0], [1], [0, 0, 1, 1], [], []>} : vector<63x576xbf16>, vector<576x128xbf16>, vector<63x128xf32> -> vector<63x128xf32>
    %6 = vector.broadcast %1 : vector<1x128xf32> to vector<63x128xf32>
    %7 = arith.mulf %5, %6 : vector<63x128xf32>
    %8 = vector.broadcast %2 : vector<1x128xf32> to vector<63x128xf32>
    %9 = arith.addf %7, %8 : vector<63x128xf32>
    %cst_8 = arith.constant 0.000000e+00 : f32
    %10 = vector.broadcast %cst_8 : f32 to vector<63x128xf32>
    %11 = arith.maximumf %9, %10 : vector<63x128xf32>
    %12 = vector.extract_strided_slice %11 {offsets = [0, 0], sizes = [63, 32], strides = [1, 1]} : vector<63x128xf32> to vector<63x32xf32>
    %13 = vector.extract_strided_slice %11 {offsets = [0, 32], sizes = [63, 32], strides = [1, 1]} : vector<63x128xf32> to vector<63x32xf32>
    %14 = arith.maximumf %12, %13 : vector<63x32xf32>
    %15 = vector.extract_strided_slice %11 {offsets = [0, 64], sizes = [63, 32], strides = [1, 1]} : vector<63x128xf32> to vector<63x32xf32>
    %16 = vector.extract_strided_slice %11 {offsets = [0, 96], sizes = [63, 32], strides = [1, 1]} : vector<63x128xf32> to vector<63x32xf32>
    %17 = arith.maximumf %15, %16 : vector<63x32xf32>
    %18 = arith.maximumf %14, %17 : vector<63x32xf32>
    %19 = arith.truncf %18 : vector<63x32xf32> to vector<63x32xbf16>
    %c0_9 = arith.constant 0 : index
    %c0_10 = arith.constant 0 : index
    %c0_11 = arith.constant 0 : index
    %20 = vector.load %arg5[%c0_9, %c0_10, %c0_11] : memref<1x63x32xbf16, #tpu.memory_space<vmem>>, vector<1x63x32xbf16>
    %21 = vector.shape_cast %20 : vector<1x63x32xbf16> to vector<63x32xbf16>
    %22 = vector.shape_cast %19 : vector<63x32xbf16> to vector<1x63x32xbf16>
    tpu.vector_store %arg5[%c0_9, %c0_10, %c0_11], %22 {strides = array<i32>} : memref<1x63x32xbf16, #tpu.memory_space<vmem>>, vector<1x63x32xbf16>,
    return
  }
  func.func @transform_0(%arg0: i32) -> (i32, i32, i32) {
    %c0_i32 = arith.constant 0 : i32
    %c0_i32_0 = arith.constant 0 : i32
    %c0_i32_1 = arith.constant 0 : i32
    return %arg0, %c0_i32, %c0_i32_0 : i32, i32, i32
  }
  func.func @transform_1(%arg0: i32) -> (i32, i32) {
    %c0_i32 = arith.constant 0 : i32
    %c0_i32_0 = arith.constant 0 : i32
    %c0_i32_1 = arith.constant 0 : i32
    return %c0_i32, %c0_i32_0 : i32, i32
  }
  func.func @transform_2(%arg0: i32) -> (i32, i32) {
    %c0_i32 = arith.constant 0 : i32
    %c0_i32_0 = arith.constant 0 : i32
    %c0_i32_1 = arith.constant 0 : i32
    return %c0_i32, %c0_i32_0 : i32, i32
  }
  func.func @transform_3(%arg0: i32) -> (i32, i32) {
    %c0_i32 = arith.constant 0 : i32
    %c0_i32_0 = arith.constant 0 : i32
    %c0_i32_1 = arith.constant 0 : i32
    return %c0_i32, %c0_i32_0 : i32, i32
  }
  func.func @transform_4(%arg0: i32) -> (i32, i32, i32) {
    %c0_i32 = arith.constant 0 : i32
    %c0_i32_0 = arith.constant 0 : i32
    %c0_i32_1 = arith.constant 0 : i32
    return %arg0, %c0_i32, %c0_i32_0 : i32, i32, i32
  }
}

module attributes {stable_mosaic.version = 11 : i64} {
  func.func @fc_logsoftmax_kernel(%arg0: i32, %arg1: memref<2x2016xbf16, #tpu.memory_space<vmem>>, %arg2: memref<2016x10xbf16, #tpu.memory_space<vmem>>, %arg3: memref<1x10xf32, #tpu.memory_space<vmem>>, %arg4: memref<2x10xf32, #tpu.memory_space<vmem>>) attributes {dimension_semantics = [#tpu.dimension_semantics<arbitrary>], iteration_bounds = array<i64: 1>, scalar_prefetch = 0 : i64, scratch_operands = 0 : i64, tpu.core_type = #tpu.core_type<tc>, window_params = [{pipeline_mode = #tpu.pipeline_mode<synchronous>, transform_indices = @transform_0, window_bounds = array<i64: 2, 2016>}, {pipeline_mode = #tpu.pipeline_mode<synchronous>, transform_indices = @transform_1, window_bounds = array<i64: 2016, 10>}, {pipeline_mode = #tpu.pipeline_mode<synchronous>, transform_indices = @transform_2, window_bounds = array<i64: 1, 10>}, {pipeline_mode = #tpu.pipeline_mode<synchronous>, transform_indices = @transform_3, window_bounds = array<i64: 2, 10>}]} {
    %c0 = arith.constant 0 : index
    %c0_0 = arith.constant 0 : index
    %0 = vector.load %arg1[%c0, %c0_0] : memref<2x2016xbf16, #tpu.memory_space<vmem>>, vector<2x2016xbf16>
    %c0_1 = arith.constant 0 : index
    %c0_2 = arith.constant 0 : index
    %1 = vector.load %arg2[%c0_1, %c0_2] : memref<2016x10xbf16, #tpu.memory_space<vmem>>, vector<2016x10xbf16>
    %cst = arith.constant dense<0.000000e+00> : vector<2x10xf32>
    %2 = tpu.matmul %0, %1, %cst {dimension_numbers = #tpu.dot_dimension_numbers<[1], [0], [0], [1], [0, 0, 1, 1], [], []>} : vector<2x2016xbf16>, vector<2016x10xbf16>, vector<2x10xf32> -> vector<2x10xf32>
    %c0_3 = arith.constant 0 : index
    %c0_4 = arith.constant 0 : index
    %3 = vector.load %arg3[%c0_3, %c0_4] : memref<1x10xf32, #tpu.memory_space<vmem>>, vector<1x10xf32>
    %4 = vector.broadcast %3 : vector<1x10xf32> to vector<2x10xf32>
    %5 = arith.addf %2, %4 : vector<2x10xf32>
    %cst_5 = arith.constant dense<0xFF800000> : vector<10xf32>
    %6 = vector.multi_reduction <maximumf>, %5, %cst_5 [0] : vector<2x10xf32> to vector<10xf32>
    %7 = vector.shape_cast %6 : vector<10xf32> to vector<1x10xf32>
    %8 = vector.broadcast %7 : vector<1x10xf32> to vector<2x10xf32>
    %9 = arith.subf %5, %8 : vector<2x10xf32>
    %10 = math.exp %9 : vector<2x10xf32>
    %cst_6 = arith.constant dense<0.000000e+00> : vector<10xf32>
    %11 = vector.multi_reduction <add>, %10, %cst_6 [0] : vector<2x10xf32> to vector<10xf32>
    %12 = vector.shape_cast %11 : vector<10xf32> to vector<1x10xf32>
    %13 = math.log %12 : vector<1x10xf32>
    %14 = arith.addf %7, %13 : vector<1x10xf32>
    %15 = vector.broadcast %14 : vector<1x10xf32> to vector<2x10xf32>
    %16 = arith.subf %5, %15 : vector<2x10xf32>
    %c0_7 = arith.constant 0 : index
    %c0_8 = arith.constant 0 : index
    %17 = vector.load %arg4[%c0_7, %c0_8] : memref<2x10xf32, #tpu.memory_space<vmem>>, vector<2x10xf32>
    tpu.vector_store %arg4[%c0_7, %c0_8], %16 {strides = array<i32>} : memref<2x10xf32, #tpu.memory_space<vmem>>, vector<2x10xf32>,
    return
  }
  func.func @transform_0(%arg0: i32) -> (i32, i32) {
    %c0_i32 = arith.constant 0 : i32
    %c0_i32_0 = arith.constant 0 : i32
    %c0_i32_1 = arith.constant 0 : i32
    return %c0_i32, %c0_i32_0 : i32, i32
  }
  func.func @transform_1(%arg0: i32) -> (i32, i32) {
    %c0_i32 = arith.constant 0 : i32
    %c0_i32_0 = arith.constant 0 : i32
    %c0_i32_1 = arith.constant 0 : i32
    return %c0_i32, %c0_i32_0 : i32, i32
  }
  func.func @transform_2(%arg0: i32) -> (i32, i32) {
    %c0_i32 = arith.constant 0 : i32
    %c0_i32_0 = arith.constant 0 : i32
    %c0_i32_1 = arith.constant 0 : i32
    return %c0_i32, %c0_i32_0 : i32, i32
  }
  func.func @transform_3(%arg0: i32) -> (i32, i32) {
    %c0_i32 = arith.constant 0 : i32
    %c0_i32_0 = arith.constant 0 : i32
    %c0_i32_1 = arith.constant 0 : i32
    return %c0_i32, %c0_i32_0 : i32, i32
  }
}

</mosaic_0001>

<bundles_post_ra>
// kernel: tile.23
= control target key start
LH: loop header
LB: loop body
LE: loop exit
PB: predicated region body
PF: predicated region fallthrough
CT: control target
= control target key end

     0   :  { %s22_s0 = inlined_call_operand.vmem [shape: f32[16], index: 0, kind: input, shape index: {}]   ;;  %s23_s1 = inlined_call_operand.vmem [shape: f32[4,16], index: 1, kind: output, shape index: {}]  }
   0x1   :  { %v4_v0 = vld [vmem:[%s22_s0] ss:$0 sm:$0xff] }
   0x2   :  { %5 = vst [vmem:[%s23_s1] sm:$0xf] %v4_v0 }

// kernel: tile.24
= control target key start
LH: loop header
LB: loop body
LE: loop exit
PB: predicated region body
PF: predicated region fallthrough
CT: control target
= control target key end

     0   :  { %vm7_vm0 = vcmask 130048   ;;  %s37_s8 = smov 16   ;;  %s38_s9 = smov 32   ;;  %vm13_vm1 = vcmask 523648   ;;  %vm19_vm2 = vcmask 392448   ;;  %vm25_vm3 = vcmask 261248   ;;  %s55_s0 = inlined_call_operand.vmem [shape: f32[4,16], index: 0, kind: input, shape index: {}]   ;;  %s56_s1 = inlined_call_operand.vmem [shape: f32[1,64], index: 1, kind: output, shape index: {}]  }
   0x1   :  { %v4_v0 = vld [vmem:[%s55_s0] sm:$0xf]  ;;  %s36_s0 = smov 48  }
   0x2   :  { %5 = vst [vmem:[#allocation1] sm:$0xf] %v4_v0 }
   0x9   :  { %v10_v1 = vld [vmem:[#allocation1 + $0x3] sm:$0x1]   ;;  %v22_v2 = vld [vmem:[#allocation1 + $0x1] sm:$0x1]   ;;  %v6_v3 = vld [vmem:[#allocation1] sm:$0x1]  }
   0xa   :  { %11 = vrot.lane.b32.xlu0 %v10_v1, %s36_s0  ;;  %23 = vrot.lane.b32.xlu1 %v22_v2, %s37_s8  ;;  %v16_v4 = vld [vmem:[#allocation1 + $0x2] sm:$0x1]   ;;  %8 = vst.msk [vmem:[#allocation0] sm:$0x1] %vm7_vm0, %v6_v3  }
   0xe   :  { %17 = vrot.lane.b32.xlu0 %v16_v4, %s38_s9 }
  0x7c   :  { %v12_v5 = vpop.permute.xlu0 %11   ;;  %v24_v6 = vpop.permute.xlu1 %23  }
  0x7d   :  { %14 = vst.msk [vmem:[#allocation0] sm:$0x1] %vm13_vm1, %v12_v5  }
  0x80   :  { %v18_v7 = vpop.permute.xlu0 %17  }
  0x81   :  { %20 = vst.msk [vmem:[#allocation0] sm:$0x1] %vm19_vm2, %v18_v7  }
  0x82   :  { %26 = vst.msk [vmem:[#allocation0] sm:$0x1] %vm25_vm3, %v24_v6  }
  0x89   :  { %v30_v8 = vld [vmem:[#allocation0] sm:$0x1] }
  0x8a   :  { %32 = vst [vmem:[%s56_s1] sm:$0x1] %v30_v8 }

// kernel: convnet_forward.5
= control target key start
LH: loop header
LB: loop body
LE: loop exit
PB: predicated region body
PF: predicated region fallthrough
CT: control target
= control target key end

     0   :  { %s1042_s12 = smov 0   ;;  %s1293_s0 = inlined_call_operand.vmem [shape: bf16[2,224,36], index: 0, kind: input, shape index: {}]   ;;  %s1294_s1 = inlined_call_operand.vmem [shape: bf16[36,64], index: 1, kind: input, shape index: {}]   ;;  %s1295_s2 = inlined_call_operand.vmem [shape: f32[224,1], index: 2, kind: input, shape index: {}]   ;;  %s1296_s3 = inlined_call_operand.vmem [shape: f32[2,2,64], index: 3, kind: output, shape index: {}]  }
   0x1 LB: > { %s885_s13 = sadd.s32 4294967295, %s1019_s12   ;;  %p889_p0 = scmp.ge.s32.totalorder %s1019_s12, 1  ;;  %s1019_s12 = sphi %s1042_s12, %s13_s12  }
   0x2   : > { %p137_p1 = scmp.lt.s32.totalorder %s1019_s12, 3 }
   0x4   : > { %p138_p2 = pnand %p889_p0, %p137_p1 }
   0x5   : > { %v996_v0 = vld [vmem:[%s1294_s1] sm:$0xff] (!%p138_p2)   ;;  %v997_v1 = vld [vmem:[%s1294_s1 + $0x8] sm:$0xff] (!%p138_p2)   ;;  %p160_p3 = scmp.lt.s32.totalorder (!%p138_p2), %s885_s13, 1  ;;  %v177_v3 = vld [vmem:[%s1295_s2 + $0x10] sm:$0xff] (!%p138_p2)  ;;  %vm359_vm0 = vcmask (!%p138_p2), 1041408   ;;  %v1021_v5 = vmov (!%p138_p2), 0  }
   0x6   : > { %141 = sbr.rel (%p138_p2) target bundleno = 306 (0x132), region = 32  ;;  %942 = vmatprep.subr.bf16.mxu0 (!%p138_p2), %v996_v0  ;;  %976 = vmatprep.subr.bf16.mxu1 (!%p138_p2), %v996_v0  ;;  %v175_v2 = vld [vmem:[%s1295_s2] sm:$0xff] (!%p138_p2)  ;;  %v998_v4 = vld [vmem:[%s1294_s1 + $0x10] ss:$0 sps:$4 sm:$0x33] (!%p138_p2)   ;;  %vm316_vm1 = vcmask (!%p138_p2), 293888  }
   0x7   : > { %943 = vmatpush3.bf16.msra.mxu0 (!%p138_p2), %v996_v0  ;;  %979 = vmatpush3.bf16.msra.mxu1 (!%p138_p2), %v996_v0  ;;  %v176_v6 = vld [vmem:[%s1295_s2 + $0x8] sm:$0xff] (!%p138_p2)  ;;  %v178_v7 = vld [vmem:[%s1295_s2 + $0x18] sm:$0xff] (!%p138_p2)  ;;  %v361_v8 = vsel (!%p138_p2), %vm359_vm0, %v998_v4, 0  ;;  %v179_v13 = vld [vmem:[%s1295_s2 + $0x20] sm:$0xff] (!%p138_p2)  ;;  %vm676_vm2 = vcmask (!%p138_p2), 523264   ;;  %vm829_vm3 = vcmask (!%p138_p2), 516096  }
   0x8   : > { %944 = vmatprep.subr.bf16.mxu0 (!%p138_p2), %v997_v1  ;;  %977 = vmatprep.subr.bf16.mxu1 (!%p138_p2), %v997_v1  ;;  %v180_v14 = vld [vmem:[%s1295_s2 + $0x28] sm:$0xff] (!%p138_p2)  ;;  %v181_v17 = vld [vmem:[%s1295_s2 + $0x30] sm:$0xff] (!%p138_p2)  ;;  %v182_v18 = vld [vmem:[%s1295_s2 + $0x38] sm:$0xff] (!%p138_p2) }
   0x9   : > { %994 = vset.pattern.permute.xlu0 (!%p138_p2), %v1021_v5  ;;  %995 = vset.pattern.permute.xlu1 (!%p138_p2), %v1021_v5  ;;  %v183_v23 = vld [vmem:[%s1295_s2 + $0x40] sm:$0xff] (!%p138_p2)  ;;  %v184_v24 = vld [vmem:[%s1295_s2 + $0x48] sm:$0xff] (!%p138_p2)  ;;  %v185_v25 = vld [vmem:[%s1295_s2 + $0x50] sm:$0xff] (!%p138_p2) }
   0xa   : > { %510 = vperm.xlu0 (!%p138_p2), %994, %v175_v2   ;;  %520 = vperm.xlu1 (!%p138_p2), %995, %v177_v3   ;;  %v186_v26 = vld [vmem:[%s1295_s2 + $0x58] sm:$0xff] (!%p138_p2)  ;;  %v187_v30 = vld [vmem:[%s1295_s2 + $0x60] sm:$0xff] (!%p138_p2)  ;;  %v188_v31 = vld [vmem:[%s1295_s2 + $0x68] sm:$0xff] (!%p138_p2) }
   0xb   : > { %945 = vmatpush3.bf16.msra.mxu0 (!%p138_p2), %v997_v1  ;;  %980 = vmatpush3.bf16.msra.mxu1 (!%p138_p2), %v997_v1  ;;  %v189_v32 = vld [vmem:[%s1295_s2 + $0x70] sm:$0xff] (!%p138_p2)  ;;  %v190_v33 = vld [vmem:[%s1295_s2 + $0x78] sm:$0xff] (!%p138_p2)  ;;  %v191_v35 = vld [vmem:[%s1295_s2 + $0x80] sm:$0xff] (!%p138_p2) }
   0xc   : > { %982 = vmatprep.subr.msk.bf16.mxu0 (!%p138_p2), %vm359_vm0, %v998_v4  ;;  %983 = vmatprep.subr.msk.bf16.mxu1 (!%p138_p2), %vm359_vm0, %v998_v4  ;;  %v192_v36 = vld [vmem:[%s1295_s2 + $0x88] sm:$0xff] (!%p138_p2)  ;;  %v193_v37 = vld [vmem:[%s1295_s2 + $0x90] sm:$0xff] (!%p138_p2)  ;;  %v194_v38 = vld [vmem:[%s1295_s2 + $0x98] sm:$0xff] (!%p138_p2) }
   0xd   : > { %s1298_s13 = smov (!%p160_p3, %s885_s13), 1  ;;  %v195_v39 = vld [vmem:[%s1295_s2 + $0xa0] sm:$0xff]  ;;  %v196_v40 = vld [vmem:[%s1295_s2 + $0xa8] sm:$0xff]  ;;  %v197_v41 = vld [vmem:[%s1295_s2 + $0xb0] sm:$0xff] }
   0xe   : > { %s984_s24 = smul.u32 112, %s1298_s13  ;;  %515 = vperm.xlu0 %994, %v176_v6   ;;  %525 = vperm.xlu1 %995, %v178_v7   ;;  %v198_v42 = vld [vmem:[%s1295_s2 + $0xb8] sm:$0xff]  ;;  %v199_v43 = vld [vmem:[%s1295_s2 + $0xc0] sm:$0xff]  ;;  %v200_v44 = vld [vmem:[%s1295_s2 + $0xc8] sm:$0xff]  ;;  %s891_s4 = sshll.u32 %s1298_s13, 1 }
   0xf   : > { %947 = vmatpush3.bf16.msra.mxu0 %v361_v8  ;;  %981 = vmatpush3.bf16.msra.mxu1 %v361_v8  ;;  %v201_v45 = vld [vmem:[%s1295_s2 + $0xd0] sm:$0xff]  ;;  %v202_v46 = vld [vmem:[%s1295_s2 + $0xd8] sm:$0xff]  ;;  %s168_s7 = scalar_lea.vmem %s1296_s3, %s891_s4 }
  0x10   : > { %s1071_s27 = scalar_lea.vmem %s1293_s0, %s984_s24 }
  0x11   : > { %v999_v9 = vld [vmem:[%s1071_s27] sm:$0xff]   ;;  %v1001_v11 = vld [vmem:[%s1071_s27 + $0x8] sm:$0xff]   ;;  %v1003_v15 = vld [vmem:[%s1071_s27 + $0x10] sm:$0xff]  }
  0x12   : > { %v1000_v10 = vld [vmem:[%s1071_s27 + $0x40] sm:$0xff]   ;;  %948 = vmatprep.mubr.msk.bf16.mxu0 %vm316_vm1, %v999_v9  ;;  %v1002_v12 = vld [vmem:[%s1071_s27 + $0x48] sm:$0xff]   ;;  %v1004_v16 = vld [vmem:[%s1071_s27 + $0x50] sm:$0xff]   ;;  %530 = vperm.xlu0 %994, %v179_v13  }
  0x13   : > { %964 = vmatprep.mubr.msk.bf16.mxu1 %vm316_vm1, %v1000_v10  ;;  %949 = vmatmul.mubr.msk.bf16.vlgmr.msra.gmra.mrb[0].mxu0 %vm316_vm1, %v1001_v11  ;;  %v1005_v19 = vld [vmem:[%s1071_s27 + $0x18] sm:$0xff]   ;;  %v1007_v21 = vld [vmem:[%s1071_s27 + $0x20] sm:$0xff]   ;;  %v1009_v27 = vld [vmem:[%s1071_s27 + $0x28] sm:$0xff]  }
  0x14   : > { %965 = vmatmul.mubr.msk.bf16.vlgmr.msra.gmra.mrb[0].mxu1 %vm316_vm1, %v1002_v12  ;;  %952 = vmatprep.mubr.msk.bf16.mxu0 %vm316_vm1, %v1003_v15  ;;  %v1006_v20 = vld [vmem:[%s1071_s27 + $0x58] sm:$0xff]   ;;  %v1008_v22 = vld [vmem:[%s1071_s27 + $0x60] sm:$0xff]   ;;  %v1010_v28 = vld [vmem:[%s1071_s27 + $0x68] sm:$0xff]  }
  0x15   : > { %968 = vmatprep.mubr.msk.bf16.mxu1 %vm316_vm1, %v1004_v16  ;;  %535 = vperm.xlu1 %995, %v180_v14   ;;  %v1011_v29 = vld [vmem:[%s1071_s27 + $0x30] sm:$0xff]   ;;  %v1012_v34 = vld [vmem:[%s1071_s27 + $0x38] sm:$0xff]  }
  0x16   : > { %540 = vperm.xlu0 %994, %v181_v17  }
  0x19   : > { %545 = vperm.xlu1 %995, %v182_v18  }
  0x1a   : > { %550 = vperm.xlu0 %994, %v183_v23  }
  0x1b   : > { %953 = vmatmul.mubr.msk.bf16.gmra.mrb[4].mxu0 %vm316_vm1, %v1005_v19 }
  0x1c   : > { %969 = vmatmul.mubr.msk.bf16.gmra.mrb[4].mxu1 %vm316_vm1, %v1006_v20  ;;  %956 = vmatprep.mubr.msk.bf16.mxu0 %vm316_vm1, %v1007_v21 }
  0x1d   : > { %972 = vmatprep.mubr.msk.bf16.mxu1 %vm316_vm1, %v1008_v22  ;;  %555 = vperm.xlu1 %995, %v184_v24  }
  0x1e   : > { %560 = vperm.xlu0 %994, %v185_v25  }
  0x21   : > { %565 = vperm.xlu1 %995, %v186_v26  }
  0x22   : > { %570 = vperm.xlu0 %994, %v187_v30  }
  0x23   : > { %957 = vmatmul.mubr.msk.bf16.gmra.mrb[8].mxu0 %vm316_vm1, %v1009_v27 }
  0x24   : > { %973 = vmatmul.mubr.msk.bf16.gmra.mrb[8].mxu1 %vm316_vm1, %v1010_v28  ;;  %960 = vmatprep.mubr.msk.bf16.mxu0 %vm316_vm1, %v1011_v29 }
  0x25   : > { %575 = vperm.xlu1 %995, %v188_v31  }
  0x26   : > { %580 = vperm.xlu0 %994, %v189_v32  }
  0x29   : > { %585 = vperm.xlu1 %995, %v190_v33  }
  0x2a   : > { %590 = vperm.xlu0 %994, %v191_v35  }
  0x2b   : > { %961 = vmatmul.mubr.msk.bf16.gmra.mrb[12].mxu0 %vm316_vm1, %v1012_v34 }
  0x2d   : > { %595 = vperm.xlu1 %995, %v192_v36  }
  0x2e   : > { %600 = vperm.xlu0 %994, %v193_v37  }
  0x31   : > { %605 = vperm.xlu1 %995, %v194_v38  }
  0x32   : > { %610 = vperm.xlu0 %994, %v195_v39  }
  0x35   : > { %615 = vperm.xlu1 %995, %v196_v40  }
  0x36   : > { %620 = vperm.xlu0 %994, %v197_v41  }
  0x39   : > { %625 = vperm.xlu1 %995, %v198_v42  }
  0x3a   : > { %630 = vperm.xlu0 %994, %v199_v43  }
  0x3d   : > { %635 = vperm.xlu1 %995, %v200_v44  }
  0x3e   : > { %640 = vperm.xlu0 %994, %v201_v45  }
  0x41   : > { %645 = vperm.xlu1 %995, %v202_v46  }
  0x89   : > { %v511_v47 = vpop.permute.xlu0 %510  ;;  %v521_v48 = vpop.permute.xlu1 %520 }
  0x8d   : > { %v516_v49 = vpop.permute.xlu0 %515  ;;  %v526_v50 = vpop.permute.xlu1 %525 }
  0x91   : > { %v531_v51 = vpop.permute.xlu0 %530 }
  0x94   : > { %v536_v52 = vpop.permute.xlu1 %535 }
  0x95   : > { %v541_v53 = vpop.permute.xlu0 %540 }
  0x98   : > { %v546_v54 = vpop.permute.xlu1 %545 }
  0x99   : > { %v1179_v55 = vpop.permute.xlu0 %550 }
  0x9c   : > { %v1181_v56 = vpop.permute.xlu1 %555 }
  0x9d   : > { %v1183_v57 = vpop.permute.xlu0 %560 }
  0xa0   : > { %v1193_v7 = vpop.permute.xlu1 %565 }
  0xa1   : > { %v1195_v8 = vpop.permute.xlu0 %570 }
  0xa4   : > { %v576_v38 = vpop.permute.xlu1 %575 }
  0xa5   : > { %v581_v39 = vpop.permute.xlu0 %580 }
  0xe6   : > { %v950_v58 = vpop.f32.mrb[0].mxu0 }
  0xe7   : > { %v1185_v59 = vpop.f32.mrb[0].mxu1  ;;  %v397_v60 = vpop.f32.mrb[1].mxu0  ;;  %v650_v3 = vmul.f32 %v950_v58, %v521_v48 }
  0xe8   : > { %v1187_v61 = vpop.f32.mrb[1].mxu1  ;;  %v648_v62 = vmul.f32 %v511_v47, %v397_v60  ;;  %v951_v63 = vpop.f32.mrb[2].mxu0 }
  0xe9   : > { %v1189_v0 = vpop.f32.mrb[2].mxu1  ;;  %v400_v1 = vpop.f32.mrb[3].mxu0  ;;  %v651_v5 = vmul.f32 %v951_v63, %v526_v50  ;;  %v741_v9 = vmul.f32 %v650_v3, %v650_v3  ;;  %v680_v15 = vsel %vm676_vm2, %v650_v3, 0.0 }
  0xea   : > { %v1191_v2 = vpop.f32.mrb[3].mxu1  ;;  %v739_v4 = vmul.f32 %v648_v62, %v648_v62  ;;  %v649_v6 = vmul.f32 %v516_v49, %v400_v1  ;;  %v677_v10 = vsel %vm676_vm2, %v648_v62, 0.0  ;;  %v586_v1 = vpop.permute.xlu1 %585 }
  0xeb   : > { %v742_v20 = vmul.f32 %v651_v5, %v651_v5  ;;  %v770_v29 = vsel %vm676_vm2, %v741_v9, 0.0  ;;  %v682_v30 = vsel %vm676_vm2, %v651_v5, 0.0 }
  0xec   : > { %v678_v11 = vsel %vm676_vm2, %v649_v6, 0.0  ;;  %v740_v12 = vmul.f32 %v649_v6, %v649_v6  ;;  %v767_v19 = vsel %vm676_vm2, %v739_v4, 0.0 }
  0xed   : > { %v679_v16 = vadd.f32 %v678_v11, %v677_v10  ;;  %v772_v35 = vsel %vm676_vm2, %v742_v20, 0.0 }
  0xee   : > { %v954_v13 = vpop.f32.mrb[4].mxu0  ;;  %v768_v21 = vsel %vm676_vm2, %v740_v12, 0.0 }
  0xef   : > { %v1199_v14 = vpop.f32.mrb[4].mxu1  ;;  %v413_v17 = vpop.f32.mrb[5].mxu0  ;;  %v681_v25 = vadd.f32 %v680_v15, %v679_v16  ;;  %v769_v26 = vadd.f32 %v768_v21, %v767_v19  ;;  %v654_v36 = vmul.f32 %v954_v13, %v541_v53 }
  0xf0   : > { %v1202_v18 = vpop.f32.mrb[5].mxu1  ;;  %v652_v22 = vmul.f32 %v531_v51, %v413_v17  ;;  %v955_v23 = vpop.f32.mrb[6].mxu0 }
  0xf1   : > { %v1206_v24 = vpop.f32.mrb[6].mxu1  ;;  %v416_v27 = vpop.f32.mrb[7].mxu0  ;;  %v771_v33 = vadd.f32 %v770_v29, %v769_v26  ;;  %v683_v34 = vadd.f32 %v682_v30, %v681_v25  ;;  %v655_v45 = vmul.f32 %v955_v23, %v546_v54  ;;  %v745_v49 = vmul.f32 %v654_v36, %v654_v36 }
  0xf2   : > { %v1208_v28 = vpop.f32.mrb[7].mxu1  ;;  %v684_v31 = vsel %vm676_vm2, %v652_v22, 0.0  ;;  %v743_v32 = vmul.f32 %v652_v22, %v652_v22  ;;  %v653_v46 = vmul.f32 %v536_v52, %v416_v27  ;;  %v688_v3 = vsel %vm676_vm2, %v654_v36, 0.0  ;;  %v591_v19 = vpop.permute.xlu0 %590 }
  0xf3   : > { %v685_v40 = vadd.f32 %v684_v31, %v683_v34  ;;  %v773_v41 = vadd.f32 %v772_v35, %v771_v33  ;;  %v746_v4 = vmul.f32 %v655_v45, %v655_v45  ;;  %v778_v5 = vsel %vm676_vm2, %v745_v49, 0.0 }
  0xf4   : > { %v774_v37 = vsel %vm676_vm2, %v743_v32, 0.0  ;;  %v686_v53 = vsel %vm676_vm2, %v653_v46, 0.0  ;;  %v744_v58 = vmul.f32 %v653_v46, %v653_v46  ;;  %v690_v10 = vsel %vm676_vm2, %v655_v45, 0.0 }
  0xf5   : > { %v775_v44 = vadd.f32 %v774_v37, %v773_v41  ;;  %v687_v63 = vadd.f32 %v686_v53, %v685_v40  ;;  %v780_v20 = vsel %vm676_vm2, %v746_v4, 0.0 }
  0xf6   : > { %v958_v42 = vpop.f32.mrb[8].mxu0  ;;  %v776_v52 = vsel %vm676_vm2, %v744_v58, 0.0  ;;  %v601_v40 = vpop.permute.xlu0 %600 }
  0xf7   : > { %v1215_v43 = vpop.f32.mrb[8].mxu1  ;;  %v429_v47 = vpop.f32.mrb[9].mxu0  ;;  %v689_v6 = vadd.f32 %v688_v3, %v687_v63  ;;  %v777_v9 = vadd.f32 %v776_v52, %v775_v44  ;;  %v658_v11 = vmul.f32 %v958_v42, %v1183_v57 }
  0xf8   : > { %v1217_v48 = vpop.f32.mrb[9].mxu1  ;;  %v959_v50 = vpop.f32.mrb[10].mxu0  ;;  %v656_v54 = vmul.f32 %v1179_v55, %v429_v47 }
  0xf9   : > { %v1219_v51 = vpop.f32.mrb[10].mxu1  ;;  %v432_v60 = vpop.f32.mrb[11].mxu0  ;;  %v779_v15 = vadd.f32 %v778_v5, %v777_v9  ;;  %v691_v16 = vadd.f32 %v690_v10, %v689_v6  ;;  %v659_v55 = vmul.f32 %v959_v50, %v1193_v7  ;;  %v749_v29 = vmul.f32 %v658_v11, %v658_v11 }
  0xfa   : > { %v1222_v62 = vpop.f32.mrb[11].mxu1  ;;  %v692_v12 = vsel %vm676_vm2, %v656_v54, 0.0  ;;  %v747_v13 = vmul.f32 %v656_v54, %v656_v54  ;;  %v657_v26 = vmul.f32 %v1181_v56, %v432_v60  ;;  %v596_v57 = vpop.permute.xlu1 %595  ;;  %v696_v36 = vsel %vm676_vm2, %v658_v11, 0.0 }
  0xfb   : > { %v693_v23 = vadd.f32 %v692_v12, %v691_v16  ;;  %v781_v25 = vadd.f32 %v780_v20, %v779_v15  ;;  %v750_v34 = vmul.f32 %v659_v55, %v659_v55  ;;  %v786_v41 = vsel %vm676_vm2, %v749_v29, 0.0  ;;  %v611_v9 = vpop.permute.xlu0 %610 }
  0xfc   : > { %v782_v21 = vsel %vm676_vm2, %v747_v13, 0.0  ;;  %v694_v32 = vsel %vm676_vm2, %v657_v26, 0.0  ;;  %v748_v33 = vmul.f32 %v657_v26, %v657_v26  ;;  %v698_v56 = vsel %vm676_vm2, %v659_v55, 0.0 }
  0xfd   : > { %v783_v31 = vadd.f32 %v782_v21, %v781_v25  ;;  %v695_v35 = vadd.f32 %v694_v32, %v693_v23  ;;  %v788_v53 = vsel %vm676_vm2, %v750_v34, 0.0  ;;  %v664_v5 = vmul.f32 %v591_v19, %v1187_v61 }
  0xfe   : > { %v962_v17 = vpop.f32.mrb[12].mxu0  ;;  %v784_v37 = vsel %vm676_vm2, %v748_v33, 0.0  ;;  %v606_v50 = vpop.permute.xlu1 %605  ;;  %v665_v11 = vmul.f32 %v596_v57, %v1191_v2 }
  0xff   : > { %v445_v22 = vpop.f32.mrb[13].mxu0  ;;  %v697_v42 = vadd.f32 %v696_v36, %v695_v35  ;;  %v785_v44 = vadd.f32 %v784_v37, %v783_v31  ;;  %v662_v45 = vmul.f32 %v962_v17, %v581_v39  ;;  %v666_v17 = vmul.f32 %v1185_v59, %v601_v40  ;;  %v621_v26 = vpop.permute.xlu0 %620 }
 0x100   : > { %v963_v27 = vpop.f32.mrb[14].mxu0  ;;  %v660_v7 = vmul.f32 %v1195_v8, %v445_v22  ;;  %v755_v20 = vmul.f32 %v664_v5, %v664_v5  ;;  %v708_v22 = vsel %vm676_vm2, %v664_v5, 0.0  ;;  %v667_v23 = vmul.f32 %v1189_v0, %v606_v50 }
 0x101   : > { %v448_v30 = vpop.f32.mrb[15].mxu0  ;;  %v787_v58 = vadd.f32 %v786_v41, %v785_v44  ;;  %v699_v60 = vadd.f32 %v698_v56, %v697_v42  ;;  %v663_v8 = vmul.f32 %v963_v27, %v586_v1  ;;  %v753_v39 = vmul.f32 %v662_v45, %v662_v45 }
 0x102   : > { %v700_v46 = vsel %vm676_vm2, %v660_v7, 0.0  ;;  %v751_v47 = vmul.f32 %v660_v7, %v660_v7  ;;  %v661_v49 = vmul.f32 %v576_v38, %v448_v30  ;;  %v704_v12 = vsel %vm676_vm2, %v662_v45, 0.0  ;;  %v616_v15 = vpop.permute.xlu1 %615 }
 0x103   : > { %v701_v52 = vadd.f32 %v700_v46, %v699_v60  ;;  %v789_v54 = vadd.f32 %v788_v53, %v787_v58  ;;  %v754_v13 = vmul.f32 %v663_v8, %v663_v8  ;;  %v794_v21 = vsel %vm676_vm2, %v753_v39, 0.0 }
 0x104   : > { %v790_v63 = vsel %vm676_vm2, %v751_v47, 0.0  ;;  %v702_v3 = vsel %vm676_vm2, %v661_v49, 0.0  ;;  %v752_v4 = vmul.f32 %v661_v49, %v661_v49  ;;  %v706_v61 = vsel %vm676_vm2, %v663_v8, 0.0 }
 0x105   : > { %v791_v38 = vadd.f32 %v790_v63, %v789_v54  ;;  %v703_v10 = vadd.f32 %v702_v3, %v701_v52  ;;  %v756_v2 = vmul.f32 %v665_v11, %v665_v11  ;;  %v796_v25 = vsel %vm676_vm2, %v754_v13, 0.0 }
 0x106   : > { %v792_v6 = vsel %vm676_vm2, %v752_v4, 0.0  ;;  %v757_v29 = vmul.f32 %v666_v17, %v666_v17  ;;  %v798_v59 = vsel %vm676_vm2, %v755_v20, 0.0  ;;  %v710_v30 = vsel %vm676_vm2, %v665_v11, 0.0  ;;  %v626_v32 = vpop.permute.xlu1 %625 }
 0x107   : > { %v705_v1 = vadd.f32 %v704_v12, %v703_v10  ;;  %v793_v16 = vadd.f32 %v792_v6, %v791_v38  ;;  %v668_v31 = vmul.f32 %v611_v9, %v1202_v18  ;;  %v712_v35 = vsel %vm676_vm2, %v666_v17, 0.0  ;;  %v631_v18 = vpop.permute.xlu0 %630 }
 0x108   : > { %v758_v36 = vmul.f32 %v667_v23, %v667_v23  ;;  %v800_v0 = vsel %vm676_vm2, %v756_v2, 0.0  ;;  %v669_v37 = vmul.f32 %v616_v15, %v1208_v28  ;;  %v802_v41 = vsel %vm676_vm2, %v757_v29, 0.0 }
 0x109   : > { %v707_v19 = vadd.f32 %v706_v61, %v705_v1  ;;  %v795_v55 = vadd.f32 %v794_v21, %v793_v16  ;;  %v714_v56 = vsel %vm676_vm2, %v667_v23, 0.0  ;;  %v670_v42 = vmul.f32 %v1199_v14, %v621_v26 }
 0x10a   : > { %v759_v44 = vmul.f32 %v668_v31, %v668_v31  ;;  %v804_v47 = vsel %vm676_vm2, %v758_v36, 0.0  ;;  %v716_v49 = vsel %vm676_vm2, %v668_v31, 0.0  ;;  %v671_v50 = vmul.f32 %v1206_v24, %v626_v32  ;;  %v636_v28 = vpop.permute.xlu1 %635 }
 0x10b   : > { %v709_v27 = vadd.f32 %v708_v22, %v707_v19  ;;  %v797_v57 = vadd.f32 %v796_v25, %v795_v55  ;;  %v760_v53 = vmul.f32 %v669_v37, %v669_v37  ;;  %v761_v63 = vmul.f32 %v670_v42, %v670_v42  ;;  %v641_v6 = vpop.permute.xlu0 %640 }
 0x10c   : > { %v806_v8 = vsel %vm676_vm2, %v759_v44, 0.0  ;;  %v718_v3 = vsel %vm676_vm2, %v669_v37, 0.0  ;;  %v672_v14 = vmul.f32 %v631_v18, %v1217_v48  ;;  %v720_v54 = vsel %vm676_vm2, %v670_v42, 0.0 }
 0x10d   : > { %v711_v33 = vadd.f32 %v710_v30, %v709_v27  ;;  %v799_v34 = vadd.f32 %v798_v59, %v797_v57  ;;  %v762_v5 = vmul.f32 %v671_v50, %v671_v50  ;;  %v808_v39 = vsel %vm676_vm2, %v760_v53, 0.0 }
 0x10e   : > { %v673_v24 = vmul.f32 %v636_v28, %v1222_v62  ;;  %v810_v10 = vsel %vm676_vm2, %v761_v63, 0.0  ;;  %v722_v11 = vsel %vm676_vm2, %v671_v50, 0.0  ;;  %v674_v12 = vmul.f32 %v1215_v43, %v641_v6  ;;  %v646_v48 = vpop.permute.xlu1 %645 }
 0x10f   : > { %v713_v7 = vadd.f32 %v712_v35, %v711_v33  ;;  %v801_v40 = vadd.f32 %v800_v0, %v799_v34  ;;  %v763_v13 = vmul.f32 %v672_v14, %v672_v14  ;;  %v812_v16 = vsel %vm676_vm2, %v762_v5, 0.0 }
 0x110   : > { %v724_v17 = vsel %vm676_vm2, %v672_v14, 0.0  ;;  %v675_v20 = vmul.f32 %v1219_v51, %v646_v48  ;;  %v764_v62 = vmul.f32 %v673_v24, %v673_v24  ;;  %v765_v19 = vmul.f32 %v674_v12, %v674_v12 }
 0x111   : > { %v715_v45 = vadd.f32 %v714_v56, %v713_v7  ;;  %v803_v46 = vadd.f32 %v802_v41, %v801_v40  ;;  %v814_v55 = vsel %vm676_vm2, %v763_v13, 0.0  ;;  %v726_v22 = vsel %vm676_vm2, %v673_v24, 0.0 }
 0x112   : > { %v728_v2 = vsel %vm676_vm2, %v674_v12, 0.0  ;;  %v766_v25 = vmul.f32 %v675_v20, %v675_v20  ;;  %v816_v26 = vsel %vm676_vm2, %v764_v62, 0.0  ;;  %v818_v51 = vsel %vm676_vm2, %v765_v19, 0.0 }
 0x113   : > { %v717_v58 = vadd.f32 %v716_v49, %v715_v45  ;;  %v805_v60 = vadd.f32 %v804_v47, %v803_v46  ;;  %v730_v29 = vsel %vm676_vm2, %v675_v20, 0.0 }
 0x114   : > { %v820_v31 = vsel %vm676_vm2, %v766_v25, 0.0 }
 0x115   : > { %v719_v4 = vadd.f32 %v718_v3, %v717_v58  ;;  %v807_v52 = vadd.f32 %v806_v8, %v805_v60 }
 0x117   : > { %v721_v9 = vadd.f32 %v720_v54, %v719_v4  ;;  %v809_v38 = vadd.f32 %v808_v39, %v807_v52 }
 0x119   : > { %v723_v15 = vadd.f32 %v722_v11, %v721_v9  ;;  %v811_v1 = vadd.f32 %v810_v10, %v809_v38 }
 0x11b   : > { %v725_v21 = vadd.f32 %v724_v17, %v723_v15  ;;  %v813_v61 = vadd.f32 %v812_v16, %v811_v1 }
 0x11d   : > { %v727_v23 = vadd.f32 %v726_v22, %v725_v21  ;;  %v815_v43 = vadd.f32 %v814_v55, %v813_v61 }
 0x11f   : > { %v729_v27 = vadd.f32 %v728_v2, %v727_v23  ;;  %v817_v57 = vadd.f32 %v816_v26, %v815_v43 }
 0x121   : > { %v731_v59 = vadd.f32 %v730_v29, %v729_v27  ;;  %v819_v30 = vadd.f32 %v818_v51, %v817_v57 }
 0x123   : > { %v732_v32 = vrot.slane %v731_v59, 4  ;;  %v821_v33 = vadd.f32 %v820_v31, %v819_v30 }
 0x125   : > { %v733_v34 = vadd.f32 %v732_v32, %v731_v59  ;;  %v822_v35 = vrot.slane %v821_v33, 4 }
 0x127   : > { %v734_v36 = vrot.slane %v733_v34, 2  ;;  %v823_v0 = vadd.f32 %v822_v35, %v821_v33 }
 0x129   : > { %v735_v37 = vadd.f32 %v734_v36, %v733_v34  ;;  %v824_v7 = vrot.slane %v823_v0, 2 }
 0x12b   : > { %v736_v40 = vrot.slane %v735_v37, 1  ;;  %v825_v41 = vadd.f32 %v824_v7, %v823_v0 }
 0x12d   : > { %v737_v56 = vadd.f32 %v736_v40, %v735_v37  ;;  %v826_v42 = vrot.slane %v825_v41, 1 }
 0x12f   : > { %v827_v44 = vadd.f32 %v826_v42, %v825_v41  ;;  %830 = vst.msk [vmem:[%s168_s7] sm:$0x1] %vm829_vm3, %v737_v56 }
 0x131   : > { %831 = vst.msk [vmem:[%s168_s7 + $0x1] sm:$0x1] %vm829_vm3, %v827_v44 }
 0x132 PF: > { %s13_s12 = sadd.s32 1, %s1019_s12  }
 0x133   : > { %p10_p4 = scmp.ge.s32.totalorder %s13_s12, 4  }
 0x135   :  { %12 = sbr.rel (!%p10_p4) target bundleno = 1 (0x1), region = 62 }

// kernel: convnet_forward.6
= control target key start
LH: loop header
LB: loop body
LE: loop exit
PB: predicated region body
PF: predicated region fallthrough
CT: control target
= control target key end

     0   :  { %s1443_s15 = smov 0   ;;  %s1966_s0 = inlined_call_operand.vmem [shape: bf16[2,224,36], index: 0, kind: input, shape index: {}]   ;;  %s1967_s1 = inlined_call_operand.vmem [shape: bf16[36,64], index: 1, kind: input, shape index: {}]   ;;  %s1968_s2 = inlined_call_operand.vmem [shape: f32[1,64], index: 2, kind: input, shape index: {}]   ;;  %s1969_s3 = inlined_call_operand.vmem [shape: f32[1,64], index: 3, kind: input, shape index: {}]   ;;  %s1970_s4 = inlined_call_operand.vmem [shape: bf16[2,224,16], index: 4, kind: output, shape index: {}]  }
   0x1 LB: > { %s1083_s16 = sadd.s32 4294967295, %s1414_s15   ;;  %p1087_p0 = scmp.ge.s32.totalorder %s1414_s15, 1  ;;  %s1414_s15 = sphi %s1443_s15, %s14_s15  }
   0x2   : > { %p162_p1 = scmp.lt.s32.totalorder %s1414_s15, 3 }
   0x4   : > { %p163_p2 = pnand %p1087_p0, %p162_p1 }
   0x5   : > { %v1391_v0 = vld [vmem:[%s1967_s1] sm:$0xff] (!%p163_p2)   ;;  %v1392_v1 = vld [vmem:[%s1967_s1 + $0x8] sm:$0xff] (!%p163_p2)   ;;  %p188_p3 = scmp.lt.s32.totalorder (!%p163_p2), %s1083_s16, 1  ;;  %v1393_v2 = vld [vmem:[%s1967_s1 + $0x10] ss:$0 sps:$4 sm:$0x33] (!%p163_p2)  }
   0x6   : > { %166 = sbr.rel (%p163_p2) target bundleno = 516 (0x204), region = 36  ;;  %1198 = vmatprep.subr.bf16.mxu0 (!%p163_p2), %v1391_v0  ;;  %1232 = vmatprep.subr.bf16.mxu1 (!%p163_p2), %v1391_v0  ;;  %vm362_vm0 = vcmask (!%p163_p2), 1041408   ;;  %vm319_vm1 = vcmask (!%p163_p2), 293888   ;;  %v1501_v18 = vld [vmem:[%s1968_s2] ss:$0 sm:$0xff] (!%p163_p2)  ;;  %s1416_s5 = smov (!%p163_p2), 112  }
   0x7   : > { %1199 = vmatpush3.bf16.msra.mxu0 (!%p163_p2), %v1391_v0  ;;  %1235 = vmatpush3.bf16.msra.mxu1 (!%p163_p2), %v1391_v0  ;;  %v364_v3 = vsel (!%p163_p2), %vm362_vm0, %v1393_v2, 0  ;;  %v1506_v19 = vld [vmem:[%s1969_s3] ss:$0 sm:$0xff] (!%p163_p2)  ;;  %s1417_s6 = smov (!%p163_p2), 96   ;;  %vm999_vm2 = vcmask (!%p163_p2), 125952  }
   0x8   : > { %1200 = vmatprep.subr.bf16.mxu0 (!%p163_p2), %v1392_v1  ;;  %1233 = vmatprep.subr.bf16.mxu1 (!%p163_p2), %v1392_v1 }
   0xb   : > { %1201 = vmatpush3.bf16.msra.mxu0 (!%p163_p2), %v1392_v1  ;;  %1236 = vmatpush3.bf16.msra.mxu1 (!%p163_p2), %v1392_v1 }
   0xc   : > { %1238 = vmatprep.subr.msk.bf16.mxu0 (!%p163_p2), %vm362_vm0, %v1393_v2  ;;  %1239 = vmatprep.subr.msk.bf16.mxu1 (!%p163_p2), %vm362_vm0, %v1393_v2 }
   0xd   : > { %s1980_s16 = smov (!%p188_p3, %s1083_s16), 1 }
   0xe   : > { %s1240_s23 = smul.u32 112, %s1980_s16 }
   0xf   : > { %1203 = vmatpush3.bf16.msra.mxu0 %v364_v3  ;;  %1237 = vmatpush3.bf16.msra.mxu1 %v364_v3 }
  0x10   : > { %s1468_s26 = scalar_lea.vmem %s1966_s0, %s1240_s23  ;;  %s1879_s9 = scalar_lea.vmem %s1970_s4, %s1240_s23 }
  0x11   : > { %v1394_v4 = vld [vmem:[%s1468_s26] sm:$0xff]   ;;  %v1396_v6 = vld [vmem:[%s1468_s26 + $0x8] sm:$0xff]   ;;  %v1398_v8 = vld [vmem:[%s1468_s26 + $0x10] sm:$0xff]  }
  0x12   : > { %v1395_v5 = vld [vmem:[%s1468_s26 + $0x40] sm:$0xff]   ;;  %1204 = vmatprep.mubr.msk.bf16.mxu0 %vm319_vm1, %v1394_v4  ;;  %v1397_v7 = vld [vmem:[%s1468_s26 + $0x48] sm:$0xff]   ;;  %v1400_v9 = vld [vmem:[%s1468_s26 + $0x50] sm:$0xff]  }
  0x13   : > { %1220 = vmatprep.mubr.msk.bf16.mxu1 %vm319_vm1, %v1395_v5  ;;  %1205 = vmatmul.mubr.msk.bf16.vlgmr.msra.gmra.mrb[0].mxu0 %vm319_vm1, %v1396_v6  ;;  %v1399_v10 = vld [vmem:[%s1468_s26 + $0x18] sm:$0xff]   ;;  %v1402_v12 = vld [vmem:[%s1468_s26 + $0x20] sm:$0xff]   ;;  %v1403_v14 = vld [vmem:[%s1468_s26 + $0x28] sm:$0xff]  }
  0x14   : > { %1221 = vmatmul.mubr.msk.bf16.vlgmr.msra.gmra.mrb[0].mxu1 %vm319_vm1, %v1397_v7  ;;  %1208 = vmatprep.mubr.msk.bf16.mxu0 %vm319_vm1, %v1398_v8  ;;  %v1401_v11 = vld [vmem:[%s1468_s26 + $0x58] sm:$0xff]   ;;  %v1406_v13 = vld [vmem:[%s1468_s26 + $0x60] sm:$0xff]   ;;  %v1407_v15 = vld [vmem:[%s1468_s26 + $0x68] sm:$0xff]  }
  0x15   : > { %1224 = vmatprep.mubr.msk.bf16.mxu1 %vm319_vm1, %v1400_v9  ;;  %v1404_v16 = vld [vmem:[%s1468_s26 + $0x30] sm:$0xff]   ;;  %v1405_v17 = vld [vmem:[%s1468_s26 + $0x38] sm:$0xff]  }
  0x1b   : > { %1209 = vmatmul.mubr.msk.bf16.gmra.mrb[4].mxu0 %vm319_vm1, %v1399_v10 }
  0x1c   : > { %1225 = vmatmul.mubr.msk.bf16.gmra.mrb[4].mxu1 %vm319_vm1, %v1401_v11  ;;  %1212 = vmatprep.mubr.msk.bf16.mxu0 %vm319_vm1, %v1402_v12 }
  0x1d   : > { %1228 = vmatprep.mubr.msk.bf16.mxu1 %vm319_vm1, %v1406_v13 }
  0x23   : > { %1213 = vmatmul.mubr.msk.bf16.gmra.mrb[8].mxu0 %vm319_vm1, %v1403_v14 }
  0x24   : > { %1229 = vmatmul.mubr.msk.bf16.gmra.mrb[8].mxu1 %vm319_vm1, %v1407_v15  ;;  %1216 = vmatprep.mubr.msk.bf16.mxu0 %vm319_vm1, %v1404_v16 }
  0x2b   : > { %1217 = vmatmul.mubr.msk.bf16.gmra.mrb[12].mxu0 %vm319_vm1, %v1405_v17 }
  0xe6   : > { %v1206_v20 = vpop.f32.mrb[0].mxu0 }
  0xe7   : > { %v1222_v21 = vpop.f32.mrb[0].mxu1  ;;  %v519_v22 = vmul.f32 %v1206_v20, %v1501_v18  ;;  %v400_v24 = vpop.f32.mrb[1].mxu0 }
  0xe8   : > { %v535_v23 = vmul.f32 %v1222_v21, %v1501_v18  ;;  %v464_v25 = vpop.f32.mrb[1].mxu1  ;;  %v1207_v26 = vpop.f32.mrb[2].mxu0  ;;  %v517_v34 = vmul.f32 %v1501_v18, %v400_v24 }
  0xe9   : > { %v1223_v27 = vpop.f32.mrb[2].mxu1  ;;  %v1511_v28 = vadd.f32 %v1506_v19, %v519_v22  ;;  %v520_v30 = vmul.f32 %v1207_v26, %v1501_v18  ;;  %v403_v32 = vpop.f32.mrb[3].mxu0  ;;  %v533_v35 = vmul.f32 %v1501_v18, %v464_v25 }
  0xea   : > { %v1514_v29 = vadd.f32 %v1506_v19, %v535_v23  ;;  %v536_v31 = vmul.f32 %v1223_v27, %v1501_v18  ;;  %v467_v33 = vpop.f32.mrb[3].mxu1  ;;  %v518_v36 = vmul.f32 %v1501_v18, %v403_v32  ;;  %v1536_v45 = vadd.f32 %v1506_v19, %v517_v34 }
  0xeb   : > { %v1523_v38 = vadd.f32 %v1506_v19, %v520_v30  ;;  %v534_v41 = vmul.f32 %v1501_v18, %v467_v33  ;;  %v581_v42 = vmax.f32 %v1511_v28, 0.0  ;;  %v1539_v46 = vadd.f32 %v1506_v19, %v533_v35 }
  0xec   : > { %v597_v37 = vmax.f32 %v1514_v29, 0.0  ;;  %v1526_v39 = vadd.f32 %v1506_v19, %v536_v31  ;;  %v1529_v40 = vadd.f32 %v1506_v19, %v518_v36  ;;  %v579_v1 = vmax.f32 %v1536_v45, 0.0 }
  0xed   : > { %v582_v43 = vmax.f32 %v1523_v38, 0.0  ;;  %v1553_v56 = vadd.f32 %v1506_v19, %v534_v41  ;;  %v595_v4 = vmax.f32 %v1539_v46, 0.0 }
  0xee   : > { %v598_v44 = vmax.f32 %v1526_v39, 0.0  ;;  %v1210_v47 = vpop.f32.mrb[4].mxu0  ;;  %v580_v55 = vmax.f32 %v1529_v40, 0.0 }
  0xef   : > { %v1226_v48 = vpop.f32.mrb[4].mxu1  ;;  %v523_v49 = vmul.f32 %v1210_v47, %v1501_v18  ;;  %v416_v50 = vpop.f32.mrb[5].mxu0  ;;  %v1251_v54 = vpack.i.bf16 %v582_v43, %v581_v42  ;;  %v596_v8 = vmax.f32 %v1553_v56, 0.0 }
  0xf0   : > { %v539_v51 = vmul.f32 %v1226_v48, %v1501_v18  ;;  %v480_v52 = vpop.f32.mrb[5].mxu1  ;;  %v1256_v53 = vpack.i.bf16 %v598_v44, %v597_v37  ;;  %v1211_v57 = vpop.f32.mrb[6].mxu0  ;;  %v1261_v11 = vpack.i.bf16 %v580_v55, %v579_v1  ;;  %v521_v13 = vmul.f32 %v1501_v18, %v416_v50 }
  0xf1   : > { %v537_v58 = vmul.f32 %v1501_v18, %v480_v52  ;;  %v1227_v59 = vpop.f32.mrb[6].mxu1  ;;  %v1557_v60 = vadd.f32 %v1506_v19, %v523_v49  ;;  %v524_v61 = vmul.f32 %v1211_v57, %v1501_v18  ;;  %v419_v63 = vpop.f32.mrb[7].mxu0  ;;  %1252 = vrot.lane.b32.xlu0 %v1251_v54, %s1416_s5  ;;  %v1266_v32 = vpack.i.bf16 %v596_v8, %v595_v4 }
  0xf2   : > { %1257 = vrot.lane.b32.xlu1 %v1256_v53, %s1416_s5  ;;  %v540_v62 = vmul.f32 %v1227_v59, %v1501_v18  ;;  %v483_v0 = vpop.f32.mrb[7].mxu1  ;;  %v1564_v2 = vadd.f32 %v1506_v19, %v539_v51  ;;  %v522_v7 = vmul.f32 %v1501_v18, %v419_v63  ;;  %v1609_v34 = vadd.f32 %v1506_v19, %v521_v13 }
  0xf3   : > { %v538_v3 = vmul.f32 %v1501_v18, %v483_v0  ;;  %v1570_v5 = vadd.f32 %v1506_v19, %v524_v61  ;;  %v1578_v9 = vadd.f32 %v1506_v19, %v537_v58  ;;  %v585_v12 = vmax.f32 %v1557_v60, 0.0 }
  0xf4   : > { %v1573_v6 = vadd.f32 %v1506_v19, %v540_v62  ;;  %v601_v15 = vmax.f32 %v1564_v2, 0.0  ;;  %v1594_v21 = vadd.f32 %v1506_v19, %v522_v7  ;;  %v583_v58 = vmax.f32 %v1609_v34, 0.0 }
  0xf5   : > { %v1581_v10 = vadd.f32 %v1506_v19, %v538_v3  ;;  %v586_v14 = vmax.f32 %v1570_v5, 0.0  ;;  %1262 = vrot.lane.b32.xlu0 %v1261_v11, %s1416_s5  ;;  %v599_v26 = vmax.f32 %v1578_v9, 0.0 }
  0xf6   : > { %v1214_v16 = vpop.f32.mrb[8].mxu0  ;;  %v602_v20 = vmax.f32 %v1573_v6, 0.0  ;;  %v584_v49 = vmax.f32 %v1594_v21, 0.0 }
  0xf7   : > { %v1230_v17 = vpop.f32.mrb[8].mxu1  ;;  %v527_v22 = vmul.f32 %v1214_v16, %v1501_v18  ;;  %v432_v23 = vpop.f32.mrb[9].mxu0  ;;  %v1271_v24 = vpack.i.bf16 %v586_v14, %v585_v12  ;;  %v600_v27 = vmax.f32 %v1581_v10, 0.0 }
  0xf8   : > { %v496_v25 = vpop.f32.mrb[9].mxu1  ;;  %v525_v30 = vmul.f32 %v1501_v18, %v432_v23  ;;  %v1215_v31 = vpop.f32.mrb[10].mxu0  ;;  %v1276_v52 = vpack.i.bf16 %v602_v20, %v601_v15  ;;  %v543_v59 = vmul.f32 %v1230_v17, %v1501_v18  ;;  %v1281_v17 = vpack.i.bf16 %v584_v49, %v583_v58 }
  0xf9   : > { %v1231_v33 = vpop.f32.mrb[10].mxu1  ;;  %v528_v35 = vmul.f32 %v1215_v31, %v1501_v18  ;;  %1272 = vrot.lane.b32.xlu1 %v1271_v24, %s1416_s5  ;;  %v435_v36 = vpop.f32.mrb[11].mxu0  ;;  %1267 = vrot.lane.b32.xlu0 %v1266_v32, %s1416_s5  ;;  %v1620_v50 = vadd.f32 %v1506_v19, %v527_v22  ;;  %v1286_v57 = vpack.i.bf16 %v600_v27, %v599_v26 }
  0xfa   : > { %v499_v41 = vpop.f32.mrb[11].mxu1  ;;  %v1614_v47 = vadd.f32 %v1506_v19, %v525_v30  ;;  %v526_v48 = vmul.f32 %v1501_v18, %v435_v36  ;;  %v544_v61 = vmul.f32 %v1231_v33, %v1501_v18  ;;  %v541_v0 = vmul.f32 %v1501_v18, %v496_v25 }
  0xfb   : > { %v1623_v51 = vadd.f32 %v1506_v19, %v528_v35  ;;  %v542_v3 = vmul.f32 %v1501_v18, %v499_v41  ;;  %v589_v7 = vmax.f32 %v1620_v50, 0.0  ;;  %v1663_v32 = vadd.f32 %v1506_v19, %v543_v59 }
  0xfc   : > { %v587_v53 = vmax.f32 %v1614_v47, 0.0  ;;  %v1631_v54 = vadd.f32 %v1506_v19, %v526_v48  ;;  %v1666_v33 = vadd.f32 %v1506_v19, %v544_v61  ;;  %v1674_v41 = vadd.f32 %v1506_v19, %v541_v0 }
  0xfd   : > { %1277 = vrot.lane.b32.xlu1 %v1276_v52, %s1416_s5  ;;  %1287 = vrot.lane.b32.xlu0 %v1286_v57, %s1416_s5  ;;  %v590_v11 = vmax.f32 %v1623_v51, 0.0  ;;  %v1677_v48 = vadd.f32 %v1506_v19, %v542_v3  ;;  %v1972_v0 = vmax.f32 %v1663_v32, 0.0 }
  0xfe   : > { %v588_v62 = vmax.f32 %v1631_v54, 0.0  ;;  %v1218_v63 = vpop.f32.mrb[12].mxu0  ;;  %v606_v3 = vmax.f32 %v1666_v33, 0.0 }
  0xff   : > { %v531_v13 = vmul.f32 %v1218_v63, %v1501_v18  ;;  %v448_v16 = vpop.f32.mrb[13].mxu0  ;;  %v1291_v59 = vpack.i.bf16 %v590_v11, %v589_v7 }
 0x100   : > { %v529_v22 = vmul.f32 %v1501_v18, %v448_v16  ;;  %v1219_v23 = vpop.f32.mrb[14].mxu0  ;;  %v1296_v24 = vpack.i.bf16 %v588_v62, %v587_v53  ;;  %v1973_v16 = vmax.f32 %v1674_v41, 0.0 }
 0x101   : > { %v1658_v25 = vadd.f32 %v1506_v19, %v531_v13  ;;  %v532_v30 = vmul.f32 %v1219_v23, %v1501_v18  ;;  %1282 = vrot.lane.b32.xlu1 %v1281_v17, %s1416_s5  ;;  %v451_v31 = vpop.f32.mrb[15].mxu0  ;;  %v1974_v17 = vmax.f32 %v1677_v48, 0.0  ;;  %v1316_v23 = vpack.i.bf16 %v606_v3, %v1972_v0 }
 0x102   : > { %v1669_v35 = vadd.f32 %v1506_v19, %v529_v22  ;;  %v530_v36 = vmul.f32 %v1501_v18, %v451_v31  ;;  %1297 = vrot.lane.b32.xlu0 %v1296_v24, %s1416_s5 }
 0x103   : > { %v593_v52 = vmax.f32 %v1658_v25, 0.0  ;;  %v1681_v57 = vadd.f32 %v1506_v19, %v532_v30  ;;  %v1311_v24 = vpack.i.bf16 %v1974_v17, %v1973_v16 }
 0x104   : > { %v1971_v18 = vmax.f32 %v1669_v35, 0.0  ;;  %v1689_v61 = vadd.f32 %v1506_v19, %v530_v36 }
 0x105   : > { %v594_v63 = vmax.f32 %v1681_v57, 0.0  ;;  %1292 = vrot.lane.b32.xlu1 %v1291_v59, %s1416_s5  ;;  %v1975_v57 = vmax.f32 %v1669_v35, 0.0  ;;  %v1977_v35 = vmax.f32 %v1677_v48, 0.0 }
 0x106   : > { %v592_v13 = vmax.f32 %v1689_v61, 0.0 }
 0x107   : > { %v1301_v19 = vpack.i.bf16 %v594_v63, %v593_v52 }
 0x108   : > { %v1306_v22 = vpack.i.bf16 %v592_v13, %v1971_v18 }
 0x109   : > { %1302 = vrot.lane.b32.xlu1 %v1301_v19, %s1416_s5 }
 0x10a   : > { %1307 = vrot.lane.b32.xlu0 %v1306_v22, %s1416_s5 }
 0x10d   : > { %1317 = vrot.lane.b32.xlu1 %v1316_v23, %s1416_s5 }
 0x10e   : > { %1312 = vrot.lane.b32.xlu0 %v1311_v24, %s1416_s5 }
 0x163   : > { %v1253_v36 = vpop.permute.xlu0 %1252 }
 0x164   : > { %v1258_v30 = vpop.permute.xlu1 %1257  ;;  %v1255_v19 = vunpack.i.h.bf16 %v1253_v36  ;;  %v1254_v18 = vunpack.i.l.bf16 %v1253_v36 }
 0x165   : > { %v1260_v31 = vunpack.i.h.bf16 %v1258_v30  ;;  %v1259_v59 = vunpack.i.l.bf16 %v1258_v30 }
 0x166   : > { %v1720_v0 = vmax.f32 %v582_v43, %v1255_v19  ;;  %v1724_v22 = vmax.f32 %v581_v42, %v1254_v18 }
 0x167   : > { %v1728_v16 = vmax.f32 %v598_v44, %v1260_v31  ;;  %v1263_v23 = vpop.permute.xlu0 %1262  ;;  %v1732_v24 = vmax.f32 %v597_v37, %v1259_v59 }
 0x168   : > { %v1265_v30 = vunpack.i.h.bf16 %v1263_v23  ;;  %v1264_v17 = vunpack.i.l.bf16 %v1263_v23  ;;  %v1321_v38 = vpack.i.bf16 %v1720_v0, %v1724_v22 }
 0x169   : > { %v1326_v31 = vpack.i.bf16 %v1728_v16, %v1732_v24 }
 0x16a   : > { %v1738_v43 = vmax.f32 %v580_v55, %v1265_v30  ;;  %v1742_v28 = vmax.f32 %v579_v1, %v1264_v17  ;;  %1322 = vrot.lane.b32.xlu1 %v1321_v38, %s1417_s6 }
 0x16b   : > { %v1273_v39 = vpop.permute.xlu1 %1272  ;;  %v1268_v29 = vpop.permute.xlu0 %1267 }
 0x16c   : > { %v1275_v37 = vunpack.i.h.bf16 %v1273_v39  ;;  %v1274_v42 = vunpack.i.l.bf16 %v1273_v39  ;;  %v1270_v44 = vunpack.i.h.bf16 %v1268_v29  ;;  %v1269_v18 = vunpack.i.l.bf16 %v1268_v29 }
 0x16d   : > { %v1331_v40 = vpack.i.bf16 %v1738_v43, %v1742_v28 }
 0x16e   : > { %v1751_v45 = vmax.f32 %v586_v14, %v1275_v37  ;;  %v1755_v55 = vmax.f32 %v585_v12, %v1274_v42  ;;  %v1759_v1 = vmax.f32 %v596_v8, %v1270_v44  ;;  %v1763_v17 = vmax.f32 %v595_v4, %v1269_v18  ;;  %1327 = vrot.lane.b32.xlu1 %v1326_v31, %s1417_s6 }
 0x16f   : > { %1332 = vrot.lane.b32.xlu0 %v1331_v40, %s1417_s6  ;;  %v1278_v36 = vpop.permute.xlu1 %1277  ;;  %v1288_v5 = vpop.permute.xlu0 %1287 }
 0x170   : > { %v1280_v14 = vunpack.i.h.bf16 %v1278_v36  ;;  %v1279_v59 = vunpack.i.l.bf16 %v1278_v36  ;;  %v1341_v60 = vpack.i.bf16 %v1751_v45, %v1755_v55  ;;  %v1336_v56 = vpack.i.bf16 %v1759_v1, %v1763_v17 }
 0x171   : > { %v1290_v4 = vunpack.i.h.bf16 %v1288_v5  ;;  %v1289_v19 = vunpack.i.l.bf16 %v1288_v5 }
 0x172   : > { %v1773_v8 = vmax.f32 %v602_v20, %v1280_v14  ;;  %v1777_v46 = vmax.f32 %v601_v15, %v1279_v59  ;;  %1342 = vrot.lane.b32.xlu1 %v1341_v60, %s1417_s6 }
 0x173   : > { %1337 = vrot.lane.b32.xlu0 %v1336_v56, %s1417_s6  ;;  %v1283_v12 = vpop.permute.xlu1 %1282  ;;  %v1793_v15 = vmax.f32 %v600_v27, %v1290_v4  ;;  %v1798_v42 = vmax.f32 %v599_v26, %v1289_v19  ;;  %v1978_v4 = vmax.f32 %v1674_v41, 0.0 }
 0x174   : > { %v1285_v23 = vunpack.i.h.bf16 %v1283_v12  ;;  %v1284_v30 = vunpack.i.l.bf16 %v1283_v12  ;;  %v1298_v38 = vpop.permute.xlu0 %1297  ;;  %v1346_v39 = vpack.i.bf16 %v1773_v8, %v1777_v46 }
 0x175   : > { %v1300_v20 = vunpack.i.h.bf16 %v1298_v38  ;;  %v1299_v29 = vunpack.i.l.bf16 %v1298_v38  ;;  %v1356_v50 = vpack.i.bf16 %v1793_v15, %v1798_v42 }
 0x176   : > { %v1785_v6 = vmax.f32 %v584_v49, %v1285_v23  ;;  %v1789_v2 = vmax.f32 %v583_v58, %v1284_v30  ;;  %1347 = vrot.lane.b32.xlu1 %v1346_v39, %s1417_s6 }
 0x177   : > { %v1293_v37 = vpop.permute.xlu1 %1292  ;;  %v1813_v9 = vmax.f32 %v588_v62, %v1300_v20  ;;  %v1817_v26 = vmax.f32 %v587_v53, %v1299_v29 }
 0x178   : > { %v1295_v21 = vunpack.i.h.bf16 %v1293_v37  ;;  %v1294_v49 = vunpack.i.l.bf16 %v1293_v37  ;;  %v1351_v34 = vpack.i.bf16 %v1785_v6, %v1789_v2 }
 0x179   : > { %v1366_v40 = vpack.i.bf16 %v1813_v9, %v1817_v26 }
 0x17a   : > { %v1804_v58 = vmax.f32 %v590_v11, %v1295_v21  ;;  %v1808_v10 = vmax.f32 %v589_v7, %v1294_v49  ;;  %1352 = vrot.lane.b32.xlu0 %v1351_v34, %s1417_s6 }
 0x17b   : > { %v1303_v27 = vpop.permute.xlu1 %1302 }
 0x17c   : > { %v1305_v44 = vunpack.i.h.bf16 %v1303_v27  ;;  %v1304_v18 = vunpack.i.l.bf16 %v1303_v27  ;;  %v1308_v51 = vpop.permute.xlu0 %1307  ;;  %v1361_v11 = vpack.i.bf16 %v1804_v58, %v1808_v10 }
 0x17d   : > { %v1310_v7 = vunpack.i.h.bf16 %v1308_v51  ;;  %v1309_v31 = vunpack.i.l.bf16 %v1308_v51 }
 0x17e   : > { %v1825_v54 = vmax.f32 %v594_v63, %v1305_v44  ;;  %v1829_v47 = vmax.f32 %v593_v52, %v1304_v18  ;;  %1362 = vrot.lane.b32.xlu1 %v1361_v11, %s1417_s6  ;;  %1357 = vrot.lane.b32.xlu0 %v1356_v50, %s1417_s6 }
 0x17f   : > { %v1835_v53 = vmax.f32 %v592_v13, %v1310_v7  ;;  %v1318_v62 = vpop.permute.xlu1 %1317  ;;  %v1841_v63 = vmax.f32 %v1975_v57, %v1309_v31  ;;  %v1976_v13 = vmax.f32 %v1663_v32, 0.0 }
 0x180   : > { %v1320_v36 = vunpack.i.h.bf16 %v1318_v62  ;;  %v1319_v25 = vunpack.i.l.bf16 %v1318_v62  ;;  %v1313_v52 = vpop.permute.xlu0 %1312  ;;  %v1371_v5 = vpack.i.bf16 %v1825_v54, %v1829_v47 }
 0x181   : > { %v1315_v14 = vunpack.i.h.bf16 %v1313_v52  ;;  %v1314_v59 = vunpack.i.l.bf16 %v1313_v52  ;;  %v1376_v32 = vpack.i.bf16 %v1835_v53, %v1841_v63 }
 0x182   : > { %v1847_v61 = vmax.f32 %v606_v3, %v1320_v36  ;;  %v1851_v60 = vmax.f32 %v1976_v13, %v1319_v25  ;;  %1372 = vrot.lane.b32.xlu1 %v1371_v5, %s1417_s6  ;;  %1367 = vrot.lane.b32.xlu0 %v1366_v40, %s1417_s6 }
 0x183   : > { %v1857_v56 = vmax.f32 %v1977_v35, %v1315_v14  ;;  %v1861_v12 = vmax.f32 %v1978_v4, %v1314_v59 }
 0x184   : > { %v1386_v33 = vpack.i.bf16 %v1847_v61, %v1851_v60 }
 0x185   : > { %v1381_v3 = vpack.i.bf16 %v1857_v56, %v1861_v12 }
 0x186   : > { %1387 = vrot.lane.b32.xlu1 %v1386_v33, %s1417_s6  ;;  %1377 = vrot.lane.b32.xlu0 %v1376_v32, %s1417_s6 }
 0x18a   : > { %1382 = vrot.lane.b32.xlu0 %v1381_v3, %s1417_s6 }
 0x1dc   : > { %v1323_v48 = vpop.permute.xlu1 %1322 }
 0x1dd   : > { %v1325_v19 = vunpack.i.h.bf16 %v1323_v48  ;;  %v1324_v41 = vunpack.i.l.bf16 %v1323_v48 }
 0x1df   : > { %v862_v23 = vmax.f32 %v1720_v0, %v1325_v19  ;;  %v861_v30 = vmax.f32 %v1724_v22, %v1324_v41 }
 0x1e0   : > { %v1328_v38 = vpop.permute.xlu1 %1327 }
 0x1e1   : > { %v1333_v39 = vpop.permute.xlu0 %1332  ;;  %v1156_v20 = vpack.c.bf16 %v862_v23, %v862_v23  ;;  %v1155_v29 = vpack.c.bf16 %v861_v30, %v861_v30  ;;  %v1330_v37 = vunpack.i.h.bf16 %v1328_v38  ;;  %v1329_v21 = vunpack.i.l.bf16 %v1328_v38 }
 0x1e2   : > { %v1335_v49 = vunpack.i.h.bf16 %v1333_v39  ;;  %v1334_v34 = vunpack.i.l.bf16 %v1333_v39 }
 0x1e3   : > { %1003 = vst.msk [vmem:[%s1879_s9 + $0xc] sm:$0xf] %vm999_vm2, %v1156_v20  ;;  %1002 = vst.msk [vmem:[%s1879_s9 + $0x8] sm:$0xf] %vm999_vm2, %v1155_v29  ;;  %v878_v0 = vmax.f32 %v1728_v16, %v1330_v37  ;;  %v877_v22 = vmax.f32 %v1732_v24, %v1329_v21 }
 0x1e4   : > { %v860_v27 = vmax.f32 %v1738_v43, %v1335_v49  ;;  %v859_v44 = vmax.f32 %v1742_v28, %v1334_v34  ;;  %v1343_v18 = vpop.permute.xlu1 %1342 }
 0x1e5   : > { %v1338_v51 = vpop.permute.xlu0 %1337  ;;  %v1172_v11 = vpack.c.bf16 %v878_v0, %v878_v0  ;;  %v1171_v50 = vpack.c.bf16 %v877_v22, %v877_v22  ;;  %v1345_v7 = vunpack.i.h.bf16 %v1343_v18  ;;  %v1344_v31 = vunpack.i.l.bf16 %v1343_v18 }
 0x1e6   : > { %v1154_v62 = vpack.c.bf16 %v860_v27, %v860_v27  ;;  %v1153_v40 = vpack.c.bf16 %v859_v44, %v859_v44  ;;  %v1340_v57 = vunpack.i.h.bf16 %v1338_v51  ;;  %v1339_v36 = vunpack.i.l.bf16 %v1338_v51 }
 0x1e7   : > { %1019 = vst.msk [vmem:[%s1879_s9 + $0x4c] sm:$0xf] %vm999_vm2, %v1172_v11  ;;  %1018 = vst.msk [vmem:[%s1879_s9 + $0x48] sm:$0xf] %vm999_vm2, %v1171_v50  ;;  %v866_v16 = vmax.f32 %v1751_v45, %v1345_v7  ;;  %v865_v24 = vmax.f32 %v1755_v55, %v1344_v31 }
 0x1e8   : > { %1001 = vst.msk [vmem:[%s1879_s9 + $0x4] sm:$0xf] %vm999_vm2, %v1154_v62  ;;  %1000 = vst.msk [vmem:[%s1879_s9] sm:$0xf] %vm999_vm2, %v1153_v40  ;;  %v876_v43 = vmax.f32 %v1759_v1, %v1340_v57  ;;  %v875_v28 = vmax.f32 %v1763_v17, %v1339_v36  ;;  %v1348_v25 = vpop.permute.xlu1 %1347 }
 0x1e9   : > { %v1160_v52 = vpack.c.bf16 %v866_v16, %v866_v16  ;;  %v1159_v5 = vpack.c.bf16 %v865_v24, %v865_v24  ;;  %v1350_v14 = vunpack.i.h.bf16 %v1348_v25  ;;  %v1349_v59 = vunpack.i.l.bf16 %v1348_v25 }
 0x1ea   : > { %v1170_v13 = vpack.c.bf16 %v876_v43, %v876_v43  ;;  %v1169_v45 = vpack.c.bf16 %v875_v28, %v875_v28 }
 0x1eb   : > { %1007 = vst.msk [vmem:[%s1879_s9 + $0x1c] sm:$0xf] %vm999_vm2, %v1160_v52  ;;  %1006 = vst.msk [vmem:[%s1879_s9 + $0x18] sm:$0xf] %vm999_vm2, %v1159_v5  ;;  %v882_v55 = vmax.f32 %v1773_v8, %v1350_v14  ;;  %v881_v35 = vmax.f32 %v1777_v46, %v1349_v59 }
 0x1ec   : > { %v1353_v1 = vpop.permute.xlu0 %1352  ;;  %1017 = vst.msk [vmem:[%s1879_s9 + $0x44] sm:$0xf] %vm999_vm2, %v1170_v13  ;;  %1016 = vst.msk [vmem:[%s1879_s9 + $0x40] sm:$0xf] %vm999_vm2, %v1169_v45 }
 0x1ed   : > { %v1355_v17 = vunpack.i.h.bf16 %v1353_v1  ;;  %v1354_v4 = vunpack.i.l.bf16 %v1353_v1  ;;  %v1176_v33 = vpack.c.bf16 %v882_v55, %v882_v55  ;;  %v1175_v32 = vpack.c.bf16 %v881_v35, %v881_v35 }
 0x1ef   : > { %v864_v3 = vmax.f32 %v1785_v6, %v1355_v17  ;;  %v863_v48 = vmax.f32 %v1789_v2, %v1354_v4  ;;  %1023 = vst.msk [vmem:[%s1879_s9 + $0x5c] sm:$0xf] %vm999_vm2, %v1176_v33  ;;  %1022 = vst.msk [vmem:[%s1879_s9 + $0x58] sm:$0xf] %vm999_vm2, %v1175_v32 }
 0x1f0   : > { %v1363_v8 = vpop.permute.xlu1 %1362  ;;  %v1358_v46 = vpop.permute.xlu0 %1357 }
 0x1f1   : > { %v1158_v19 = vpack.c.bf16 %v864_v3, %v864_v3  ;;  %v1157_v41 = vpack.c.bf16 %v863_v48, %v863_v48  ;;  %v1365_v23 = vunpack.i.h.bf16 %v1363_v8  ;;  %v1364_v30 = vunpack.i.l.bf16 %v1363_v8 }
 0x1f2   : > { %v1360_v38 = vunpack.i.h.bf16 %v1358_v46  ;;  %v1359_v39 = vunpack.i.l.bf16 %v1358_v46 }
 0x1f3   : > { %1005 = vst.msk [vmem:[%s1879_s9 + $0x14] sm:$0xf] %vm999_vm2, %v1158_v19  ;;  %1004 = vst.msk [vmem:[%s1879_s9 + $0x10] sm:$0xf] %vm999_vm2, %v1157_v41  ;;  %v870_v6 = vmax.f32 %v1804_v58, %v1365_v23  ;;  %v869_v2 = vmax.f32 %v1808_v10, %v1364_v30 }
 0x1f4   : > { %v880_v20 = vmax.f32 %v1793_v15, %v1360_v38  ;;  %v879_v29 = vmax.f32 %v1798_v42, %v1359_v39  ;;  %v1373_v37 = vpop.permute.xlu1 %1372  ;;  %v1368_v21 = vpop.permute.xlu0 %1367 }
 0x1f5   : > { %v1164_v49 = vpack.c.bf16 %v870_v6, %v870_v6  ;;  %v1163_v34 = vpack.c.bf16 %v869_v2, %v869_v2  ;;  %v1375_v0 = vunpack.i.h.bf16 %v1373_v37  ;;  %v1374_v22 = vunpack.i.l.bf16 %v1373_v37 }
 0x1f6   : > { %v1174_v27 = vpack.c.bf16 %v880_v20, %v880_v20  ;;  %v1173_v44 = vpack.c.bf16 %v879_v29, %v879_v29  ;;  %v1370_v18 = vunpack.i.h.bf16 %v1368_v21  ;;  %v1369_v51 = vunpack.i.l.bf16 %v1368_v21 }
 0x1f7   : > { %1011 = vst.msk [vmem:[%s1879_s9 + $0x2c] sm:$0xf] %vm999_vm2, %v1164_v49  ;;  %1010 = vst.msk [vmem:[%s1879_s9 + $0x28] sm:$0xf] %vm999_vm2, %v1163_v34  ;;  %v874_v15 = vmax.f32 %v1825_v54, %v1375_v0  ;;  %v873_v42 = vmax.f32 %v1829_v47, %v1374_v22 }
 0x1f8   : > { %1021 = vst.msk [vmem:[%s1879_s9 + $0x54] sm:$0xf] %vm999_vm2, %v1174_v27  ;;  %1020 = vst.msk [vmem:[%s1879_s9 + $0x50] sm:$0xf] %vm999_vm2, %v1173_v44  ;;  %v868_v58 = vmax.f32 %v1813_v9, %v1370_v18  ;;  %v867_v10 = vmax.f32 %v1817_v26, %v1369_v51  ;;  %v1388_v11 = vpop.permute.xlu1 %1387  ;;  %v1378_v50 = vpop.permute.xlu0 %1377 }
 0x1f9   : > { %v1168_v7 = vpack.c.bf16 %v874_v15, %v874_v15  ;;  %v1167_v31 = vpack.c.bf16 %v873_v42, %v873_v42  ;;  %v1390_v62 = vunpack.i.h.bf16 %v1388_v11  ;;  %v1389_v54 = vunpack.i.l.bf16 %v1388_v11 }
 0x1fa   : > { %v1162_v40 = vpack.c.bf16 %v868_v58, %v868_v58  ;;  %v1161_v57 = vpack.c.bf16 %v867_v10, %v867_v10  ;;  %v1380_v47 = vunpack.i.h.bf16 %v1378_v50  ;;  %v1379_v36 = vunpack.i.l.bf16 %v1378_v50 }
 0x1fb   : > { %1015 = vst.msk [vmem:[%s1879_s9 + $0x3c] sm:$0xf] %vm999_vm2, %v1168_v7  ;;  %1014 = vst.msk [vmem:[%s1879_s9 + $0x38] sm:$0xf] %vm999_vm2, %v1167_v31  ;;  %v886_v9 = vmax.f32 %v1847_v61, %v1390_v62  ;;  %v885_v26 = vmax.f32 %v1851_v60, %v1389_v54 }
 0x1fc   : > { %1009 = vst.msk [vmem:[%s1879_s9 + $0x24] sm:$0xf] %vm999_vm2, %v1162_v40  ;;  %1008 = vst.msk [vmem:[%s1879_s9 + $0x20] sm:$0xf] %vm999_vm2, %v1161_v57  ;;  %v872_v16 = vmax.f32 %v1835_v53, %v1380_v47  ;;  %v871_v24 = vmax.f32 %v1841_v63, %v1379_v36  ;;  %v1383_v43 = vpop.permute.xlu0 %1382 }
 0x1fd   : > { %v1180_v28 = vpack.c.bf16 %v886_v9, %v886_v9  ;;  %v1179_v25 = vpack.c.bf16 %v885_v26, %v885_v26  ;;  %v1385_v52 = vunpack.i.h.bf16 %v1383_v43  ;;  %v1384_v5 = vunpack.i.l.bf16 %v1383_v43 }
 0x1fe   : > { %v1166_v61 = vpack.c.bf16 %v872_v16, %v872_v16  ;;  %v1165_v14 = vpack.c.bf16 %v871_v24, %v871_v24 }
 0x1ff   : > { %1027 = vst.msk [vmem:[%s1879_s9 + $0x6c] sm:$0xf] %vm999_vm2, %v1180_v28  ;;  %1026 = vst.msk [vmem:[%s1879_s9 + $0x68] sm:$0xf] %vm999_vm2, %v1179_v25  ;;  %v884_v60 = vmax.f32 %v1857_v56, %v1385_v52  ;;  %v883_v59 = vmax.f32 %v1861_v12, %v1384_v5 }
 0x200   : > { %1013 = vst.msk [vmem:[%s1879_s9 + $0x34] sm:$0xf] %vm999_vm2, %v1166_v61  ;;  %1012 = vst.msk [vmem:[%s1879_s9 + $0x30] sm:$0xf] %vm999_vm2, %v1165_v14 }
 0x201   : > { %v1178_v53 = vpack.c.bf16 %v884_v60, %v884_v60  ;;  %v1177_v63 = vpack.c.bf16 %v883_v59, %v883_v59 }
 0x203   : > { %1025 = vst.msk [vmem:[%s1879_s9 + $0x64] sm:$0xf] %vm999_vm2, %v1178_v53  ;;  %1024 = vst.msk [vmem:[%s1879_s9 + $0x60] sm:$0xf] %vm999_vm2, %v1177_v63 }
 0x204 PF: > { %s14_s15 = sadd.s32 1, %s1414_s15  }
 0x205   : > { %p11_p4 = scmp.ge.s32.totalorder %s14_s15, 4  }
 0x207   :  { %13 = sbr.rel (!%p11_p4) target bundleno = 1 (0x1), region = 66 }

// kernel: tile.33
= control target key start
LH: loop header
LB: loop body
LE: loop exit
PB: predicated region body
PF: predicated region fallthrough
CT: control target
= control target key end

     0   :  { %s22_s0 = inlined_call_operand.vmem [shape: f32[32], index: 0, kind: input, shape index: {}]   ;;  %s23_s1 = inlined_call_operand.vmem [shape: f32[4,32], index: 1, kind: output, shape index: {}]  }
   0x1   :  { %v4_v0 = vld [vmem:[%s22_s0] ss:$0 sm:$0xff] }
   0x2   :  { %5 = vst [vmem:[%s23_s1] sm:$0xf] %v4_v0 }

// kernel: tile.34
= control target key start
LH: loop header
LB: loop body
LE: loop exit
PB: predicated region body
PF: predicated region fallthrough
CT: control target
= control target key end

     0   :  { %vm7_vm0 = vcmask 261120   ;;  %s37_s8 = smov 32   ;;  %s38_s9 = smov 64   ;;  %vm13_vm1 = vcmask 1048320   ;;  %vm19_vm2 = vcmask 785920   ;;  %vm25_vm3 = vcmask 523520   ;;  %s55_s0 = inlined_call_operand.vmem [shape: f32[4,32], index: 0, kind: input, shape index: {}]   ;;  %s56_s1 = inlined_call_operand.vmem [shape: f32[1,128], index: 1, kind: output, shape index: {}]  }
   0x1   :  { %v4_v0 = vld [vmem:[%s55_s0] sm:$0xf]  ;;  %s36_s0 = smov 96  }
   0x2   :  { %5 = vst [vmem:[#allocation1] sm:$0xf] %v4_v0 }
   0x9   :  { %v10_v1 = vld [vmem:[#allocation1 + $0x3] sm:$0x1]   ;;  %v22_v2 = vld [vmem:[#allocation1 + $0x1] sm:$0x1]   ;;  %v6_v3 = vld [vmem:[#allocation1] sm:$0x1]  }
   0xa   :  { %11 = vrot.lane.b32.xlu0 %v10_v1, %s36_s0  ;;  %23 = vrot.lane.b32.xlu1 %v22_v2, %s37_s8  ;;  %v16_v4 = vld [vmem:[#allocation1 + $0x2] sm:$0x1]   ;;  %8 = vst.msk [vmem:[#allocation0] sm:$0x1] %vm7_vm0, %v6_v3  }
   0xe   :  { %17 = vrot.lane.b32.xlu0 %v16_v4, %s38_s9 }
  0x7c   :  { %v12_v5 = vpop.permute.xlu0 %11   ;;  %v24_v6 = vpop.permute.xlu1 %23  }
  0x7d   :  { %14 = vst.msk [vmem:[#allocation0] sm:$0x1] %vm13_vm1, %v12_v5  }
  0x80   :  { %v18_v7 = vpop.permute.xlu0 %17  }
  0x81   :  { %20 = vst.msk [vmem:[#allocation0] sm:$0x1] %vm19_vm2, %v18_v7  }
  0x82   :  { %26 = vst.msk [vmem:[#allocation0] sm:$0x1] %vm25_vm3, %v24_v6  }
  0x89   :  { %v30_v8 = vld [vmem:[#allocation0] sm:$0x1] }
  0x8a   :  { %32 = vst [vmem:[%s56_s1] sm:$0x1] %v30_v8 }

// kernel: convnet_forward.7
= control target key start
LH: loop header
LB: loop body
LE: loop exit
PB: predicated region body
PF: predicated region fallthrough
CT: control target
= control target key end

     0   :  { %s1226_s12 = smov 0   ;;  %s1409_s0 = inlined_call_operand.vmem [shape: bf16[2,63,576], index: 0, kind: input, shape index: {}]   ;;  %s1410_s1 = inlined_call_operand.vmem [shape: bf16[576,128], index: 1, kind: input, shape index: {}]   ;;  %s1411_s2 = inlined_call_operand.vmem [shape: f32[63,1], index: 2, kind: input, shape index: {}]   ;;  %s1412_s3 = inlined_call_operand.vmem [shape: f32[2,2,128], index: 3, kind: output, shape index: {}]  }
   0x1 LB: > { %s940_s13 = sadd.s32 4294967295, %s1203_s12   ;;  %p944_p0 = scmp.ge.s32.totalorder %s1203_s12, 1  ;;  %s1203_s12 = sphi %s1226_s12, %s13_s12  }
   0x2   : > { %p137_p1 = scmp.lt.s32.totalorder %s1203_s12, 3 }
   0x4   : > { %p138_p2 = pnand %p944_p0, %p137_p1 }
   0x5   : > { %v1133_v0 = vld [vmem:[%s1410_s1 + $0x40] sm:$0xff] (!%p138_p2)   ;;  %v1137_v4 = vld [vmem:[%s1410_s1 + $0x48] sm:$0xff] (!%p138_p2)   ;;  %v1205_v5 = vmov (!%p138_p2), 0   ;;  %v1141_v9 = vld [vmem:[%s1410_s1 + $0x50] sm:$0xff] (!%p138_p2)   ;;  %p160_p3 = scmp.lt.s32.totalorder (!%p138_p2), %s940_s13, 1  ;;  %vm590_vm0 = vcmask (!%p138_p2), 523264  }
   0x6   : > { %141 = sbr.rel (%p138_p2) target bundleno = 319 (0x13f), region = 32  ;;  %v1134_v1 = vld [vmem:[%s1410_s1 + $0xc0] sm:$0xff] (!%p138_p2)   ;;  %1009 = vmatprep.subr.bf16.mxu0 (!%p138_p2), %v1133_v0  ;;  %1131 = vset.pattern.permute.xlu0 (!%p138_p2), %v1205_v5  ;;  %v1138_v6 = vld [vmem:[%s1410_s1 + $0xc8] sm:$0xff] (!%p138_p2)   ;;  %v1142_v10 = vld [vmem:[%s1410_s1 + $0xd0] sm:$0xff] (!%p138_p2)   ;;  %vm852_vm1 = vcmask (!%p138_p2), 1046528  }
   0x7   : > { %v1135_v2 = vld [vmem:[%s1410_s1] sm:$0xff] (!%p138_p2)   ;;  %1049 = vmatprep.subr.bf16.mxu1 (!%p138_p2), %v1134_v1  ;;  %1132 = vset.pattern.permute.xlu1 (!%p138_p2), %v1205_v5  ;;  %v1139_v7 = vld [vmem:[%s1410_s1 + $0x8] sm:$0xff] (!%p138_p2)   ;;  %v1143_v11 = vld [vmem:[%s1410_s1 + $0x10] sm:$0xff] (!%p138_p2)  }
   0x8   : > { %v1136_v3 = vld [vmem:[%s1410_s1 + $0x80] sm:$0xff] (!%p138_p2)   ;;  %1010 = vmatpush3.bf16.msra.mxu0 (!%p138_p2), %v1135_v2  ;;  %v1140_v8 = vld [vmem:[%s1410_s1 + $0x88] sm:$0xff] (!%p138_p2)   ;;  %v1144_v12 = vld [vmem:[%s1410_s1 + $0x90] sm:$0xff] (!%p138_p2)  }
   0x9   : > { %1050 = vmatpush3.bf16.msra.mxu1 (!%p138_p2), %v1136_v3  ;;  %1011 = vmatprep.subr.bf16.mxu0 (!%p138_p2), %v1137_v4  ;;  %v1145_v13 = vld [vmem:[%s1410_s1 + $0x58] sm:$0xff] (!%p138_p2)   ;;  %v1149_v17 = vld [vmem:[%s1410_s1 + $0x60] sm:$0xff] (!%p138_p2)   ;;  %v1153_v21 = vld [vmem:[%s1410_s1 + $0x68] sm:$0xff] (!%p138_p2)  }
   0xa   : > { %1051 = vmatprep.subr.bf16.mxu1 (!%p138_p2), %v1138_v6  ;;  %v1146_v14 = vld [vmem:[%s1410_s1 + $0xd8] sm:$0xff] (!%p138_p2)   ;;  %v1150_v18 = vld [vmem:[%s1410_s1 + $0xe0] sm:$0xff] (!%p138_p2)   ;;  %v1154_v22 = vld [vmem:[%s1410_s1 + $0xe8] sm:$0xff] (!%p138_p2)  }
   0xb   : > { %v1147_v15 = vld [vmem:[%s1410_s1 + $0x18] sm:$0xff] (!%p138_p2)   ;;  %v1151_v19 = vld [vmem:[%s1410_s1 + $0x20] sm:$0xff] (!%p138_p2)   ;;  %v1155_v23 = vld [vmem:[%s1410_s1 + $0x28] sm:$0xff] (!%p138_p2)  }
   0xc   : > { %1012 = vmatpush3.bf16.msra.mxu0 (!%p138_p2), %v1139_v7  ;;  %v1148_v16 = vld [vmem:[%s1410_s1 + $0x98] sm:$0xff] (!%p138_p2)   ;;  %v1152_v20 = vld [vmem:[%s1410_s1 + $0xa0] sm:$0xff] (!%p138_p2)   ;;  %v1156_v24 = vld [vmem:[%s1410_s1 + $0xa8] sm:$0xff] (!%p138_p2)  }
   0xd   : > { %1052 = vmatpush3.bf16.msra.mxu1 %v1140_v8  ;;  %1013 = vmatprep.subr.bf16.mxu0 %v1141_v9  ;;  %s1414_s13 = smov (!%p160_p3, %s940_s13), 1  ;;  %v1157_v25 = vld [vmem:[%s1410_s1 + $0x70] sm:$0xff]   ;;  %v1161_v29 = vld [vmem:[%s1410_s1 + $0x78] sm:$0xff]   ;;  %v1171_v37 = vld [vmem:[%s1410_s1 + $0x100] sm:$0xff]  }
   0xe   : > { %1053 = vmatprep.subr.bf16.mxu1 %v1142_v10  ;;  %v1158_v26 = vld [vmem:[%s1410_s1 + $0xf0] sm:$0xff]   ;;  %s1121_s16 = smul.u32 160, %s1414_s13  ;;  %v1162_v30 = vld [vmem:[%s1410_s1 + $0xf8] sm:$0xff]   ;;  %v1178_v40 = vld [vmem:[%s1410_s1 + $0x108] sm:$0xff]  }
   0xf   : > { %v1159_v27 = vld [vmem:[%s1410_s1 + $0x30] sm:$0xff]   ;;  %v1163_v31 = vld [vmem:[%s1410_s1 + $0x38] sm:$0xff]   ;;  %v242_v51 = vld [vmem:[%s1411_s2] sm:$0xff] }
  0x10   : > { %1014 = vmatpush3.bf16.msra.mxu0 %v1143_v11  ;;  %v1160_v28 = vld [vmem:[%s1410_s1 + $0xb0] sm:$0xff]   ;;  %s1334_s27 = scalar_lea.vmem %s1409_s0, %s1121_s16  ;;  %v1164_v32 = vld [vmem:[%s1410_s1 + $0xb8] sm:$0xff]   ;;  %800 = vperm.xlu0 %1131, %v242_v51   ;;  %v243_v53 = vld [vmem:[%s1411_s2 + $0x8] sm:$0xff] }
  0x11   : > { %1054 = vmatpush3.bf16.msra.mxu1 %v1144_v12  ;;  %1015 = vmatprep.subr.bf16.mxu0 %v1145_v13  ;;  %v1165_v33 = vld [vmem:[%s1334_s27] ss:$20 sps:$4 sm:$0xff]   ;;  %v1167_v34 = vld [vmem:[%s1334_s27 + $0x4] ss:$20 sps:$4 sm:$0xff]   ;;  %v1168_v35 = vld [vmem:[%s1334_s27 + $0x8] ss:$20 sps:$4 sm:$0xff]  }
  0x12   : > { %1055 = vmatprep.subr.bf16.mxu1 %v1146_v14  ;;  %v1170_v36 = vld [vmem:[%s1334_s27 + $0xc] ss:$20 sps:$4 sm:$0xff]   ;;  %635 = vmatprep.mubr.bf16.mxu0 %v1167_v34  ;;  %v1174_v39 = vld [vmem:[%s1334_s27 + $0x34] ss:$20 sps:$4 sm:$0xff]   ;;  %v1177_v42 = vld [vmem:[%s1334_s27 + $0x30] ss:$20 sps:$4 sm:$0xff]  }
  0x13   : > { %700 = vmatprep.mubr.bf16.mxu1 %v1170_v36  ;;  %v1172_v38 = vld [vmem:[%s1334_s27 + $0x2c] ss:$20 sps:$4 sm:$0xff]   ;;  %v1176_v41 = vld [vmem:[%s1334_s27 + $0x28] ss:$20 sps:$4 sm:$0xff]   ;;  %v1185_v45 = vld [vmem:[%s1410_s1 + $0x110] sm:$0xff]  }
  0x14   : > { %1016 = vmatpush3.bf16.msra.mxu0 %v1147_v15  ;;  %v1179_v43 = vld [vmem:[%s1334_s27 + $0x54] ss:$20 sps:$4 sm:$0xff]   ;;  %v1181_v44 = vld [vmem:[%s1334_s27 + $0x5c] ss:$20 sps:$4 sm:$0xff]   ;;  %v1184_v48 = vld [vmem:[%s1334_s27 + $0x58] ss:$20 sps:$4 sm:$0xff]   ;;  %805 = vperm.xlu0 %1131, %v243_v53  }
  0x15   : > { %1056 = vmatpush3.bf16.msra.mxu1 %v1148_v16  ;;  %1017 = vmatprep.subr.bf16.mxu0 %v1149_v17  ;;  %v1192_v46 = vld [vmem:[%s1410_s1 + $0x118] sm:$0xff]   ;;  %v1183_v47 = vld [vmem:[%s1334_s27 + $0x50] ss:$20 sps:$4 sm:$0xff]   ;;  %v1191_v56 = vld [vmem:[%s1334_s27 + $0x80] ss:$20 sps:$4 sm:$0xff]  }
  0x16   : > { %1057 = vmatprep.subr.bf16.mxu1 %v1150_v18  ;;  %v1186_v49 = vld [vmem:[%s1334_s27 + $0x7c] ss:$20 sps:$4 sm:$0xff]   ;;  %v1188_v50 = vld [vmem:[%s1334_s27 + $0x84] ss:$20 sps:$4 sm:$0xff]   ;;  %v1194_v59 = vld [vmem:[%s1334_s27 + $0x60] ss:$20 sps:$4 sm:$0xff]  }
  0x17   : > { %v244_v52 = vld [vmem:[%s1411_s2 + $0x10] sm:$0xff]  ;;  %v1190_v54 = vld [vmem:[%s1334_s27 + $0x78] ss:$20 sps:$4 sm:$0xff]   ;;  %v246_v58 = vld [vmem:[%s1411_s2 + $0x20] sm:$0xff] }
  0x18   : > { %1018 = vmatpush3.bf16.msra.mxu0 %v1151_v19  ;;  %810 = vperm.xlu1 %1132, %v244_v52   ;;  %v245_v55 = vld [vmem:[%s1411_s2 + $0x18] sm:$0xff]  ;;  %v1193_v57 = vld [vmem:[%s1334_s27 + $0x10] ss:$20 sps:$4 sm:$0xff]   ;;  %v247_v60 = vld [vmem:[%s1411_s2 + $0x28] sm:$0xff] }
  0x19   : > { %1058 = vmatpush3.bf16.msra.mxu1 %v1152_v20  ;;  %1019 = vmatprep.subr.bf16.mxu0 %v1153_v21  ;;  %v248_v61 = vld [vmem:[%s1411_s2 + $0x30] sm:$0xff]  ;;  %v1195_v62 = vld [vmem:[%s1334_s27 + $0x38] ss:$20 sps:$4 sm:$0xff]   ;;  %v1196_v0 = vld [vmem:[%s1334_s27 + $0x88] ss:$20 sps:$4 sm:$0xff]   ;;  %s946_s27 = sshll.u32 %s1414_s13, 1 }
  0x1a   : > { %1059 = vmatprep.subr.bf16.mxu1 %v1154_v22  ;;  %820 = vperm.xlu0 %1131, %v246_v58   ;;  %v249_v63 = vld [vmem:[%s1411_s2 + $0x38] sm:$0x7f]  ;;  %s168_s7 = scalar_lea.vmem %s1412_s3, %s946_s27 }
  0x1c   : > { %1020 = vmatpush3.bf16.msra.mxu0 %v1155_v23  ;;  %815 = vperm.xlu1 %1132, %v245_v55  }
  0x1d   : > { %1060 = vmatpush3.bf16.msra.mxu1 %v1156_v24  ;;  %1021 = vmatprep.subr.bf16.mxu0 %v1157_v25 }
  0x1e   : > { %1061 = vmatprep.subr.bf16.mxu1 %v1158_v26  ;;  %830 = vperm.xlu0 %1131, %v248_v61  }
  0x20   : > { %1022 = vmatpush3.bf16.msra.mxu0 %v1159_v27  ;;  %825 = vperm.xlu1 %1132, %v247_v60  }
  0x21   : > { %1062 = vmatpush3.bf16.msra.mxu1 %v1160_v28  ;;  %1023 = vmatprep.subr.bf16.mxu0 %v1161_v29 }
  0x22   : > { %1063 = vmatprep.subr.bf16.mxu1 %v1162_v30 }
  0x24   : > { %1024 = vmatpush3.bf16.msra.mxu0 %v1163_v31  ;;  %835 = vperm.xlu1 %1132, %v249_v63  }
  0x25   : > { %1064 = vmatpush3.bf16.msra.mxu1 %v1164_v32  ;;  %1097 = vmatprep.subr.bf16.mxu0 %v1171_v37 }
  0x26   : > { %1113 = vmatprep.subr.bf16.mxu1 %v1171_v37 }
  0x27   : > { %636 = vmatmul.mubr.bf16.vlgmr.msra.gmra.mrb[0].mxu0 %v1165_v33 }
  0x28   : > { %701 = vmatmul.mubr.bf16.vlgmr.msra.gmra.mrb[0].mxu1 %v1168_v35  ;;  %1098 = vmatpush3.bf16.msra.mxu0 %v1171_v37 }
  0x29   : > { %643 = vmatprep.mubr.bf16.mxu0 %v1172_v38  ;;  %708 = vmatprep.mubr.bf16.mxu1 %v1174_v39 }
  0x2a   : > { %1117 = vmatpush3.bf16.msra.mxu1 %v1171_v37  ;;  %1099 = vmatprep.subr.bf16.mxu0 %v1178_v40 }
  0x2b   : > { %1114 = vmatprep.subr.bf16.mxu1 %v1178_v40 }
  0x2c   : > { %1100 = vmatpush3.bf16.msra.mxu0 %v1178_v40 }
  0x2d   : > { %1101 = vmatprep.subr.bf16.mxu0 %v1185_v45 }
  0x2e   : > { %1118 = vmatpush3.bf16.msra.mxu1 %v1178_v40 }
  0x2f   : > { %644 = vmatmul.mubr.bf16.gmra.mrb[4].mxu0 %v1176_v41  ;;  %1115 = vmatprep.subr.bf16.mxu1 %v1185_v45 }
  0x30   : > { %709 = vmatmul.mubr.bf16.gmra.mrb[4].mxu1 %v1177_v42  ;;  %651 = vmatprep.mubr.bf16.mxu0 %v1179_v43 }
  0x31   : > { %716 = vmatprep.mubr.bf16.mxu1 %v1181_v44  ;;  %1102 = vmatpush3.bf16.msra.mxu0 %v1185_v45 }
  0x32   : > { %1103 = vmatprep.subr.bf16.mxu0 %v1192_v46  ;;  %1119 = vmatpush3.bf16.msra.mxu1 %v1185_v45 }
  0x33   : > { %1116 = vmatprep.subr.bf16.mxu1 %v1192_v46 }
  0x35   : > { %1104 = vmatpush3.bf16.msra.mxu0 %v1192_v46 }
  0x36   : > { %1120 = vmatpush3.bf16.msra.mxu1 %v1192_v46 }
  0x37   : > { %652 = vmatmul.mubr.bf16.gmra.mrb[8].mxu0 %v1183_v47 }
  0x38   : > { %717 = vmatmul.mubr.bf16.gmra.mrb[8].mxu1 %v1184_v48  ;;  %659 = vmatprep.mubr.bf16.mxu0 %v1186_v49 }
  0x39   : > { %724 = vmatprep.mubr.bf16.mxu1 %v1188_v50 }
  0x3f   : > { %660 = vmatmul.mubr.bf16.gmra.mrb[12].mxu0 %v1190_v54 }
  0x40   : > { %725 = vmatmul.mubr.bf16.gmra.mrb[12].mxu1 %v1191_v56  ;;  %1105 = vmatprep.mubr.msk.bf16.mxu0 %vm590_vm0, %v1193_v57 }
  0x41   : > { %1109 = vmatprep.mubr.msk.bf16.mxu1 %vm590_vm0, %v1194_v59 }
  0x47   : > { %1106 = vmatmul.mubr.msk.bf16.vlgmr.msra.gmra.mrb[16].mxu0 %vm590_vm0, %v1195_v62 }
  0x48   : > { %1110 = vmatmul.mubr.msk.bf16.vlgmr.msra.gmra.mrb[16].mxu1 %vm590_vm0, %v1196_v0 }
  0x8f   : > { %v801_v42 = vpop.permute.xlu0 %800 }
  0x93   : > { %v806_v59 = vpop.permute.xlu0 %805 }
  0x97   : > { %v811_v44 = vpop.permute.xlu1 %810 }
  0x9b   : > { %v816_v58 = vpop.permute.xlu1 %815 }
  0xfa   : > { %v1025_v1 = vpop.f32.mrb[0].mxu0 }
  0xfb   : > { %v1065_v2 = vpop.f32.mrb[0].mxu1  ;;  %v1026_v3 = vpop.f32.mrb[1].mxu0 }
  0xfc   : > { %v1027_v4 = vadd.f32 %v1026_v3, %v1025_v1  ;;  %v1066_v5 = vpop.f32.mrb[1].mxu1  ;;  %v1028_v6 = vpop.f32.mrb[2].mxu0 }
  0xfd   : > { %v1067_v7 = vadd.f32 %v1066_v5, %v1065_v2  ;;  %v1068_v8 = vpop.f32.mrb[2].mxu1  ;;  %v1029_v9 = vpop.f32.mrb[3].mxu0 }
  0xfe   : > { %v1030_v10 = vadd.f32 %v1029_v9, %v1028_v6  ;;  %v1069_v11 = vpop.f32.mrb[3].mxu1  ;;  %v826_v9 = vpop.permute.xlu1 %825 }
  0xff   : > { %v1070_v12 = vadd.f32 %v1069_v11, %v1068_v8  ;;  %v703_v13 = vadd.f32 %v1067_v7, %v1027_v4 }
 0x101   : > { %v706_v14 = vadd.f32 %v1070_v12, %v1030_v10 }
 0x102   : > { %v1031_v15 = vpop.f32.mrb[4].mxu0 }
 0x103   : > { %v1071_v16 = vpop.f32.mrb[4].mxu1  ;;  %v1032_v17 = vpop.f32.mrb[5].mxu0 }
 0x104   : > { %v1033_v18 = vadd.f32 %v1032_v17, %v1031_v15  ;;  %v1072_v19 = vpop.f32.mrb[5].mxu1  ;;  %v1034_v20 = vpop.f32.mrb[6].mxu0 }
 0x105   : > { %v1073_v21 = vadd.f32 %v1072_v19, %v1071_v16  ;;  %v1074_v22 = vpop.f32.mrb[6].mxu1  ;;  %v1035_v23 = vpop.f32.mrb[7].mxu0 }
 0x106   : > { %v1036_v24 = vadd.f32 %v1035_v23, %v1034_v20  ;;  %v1075_v25 = vpop.f32.mrb[7].mxu1  ;;  %v821_v16 = vpop.permute.xlu0 %820 }
 0x107   : > { %v1076_v26 = vadd.f32 %v1075_v25, %v1074_v22  ;;  %v711_v27 = vadd.f32 %v1073_v21, %v1033_v18 }
 0x109   : > { %v714_v28 = vadd.f32 %v1076_v26, %v1036_v24 }
 0x10a   : > { %v1037_v29 = vpop.f32.mrb[8].mxu0 }
 0x10b   : > { %v1077_v30 = vpop.f32.mrb[8].mxu1  ;;  %v1038_v31 = vpop.f32.mrb[9].mxu0 }
 0x10c   : > { %v1039_v32 = vadd.f32 %v1038_v31, %v1037_v29  ;;  %v1078_v33 = vpop.f32.mrb[9].mxu1  ;;  %v1040_v34 = vpop.f32.mrb[10].mxu0 }
 0x10d   : > { %v1079_v35 = vadd.f32 %v1078_v33, %v1077_v30  ;;  %v1080_v36 = vpop.f32.mrb[10].mxu1  ;;  %v1041_v37 = vpop.f32.mrb[11].mxu0 }
 0x10e   : > { %v1042_v38 = vadd.f32 %v1041_v37, %v1040_v34  ;;  %v1081_v39 = vpop.f32.mrb[11].mxu1 }
 0x10f   : > { %v1082_v40 = vadd.f32 %v1081_v39, %v1080_v36  ;;  %v719_v41 = vadd.f32 %v1079_v35, %v1039_v32 }
 0x111   : > { %v722_v43 = vadd.f32 %v1082_v40, %v1042_v38 }
 0x112   : > { %v1043_v45 = vpop.f32.mrb[12].mxu0 }
 0x113   : > { %v1083_v46 = vpop.f32.mrb[12].mxu1  ;;  %v1044_v47 = vpop.f32.mrb[13].mxu0 }
 0x114   : > { %v1045_v48 = vadd.f32 %v1044_v47, %v1043_v45  ;;  %v1084_v49 = vpop.f32.mrb[13].mxu1  ;;  %v1046_v50 = vpop.f32.mrb[14].mxu0 }
 0x115   : > { %v1085_v51 = vadd.f32 %v1084_v49, %v1083_v46  ;;  %v1086_v52 = vpop.f32.mrb[14].mxu1  ;;  %v1047_v53 = vpop.f32.mrb[15].mxu0 }
 0x116   : > { %v1048_v54 = vadd.f32 %v1047_v53, %v1046_v50  ;;  %v1087_v55 = vpop.f32.mrb[15].mxu1 }
 0x117   : > { %v1088_v56 = vadd.f32 %v1087_v55, %v1086_v52  ;;  %v727_v57 = vadd.f32 %v1085_v51, %v1045_v48 }
 0x119   : > { %v730_v60 = vadd.f32 %v1088_v56, %v1048_v54 }
 0x11a   : > { %v1107_v61 = vpop.f32.mrb[16].mxu0 }
 0x11b   : > { %v776_v62 = vadd.f32 %v1107_v61, %v711_v27  ;;  %v1111_v63 = vpop.f32.mrb[16].mxu1  ;;  %v767_v0 = vpop.f32.mrb[17].mxu0 }
 0x11c   : > { %v792_v1 = vadd.f32 %v1111_v63, %v727_v57  ;;  %v768_v2 = vadd.f32 %v767_v0, %v703_v13  ;;  %v783_v3 = vpop.f32.mrb[17].mxu1  ;;  %v1108_v4 = vpop.f32.mrb[18].mxu0 }
 0x11d   : > { %v784_v5 = vadd.f32 %v783_v3, %v719_v41  ;;  %v779_v6 = vadd.f32 %v1108_v4, %v714_v28  ;;  %v1112_v7 = vpop.f32.mrb[18].mxu1  ;;  %v770_v8 = vpop.f32.mrb[19].mxu0  ;;  %v840_v18 = vmul.f32 %v811_v44, %v776_v62 }
 0x11e   : > { %v838_v10 = vmul.f32 %v801_v42, %v768_v2  ;;  %v795_v11 = vadd.f32 %v1112_v7, %v730_v60  ;;  %v771_v12 = vadd.f32 %v770_v8, %v706_v14  ;;  %v786_v15 = vpop.f32.mrb[19].mxu1  ;;  %v836_v27 = vpop.permute.xlu1 %835 }
 0x11f   : > { %v787_v17 = vadd.f32 %v786_v15, %v722_v43  ;;  %v841_v21 = vmul.f32 %v816_v58, %v779_v6  ;;  %v864_v13 = vmul.f32 %v840_v18, %v840_v18  ;;  %v842_v24 = vmul.f32 %v821_v16, %v784_v5  ;;  %v831_v28 = vpop.permute.xlu0 %830 }
 0x120   : > { %v839_v19 = vmul.f32 %v806_v59, %v771_v12  ;;  %v862_v20 = vmul.f32 %v838_v10, %v838_v10  ;;  %v845_v14 = vmul.f32 %v836_v27, %v795_v11  ;;  %v844_v34 = vmul.f32 %v831_v28, %v792_v1 }
 0x121   : > { %v865_v29 = vmul.f32 %v841_v21, %v841_v21  ;;  %v843_v31 = vmul.f32 %v826_v9, %v787_v17  ;;  %v866_v33 = vmul.f32 %v842_v24, %v842_v24 }
 0x122   : > { %v846_v22 = vadd.f32 %v839_v19, %v838_v10  ;;  %v863_v23 = vmul.f32 %v839_v19, %v839_v19  ;;  %v869_v40 = vmul.f32 %v845_v14, %v845_v14  ;;  %v868_v41 = vmul.f32 %v844_v34, %v844_v34 }
 0x123   : > { %v867_v38 = vmul.f32 %v843_v31, %v843_v31  ;;  %v853_v44 = vsel %vm852_vm1, %v845_v14, 0.0 }
 0x124   : > { %v847_v25 = vadd.f32 %v846_v22, %v840_v18  ;;  %v870_v26 = vadd.f32 %v863_v23, %v862_v20  ;;  %v876_v47 = vsel %vm852_vm1, %v869_v40, 0.0 }
 0x126   : > { %v871_v30 = vadd.f32 %v870_v26, %v864_v13  ;;  %v848_v32 = vadd.f32 %v847_v25, %v841_v21 }
 0x128   : > { %v849_v35 = vadd.f32 %v848_v32, %v842_v24  ;;  %v872_v36 = vadd.f32 %v871_v30, %v865_v29 }
 0x12a   : > { %v850_v37 = vadd.f32 %v849_v35, %v843_v31  ;;  %v873_v39 = vadd.f32 %v872_v36, %v866_v33 }
 0x12c   : > { %v874_v42 = vadd.f32 %v873_v39, %v867_v38  ;;  %v851_v43 = vadd.f32 %v850_v37, %v844_v34 }
 0x12e   : > { %v854_v45 = vadd.f32 %v853_v44, %v851_v43  ;;  %v875_v46 = vadd.f32 %v874_v42, %v868_v41 }
 0x130   : > { %v855_v48 = vrot.slane %v854_v45, 4  ;;  %v877_v49 = vadd.f32 %v876_v47, %v875_v46 }
 0x132   : > { %v856_v50 = vadd.f32 %v855_v48, %v854_v45  ;;  %v878_v51 = vrot.slane %v877_v49, 4 }
 0x134   : > { %v857_v52 = vrot.slane %v856_v50, 2  ;;  %v879_v53 = vadd.f32 %v878_v51, %v877_v49 }
 0x136   : > { %v858_v54 = vadd.f32 %v857_v52, %v856_v50  ;;  %v880_v55 = vrot.slane %v879_v53, 2 }
 0x138   : > { %v859_v56 = vrot.slane %v858_v54, 1  ;;  %v881_v57 = vadd.f32 %v880_v55, %v879_v53 }
 0x13a   : > { %v860_v58 = vadd.f32 %v859_v56, %v858_v54  ;;  %v882_v59 = vrot.slane %v881_v57, 1 }
 0x13c   : > { %v883_v60 = vadd.f32 %v882_v59, %v881_v57  ;;  %885 = vst [vmem:[%s168_s7] sm:$0x1] %v860_v58 }
 0x13e   : > { %886 = vst [vmem:[%s168_s7 + $0x1] sm:$0x1] %v883_v60 }
 0x13f PF: > { %s13_s12 = sadd.s32 1, %s1203_s12  }
 0x140   : > { %p10_p4 = scmp.ge.s32.totalorder %s13_s12, 4  }
 0x142   :  { %12 = sbr.rel (!%p10_p4) target bundleno = 1 (0x1), region = 62 }

// kernel: convnet_forward.8
= control target key start
LH: loop header
LB: loop body
LE: loop exit
PB: predicated region body
PF: predicated region fallthrough
CT: control target
= control target key end

     0   :  { %s1389_s15 = smov 0   ;;  %s1569_s0 = inlined_call_operand.vmem [shape: bf16[2,63,576], index: 0, kind: input, shape index: {}]   ;;  %s1570_s1 = inlined_call_operand.vmem [shape: bf16[576,128], index: 1, kind: input, shape index: {}]   ;;  %s1571_s2 = inlined_call_operand.vmem [shape: f32[1,128], index: 2, kind: input, shape index: {}]   ;;  %s1572_s3 = inlined_call_operand.vmem [shape: f32[1,128], index: 3, kind: input, shape index: {}]   ;;  %s1573_s4 = inlined_call_operand.vmem [shape: bf16[2,63,32], index: 4, kind: output, shape index: {}]  }
   0x1 LB: > { %s1038_s16 = sadd.s32 4294967295, %s1360_s15   ;;  %p1042_p0 = scmp.ge.s32.totalorder %s1360_s15, 1  ;;  %s1360_s15 = sphi %s1389_s15, %s14_s15  }
   0x2   : > { %p162_p1 = scmp.lt.s32.totalorder %s1360_s15, 3 }
   0x4   : > { %p163_p2 = pnand %p1042_p0, %p162_p1 }
   0x5   : > { %v1290_v0 = vld [vmem:[%s1570_s1 + $0x40] sm:$0xff] (!%p163_p2)   ;;  %v1294_v4 = vld [vmem:[%s1570_s1 + $0x48] sm:$0xff] (!%p163_p2)   ;;  %v1298_v8 = vld [vmem:[%s1570_s1 + $0x50] sm:$0xff] (!%p163_p2)   ;;  %p188_p3 = scmp.lt.s32.totalorder (!%p163_p2), %s1038_s16, 1  ;;  %vm613_vm0 = vcmask (!%p163_p2), 523264   ;;  %s1362_s25 = smov (!%p163_p2), 96  }
   0x6   : > { %166 = sbr.rel (%p163_p2) target bundleno = 547 (0x223), region = 36  ;;  %v1291_v1 = vld [vmem:[%s1570_s1 + $0xc0] sm:$0xff] (!%p163_p2)   ;;  %1127 = vmatprep.subr.bf16.mxu0 (!%p163_p2), %v1290_v0  ;;  %v1295_v5 = vld [vmem:[%s1570_s1 + $0xc8] sm:$0xff] (!%p163_p2)   ;;  %v1299_v9 = vld [vmem:[%s1570_s1 + $0xd0] sm:$0xff] (!%p163_p2)   ;;  %s1363_s26 = smov (!%p163_p2), 64   ;;  %vm969_vm1 = vcmask (!%p163_p2), 257024  }
   0x7   : > { %v1292_v2 = vld [vmem:[%s1570_s1] sm:$0xff] (!%p163_p2)   ;;  %1167 = vmatprep.subr.bf16.mxu1 (!%p163_p2), %v1291_v1  ;;  %v1296_v6 = vld [vmem:[%s1570_s1 + $0x8] sm:$0xff] (!%p163_p2)   ;;  %v1300_v10 = vld [vmem:[%s1570_s1 + $0x10] sm:$0xff] (!%p163_p2)   ;;  %vm978_vm2 = vsmask.f32 (!%p163_p2), 3328 }
   0x8   : > { %v1293_v3 = vld [vmem:[%s1570_s1 + $0x80] sm:$0xff] (!%p163_p2)   ;;  %1128 = vmatpush3.bf16.msra.mxu0 (!%p163_p2), %v1292_v2  ;;  %v1297_v7 = vld [vmem:[%s1570_s1 + $0x88] sm:$0xff] (!%p163_p2)   ;;  %v1301_v11 = vld [vmem:[%s1570_s1 + $0x90] sm:$0xff] (!%p163_p2)  }
   0x9   : > { %1168 = vmatpush3.bf16.msra.mxu1 (!%p163_p2), %v1293_v3  ;;  %1129 = vmatprep.subr.bf16.mxu0 (!%p163_p2), %v1294_v4  ;;  %v1302_v12 = vld [vmem:[%s1570_s1 + $0x58] sm:$0xff] (!%p163_p2)   ;;  %v1306_v16 = vld [vmem:[%s1570_s1 + $0x60] sm:$0xff] (!%p163_p2)   ;;  %v1310_v20 = vld [vmem:[%s1570_s1 + $0x68] sm:$0xff] (!%p163_p2)  }
   0xa   : > { %1169 = vmatprep.subr.bf16.mxu1 (!%p163_p2), %v1295_v5  ;;  %v1303_v13 = vld [vmem:[%s1570_s1 + $0xd8] sm:$0xff] (!%p163_p2)   ;;  %v1307_v17 = vld [vmem:[%s1570_s1 + $0xe0] sm:$0xff] (!%p163_p2)   ;;  %v1311_v21 = vld [vmem:[%s1570_s1 + $0xe8] sm:$0xff] (!%p163_p2)  }
   0xb   : > { %v1304_v14 = vld [vmem:[%s1570_s1 + $0x18] sm:$0xff] (!%p163_p2)   ;;  %v1308_v18 = vld [vmem:[%s1570_s1 + $0x20] sm:$0xff] (!%p163_p2)   ;;  %v1312_v22 = vld [vmem:[%s1570_s1 + $0x28] sm:$0xff] (!%p163_p2)  }
   0xc   : > { %1130 = vmatpush3.bf16.msra.mxu0 (!%p163_p2), %v1296_v6  ;;  %v1305_v15 = vld [vmem:[%s1570_s1 + $0x98] sm:$0xff] (!%p163_p2)   ;;  %v1309_v19 = vld [vmem:[%s1570_s1 + $0xa0] sm:$0xff] (!%p163_p2)   ;;  %v1313_v23 = vld [vmem:[%s1570_s1 + $0xa8] sm:$0xff] (!%p163_p2)  }
   0xd   : > { %1170 = vmatpush3.bf16.msra.mxu1 %v1297_v7  ;;  %1131 = vmatprep.subr.bf16.mxu0 %v1298_v8  ;;  %s1575_s16 = smov (!%p188_p3, %s1038_s16), 1  ;;  %v1314_v24 = vld [vmem:[%s1570_s1 + $0x70] sm:$0xff]   ;;  %v1318_v28 = vld [vmem:[%s1570_s1 + $0x78] sm:$0xff]   ;;  %v1328_v36 = vld [vmem:[%s1570_s1 + $0x100] sm:$0xff]  }
   0xe   : > { %1171 = vmatprep.subr.bf16.mxu1 %v1299_v9  ;;  %v1315_v25 = vld [vmem:[%s1570_s1 + $0xf0] sm:$0xff]   ;;  %s1239_s21 = smul.u32 160, %s1575_s16  ;;  %v1319_v29 = vld [vmem:[%s1570_s1 + $0xf8] sm:$0xff]   ;;  %v1335_v39 = vld [vmem:[%s1570_s1 + $0x108] sm:$0xff]   ;;  %s1118_s27 = sshll.u32 %s1575_s16, 5 }
   0xf   : > { %v1316_v26 = vld [vmem:[%s1570_s1 + $0x30] sm:$0xff]   ;;  %v1320_v30 = vld [vmem:[%s1570_s1 + $0x38] sm:$0xff]   ;;  %s1547_s30 = scalar_lea.vmem %s1573_s4, %s1118_s27  ;;  %vm979_vm3 = vmand %vm969_vm1, %vm978_vm2 }
  0x10   : > { %1132 = vmatpush3.bf16.msra.mxu0 %v1300_v10  ;;  %v1317_v27 = vld [vmem:[%s1570_s1 + $0xb0] sm:$0xff]   ;;  %s1497_s6 = scalar_lea.vmem %s1569_s0, %s1239_s21  ;;  %v1321_v31 = vld [vmem:[%s1570_s1 + $0xb8] sm:$0xff]  }
  0x11   : > { %1172 = vmatpush3.bf16.msra.mxu1 %v1301_v11  ;;  %1133 = vmatprep.subr.bf16.mxu0 %v1302_v12  ;;  %v1322_v32 = vld [vmem:[%s1497_s6] ss:$20 sps:$4 sm:$0xff]   ;;  %v1324_v33 = vld [vmem:[%s1497_s6 + $0x4] ss:$20 sps:$4 sm:$0xff]   ;;  %v1325_v34 = vld [vmem:[%s1497_s6 + $0x8] ss:$20 sps:$4 sm:$0xff]  }
  0x12   : > { %1173 = vmatprep.subr.bf16.mxu1 %v1303_v13  ;;  %v1327_v35 = vld [vmem:[%s1497_s6 + $0xc] ss:$20 sps:$4 sm:$0xff]   ;;  %658 = vmatprep.mubr.bf16.mxu0 %v1324_v33  ;;  %v1331_v38 = vld [vmem:[%s1497_s6 + $0x34] ss:$20 sps:$4 sm:$0xff]   ;;  %v1334_v41 = vld [vmem:[%s1497_s6 + $0x30] ss:$20 sps:$4 sm:$0xff]  }
  0x13   : > { %723 = vmatprep.mubr.bf16.mxu1 %v1327_v35  ;;  %v1329_v37 = vld [vmem:[%s1497_s6 + $0x2c] ss:$20 sps:$4 sm:$0xff]   ;;  %v1333_v40 = vld [vmem:[%s1497_s6 + $0x28] ss:$20 sps:$4 sm:$0xff]   ;;  %v1342_v44 = vld [vmem:[%s1570_s1 + $0x110] sm:$0xff]  }
  0x14   : > { %1134 = vmatpush3.bf16.msra.mxu0 %v1304_v14  ;;  %v1336_v42 = vld [vmem:[%s1497_s6 + $0x54] ss:$20 sps:$4 sm:$0xff]   ;;  %v1338_v43 = vld [vmem:[%s1497_s6 + $0x5c] ss:$20 sps:$4 sm:$0xff]   ;;  %v1341_v47 = vld [vmem:[%s1497_s6 + $0x58] ss:$20 sps:$4 sm:$0xff]  }
  0x15   : > { %1174 = vmatpush3.bf16.msra.mxu1 %v1305_v15  ;;  %1135 = vmatprep.subr.bf16.mxu0 %v1306_v16  ;;  %v1349_v45 = vld [vmem:[%s1570_s1 + $0x118] sm:$0xff]   ;;  %v1340_v46 = vld [vmem:[%s1497_s6 + $0x50] ss:$20 sps:$4 sm:$0xff]   ;;  %v1348_v51 = vld [vmem:[%s1497_s6 + $0x80] ss:$20 sps:$4 sm:$0xff]  }
  0x16   : > { %1175 = vmatprep.subr.bf16.mxu1 %v1307_v17  ;;  %v1343_v48 = vld [vmem:[%s1497_s6 + $0x7c] ss:$20 sps:$4 sm:$0xff]   ;;  %v1345_v49 = vld [vmem:[%s1497_s6 + $0x84] ss:$20 sps:$4 sm:$0xff]   ;;  %v1351_v53 = vld [vmem:[%s1497_s6 + $0x60] ss:$20 sps:$4 sm:$0xff]  }
  0x17   : > { %v1347_v50 = vld [vmem:[%s1497_s6 + $0x78] ss:$20 sps:$4 sm:$0xff]   ;;  %v1350_v52 = vld [vmem:[%s1497_s6 + $0x10] ss:$20 sps:$4 sm:$0xff]   ;;  %v1353_v55 = vld [vmem:[%s1497_s6 + $0x88] ss:$20 sps:$4 sm:$0xff]  }
  0x18   : > { %1136 = vmatpush3.bf16.msra.mxu0 %v1308_v18  ;;  %v1352_v54 = vld [vmem:[%s1497_s6 + $0x38] ss:$20 sps:$4 sm:$0xff]  }
  0x19   : > { %1176 = vmatpush3.bf16.msra.mxu1 %v1309_v19  ;;  %1137 = vmatprep.subr.bf16.mxu0 %v1310_v20 }
  0x1a   : > { %1177 = vmatprep.subr.bf16.mxu1 %v1311_v21 }
  0x1c   : > { %1138 = vmatpush3.bf16.msra.mxu0 %v1312_v22 }
  0x1d   : > { %1178 = vmatpush3.bf16.msra.mxu1 %v1313_v23  ;;  %1139 = vmatprep.subr.bf16.mxu0 %v1314_v24 }
  0x1e   : > { %1179 = vmatprep.subr.bf16.mxu1 %v1315_v25 }
  0x20   : > { %1140 = vmatpush3.bf16.msra.mxu0 %v1316_v26 }
  0x21   : > { %1180 = vmatpush3.bf16.msra.mxu1 %v1317_v27  ;;  %1141 = vmatprep.subr.bf16.mxu0 %v1318_v28 }
  0x22   : > { %1181 = vmatprep.subr.bf16.mxu1 %v1319_v29 }
  0x24   : > { %1142 = vmatpush3.bf16.msra.mxu0 %v1320_v30 }
  0x25   : > { %1182 = vmatpush3.bf16.msra.mxu1 %v1321_v31  ;;  %1215 = vmatprep.subr.bf16.mxu0 %v1328_v36 }
  0x26   : > { %1231 = vmatprep.subr.bf16.mxu1 %v1328_v36 }
  0x27   : > { %659 = vmatmul.mubr.bf16.vlgmr.msra.gmra.mrb[0].mxu0 %v1322_v32 }
  0x28   : > { %724 = vmatmul.mubr.bf16.vlgmr.msra.gmra.mrb[0].mxu1 %v1325_v34  ;;  %1216 = vmatpush3.bf16.msra.mxu0 %v1328_v36 }
  0x29   : > { %1235 = vmatpush3.bf16.msra.mxu1 %v1328_v36  ;;  %666 = vmatprep.mubr.bf16.mxu0 %v1329_v37 }
  0x2a   : > { %731 = vmatprep.mubr.bf16.mxu1 %v1331_v38  ;;  %1232 = vmatprep.subr.bf16.mxu1 %v1335_v39 }
  0x2b   : > { %1217 = vmatprep.subr.bf16.mxu0 %v1335_v39 }
  0x2c   : > { %1218 = vmatpush3.bf16.msra.mxu0 %v1335_v39 }
  0x2d   : > { %1236 = vmatpush3.bf16.msra.mxu1 %v1335_v39  ;;  %1219 = vmatprep.subr.bf16.mxu0 %v1342_v44 }
  0x2e   : > { %1233 = vmatprep.subr.bf16.mxu1 %v1342_v44 }
  0x2f   : > { %667 = vmatmul.mubr.bf16.gmra.mrb[4].mxu0 %v1333_v40 }
  0x30   : > { %732 = vmatmul.mubr.bf16.gmra.mrb[4].mxu1 %v1334_v41  ;;  %674 = vmatprep.mubr.bf16.mxu0 %v1336_v42 }
  0x31   : > { %739 = vmatprep.mubr.bf16.mxu1 %v1338_v43  ;;  %1237 = vmatpush3.bf16.msra.mxu1 %v1342_v44 }
  0x32   : > { %1220 = vmatpush3.bf16.msra.mxu0 %v1342_v44  ;;  %1234 = vmatprep.subr.bf16.mxu1 %v1349_v45 }
  0x33   : > { %1221 = vmatprep.subr.bf16.mxu0 %v1349_v45 }
  0x35   : > { %1238 = vmatpush3.bf16.msra.mxu1 %v1349_v45 }
  0x36   : > { %1222 = vmatpush3.bf16.msra.mxu0 %v1349_v45 }
  0x37   : > { %675 = vmatmul.mubr.bf16.gmra.mrb[8].mxu0 %v1340_v46 }
  0x38   : > { %740 = vmatmul.mubr.bf16.gmra.mrb[8].mxu1 %v1341_v47  ;;  %682 = vmatprep.mubr.bf16.mxu0 %v1343_v48 }
  0x39   : > { %747 = vmatprep.mubr.bf16.mxu1 %v1345_v49  ;;  %v1106_v49 = vld [vmem:[%s1571_s2] ss:$0 sm:$0xff] }
  0x3f   : > { %683 = vmatmul.mubr.bf16.gmra.mrb[12].mxu0 %v1347_v50 }
  0x40   : > { %748 = vmatmul.mubr.bf16.gmra.mrb[12].mxu1 %v1348_v51  ;;  %1223 = vmatprep.mubr.msk.bf16.mxu0 %vm613_vm0, %v1350_v52 }
  0x41   : > { %1227 = vmatprep.mubr.msk.bf16.mxu1 %vm613_vm0, %v1351_v53 }
  0x47   : > { %1224 = vmatmul.mubr.msk.bf16.vlgmr.msra.gmra.mrb[16].mxu0 %vm613_vm0, %v1352_v54 }
  0x48   : > { %1228 = vmatmul.mubr.msk.bf16.vlgmr.msra.gmra.mrb[16].mxu1 %vm613_vm0, %v1353_v55 }
  0xfa   : > { %v1143_v56 = vpop.f32.mrb[0].mxu0 }
  0xfb   : > { %v1183_v57 = vpop.f32.mrb[0].mxu1  ;;  %v1144_v58 = vpop.f32.mrb[1].mxu0 }
  0xfc   : > { %v1145_v59 = vadd.f32 %v1144_v58, %v1143_v56  ;;  %v1184_v60 = vpop.f32.mrb[1].mxu1  ;;  %v1146_v61 = vpop.f32.mrb[2].mxu0 }
  0xfd   : > { %v1185_v62 = vadd.f32 %v1184_v60, %v1183_v57  ;;  %v1186_v63 = vpop.f32.mrb[2].mxu1  ;;  %v1147_v0 = vpop.f32.mrb[3].mxu0  ;;  %v1107_v57 = vld [vmem:[%s1572_s3] ss:$0 sm:$0xff] }
  0xfe   : > { %v1148_v1 = vadd.f32 %v1147_v0, %v1146_v61  ;;  %v1187_v2 = vpop.f32.mrb[3].mxu1 }
  0xff   : > { %v1188_v3 = vadd.f32 %v1187_v2, %v1186_v63  ;;  %v726_v4 = vadd.f32 %v1185_v62, %v1145_v59 }
 0x101   : > { %v729_v5 = vadd.f32 %v1188_v3, %v1148_v1 }
 0x102   : > { %v1149_v6 = vpop.f32.mrb[4].mxu0 }
 0x103   : > { %v1189_v7 = vpop.f32.mrb[4].mxu1  ;;  %v1150_v8 = vpop.f32.mrb[5].mxu0 }
 0x104   : > { %v1151_v9 = vadd.f32 %v1150_v8, %v1149_v6  ;;  %v1190_v10 = vpop.f32.mrb[5].mxu1  ;;  %v1152_v11 = vpop.f32.mrb[6].mxu0 }
 0x105   : > { %v1191_v12 = vadd.f32 %v1190_v10, %v1189_v7  ;;  %v1192_v13 = vpop.f32.mrb[6].mxu1  ;;  %v1153_v14 = vpop.f32.mrb[7].mxu0 }
 0x106   : > { %v1154_v15 = vadd.f32 %v1153_v14, %v1152_v11  ;;  %v1193_v16 = vpop.f32.mrb[7].mxu1 }
 0x107   : > { %v1194_v17 = vadd.f32 %v1193_v16, %v1192_v13  ;;  %v734_v18 = vadd.f32 %v1191_v12, %v1151_v9 }
 0x109   : > { %v737_v19 = vadd.f32 %v1194_v17, %v1154_v15 }
 0x10a   : > { %v1155_v20 = vpop.f32.mrb[8].mxu0 }
 0x10b   : > { %v1195_v21 = vpop.f32.mrb[8].mxu1  ;;  %v1156_v22 = vpop.f32.mrb[9].mxu0 }
 0x10c   : > { %v1157_v23 = vadd.f32 %v1156_v22, %v1155_v20  ;;  %v1196_v24 = vpop.f32.mrb[9].mxu1  ;;  %v1158_v25 = vpop.f32.mrb[10].mxu0 }
 0x10d   : > { %v1197_v26 = vadd.f32 %v1196_v24, %v1195_v21  ;;  %v1198_v27 = vpop.f32.mrb[10].mxu1  ;;  %v1159_v28 = vpop.f32.mrb[11].mxu0 }
 0x10e   : > { %v1160_v29 = vadd.f32 %v1159_v28, %v1158_v25  ;;  %v1199_v30 = vpop.f32.mrb[11].mxu1 }
 0x10f   : > { %v1200_v31 = vadd.f32 %v1199_v30, %v1198_v27  ;;  %v742_v32 = vadd.f32 %v1197_v26, %v1157_v23 }
 0x111   : > { %v745_v33 = vadd.f32 %v1200_v31, %v1160_v29 }
 0x112   : > { %v1161_v34 = vpop.f32.mrb[12].mxu0 }
 0x113   : > { %v1201_v35 = vpop.f32.mrb[12].mxu1  ;;  %v1162_v36 = vpop.f32.mrb[13].mxu0 }
 0x114   : > { %v1163_v37 = vadd.f32 %v1162_v36, %v1161_v34  ;;  %v1202_v38 = vpop.f32.mrb[13].mxu1  ;;  %v1164_v39 = vpop.f32.mrb[14].mxu0 }
 0x115   : > { %v1203_v40 = vadd.f32 %v1202_v38, %v1201_v35  ;;  %v1204_v41 = vpop.f32.mrb[14].mxu1  ;;  %v1165_v42 = vpop.f32.mrb[15].mxu0 }
 0x116   : > { %v1166_v43 = vadd.f32 %v1165_v42, %v1164_v39  ;;  %v1205_v44 = vpop.f32.mrb[15].mxu1 }
 0x117   : > { %v1206_v45 = vadd.f32 %v1205_v44, %v1204_v41  ;;  %v750_v46 = vadd.f32 %v1203_v40, %v1163_v37 }
 0x119   : > { %v753_v47 = vadd.f32 %v1206_v45, %v1166_v43 }
 0x11a   : > { %v1225_v48 = vpop.f32.mrb[16].mxu0 }
 0x11b   : > { %v799_v50 = vadd.f32 %v1225_v48, %v734_v18  ;;  %v1229_v51 = vpop.f32.mrb[16].mxu1  ;;  %v790_v52 = vpop.f32.mrb[17].mxu0 }
 0x11c   : > { %v815_v53 = vadd.f32 %v1229_v51, %v750_v46  ;;  %v791_v54 = vadd.f32 %v790_v52, %v726_v4  ;;  %v806_v55 = vpop.f32.mrb[17].mxu1  ;;  %v1226_v56 = vpop.f32.mrb[18].mxu0 }
 0x11d   : > { %v807_v58 = vadd.f32 %v806_v55, %v742_v32  ;;  %v802_v59 = vadd.f32 %v1226_v56, %v737_v19  ;;  %v1230_v60 = vpop.f32.mrb[18].mxu1  ;;  %v793_v61 = vpop.f32.mrb[19].mxu0  ;;  %v829_v8 = vmul.f32 %v1106_v49, %v799_v50 }
 0x11e   : > { %v827_v62 = vmul.f32 %v1106_v49, %v791_v54  ;;  %v818_v63 = vadd.f32 %v1230_v60, %v753_v47  ;;  %v794_v0 = vadd.f32 %v793_v61, %v729_v5  ;;  %v809_v1 = vpop.f32.mrb[19].mxu1  ;;  %v833_v2 = vmul.f32 %v1106_v49, %v815_v53 }
 0x11f   : > { %v831_v3 = vmul.f32 %v1106_v49, %v807_v58  ;;  %v830_v6 = vmul.f32 %v1106_v49, %v802_v59  ;;  %v810_v7 = vadd.f32 %v809_v1, %v745_v33  ;;  %v843_v5 = vadd.f32 %v1107_v57, %v829_v8  ;;  %v980_v59 = vld [vmem:[%s1547_s30 + $0x1c] sm:$0xf] }
 0x120   : > { %v834_v4 = vmul.f32 %v1106_v49, %v818_v63  ;;  %v828_v9 = vmul.f32 %v1106_v49, %v794_v0  ;;  %v841_v10 = vadd.f32 %v1107_v57, %v827_v62  ;;  %v847_v17 = vadd.f32 %v1107_v57, %v833_v2 }
 0x121   : > { %v832_v11 = vmul.f32 %v1106_v49, %v810_v7  ;;  %v844_v12 = vadd.f32 %v1107_v57, %v830_v6  ;;  %v845_v13 = vadd.f32 %v1107_v57, %v831_v3  ;;  %v851_v27 = vmax.f32 %v843_v5, 0.0 }
 0x122   : > { %v842_v14 = vadd.f32 %v1107_v57, %v828_v9  ;;  %v848_v15 = vadd.f32 %v1107_v57, %v834_v4  ;;  %v849_v16 = vmax.f32 %v841_v10, 0.0  ;;  %v855_v26 = vmax.f32 %v847_v17, 0.0 }
 0x123   : > { %v846_v18 = vadd.f32 %v1107_v57, %v832_v11  ;;  %v852_v19 = vmax.f32 %v844_v12, 0.0  ;;  %v853_v20 = vmax.f32 %v845_v13, 0.0 }
 0x124   : > { %v856_v21 = vmax.f32 %v848_v15, 0.0  ;;  %v850_v24 = vmax.f32 %v842_v14, 0.0 }
 0x125   : > { %v854_v22 = vmax.f32 %v846_v18, 0.0  ;;  %v1260_v23 = vpack.i.bf16 %v853_v20, %v852_v19 }
 0x126   : > { %v1250_v25 = vpack.i.bf16 %v849_v16, %v856_v21  ;;  %v1255_v29 = vpack.i.bf16 %v851_v27, %v850_v24 }
 0x127   : > { %1261 = vrot.lane.b32.xlu1 %v1260_v23, %s1362_s25  ;;  %v1265_v28 = vpack.i.bf16 %v855_v26, %v854_v22 }
 0x128   : > { %1251 = vrot.lane.b32.xlu0 %v1250_v25, %s1362_s25 }
 0x12b   : > { %1266 = vrot.lane.b32.xlu1 %v1265_v28, %s1362_s25 }
 0x12c   : > { %1256 = vrot.lane.b32.xlu0 %v1255_v29, %s1362_s25 }
 0x199   : > { %v1262_v30 = vpop.permute.xlu1 %1261 }
 0x19a   : > { %v1264_v31 = vunpack.i.h.bf16 %v1262_v30  ;;  %v1263_v32 = vunpack.i.l.bf16 %v1262_v30  ;;  %v1252_v33 = vpop.permute.xlu0 %1251 }
 0x19b   : > { %v1254_v34 = vunpack.i.h.bf16 %v1252_v33  ;;  %v1253_v35 = vunpack.i.l.bf16 %v1252_v33 }
 0x19c   : > { %v893_v39 = vmax.f32 %v853_v20, %v1264_v31  ;;  %v892_v40 = vmax.f32 %v852_v19, %v1263_v32 }
 0x19d   : > { %v889_v36 = vmax.f32 %v849_v16, %v1254_v34  ;;  %v896_v37 = vmax.f32 %v856_v21, %v1253_v35  ;;  %v1267_v38 = vpop.permute.xlu1 %1266 }
 0x19e   : > { %v1269_v41 = vunpack.i.h.bf16 %v1267_v38  ;;  %v1257_v42 = vpop.permute.xlu0 %1256  ;;  %v1268_v43 = vunpack.i.l.bf16 %v1267_v38  ;;  %v1280_v52 = vpack.i.bf16 %v893_v39, %v892_v40 }
 0x19f   : > { %v1259_v44 = vunpack.i.h.bf16 %v1257_v42  ;;  %v1258_v45 = vunpack.i.l.bf16 %v1257_v42  ;;  %v1270_v46 = vpack.i.bf16 %v889_v36, %v896_v37 }
 0x1a0   : > { %v895_v49 = vmax.f32 %v855_v26, %v1269_v41  ;;  %v894_v50 = vmax.f32 %v854_v22, %v1268_v43 }
 0x1a1   : > { %v891_v47 = vmax.f32 %v851_v27, %v1259_v44  ;;  %v890_v48 = vmax.f32 %v850_v24, %v1258_v45  ;;  %1271 = vrot.lane.b32.xlu0 %v1270_v46, %s1363_s26 }
 0x1a2   : > { %v1285_v53 = vpack.i.bf16 %v895_v49, %v894_v50 }
 0x1a3   : > { %v1275_v51 = vpack.i.bf16 %v891_v47, %v890_v48 }
 0x1a5   : > { %1276 = vrot.lane.b32.xlu1 %v1275_v51, %s1363_s26  ;;  %1281 = vrot.lane.b32.xlu0 %v1280_v52, %s1363_s26 }
 0x1a9   : > { %1286 = vrot.lane.b32.xlu1 %v1285_v53, %s1363_s26 }
 0x213   : > { %v1272_v54 = vpop.permute.xlu0 %1271 }
 0x214   : > { %v1274_v55 = vunpack.i.h.bf16 %v1272_v54  ;;  %v1273_v56 = vunpack.i.l.bf16 %v1272_v54 }
 0x216   : > { %v929_v57 = vmax.f32 %v889_v36, %v1274_v55  ;;  %v936_v58 = vmax.f32 %v896_v37, %v1273_v56 }
 0x217   : > { %v1277_v60 = vpop.permute.xlu1 %1276  ;;  %v1282_v61 = vpop.permute.xlu0 %1281 }
 0x218   : > { %v1119_v62 = vpack.c.bf16 %v929_v57, %v929_v57  ;;  %v1126_v63 = vpack.c.bf16 %v936_v58, %v936_v58  ;;  %v1279_v0 = vunpack.i.h.bf16 %v1277_v60  ;;  %v1278_v1 = vunpack.i.l.bf16 %v1277_v60 }
 0x219   : > { %v1284_v2 = vunpack.i.h.bf16 %v1282_v61  ;;  %v1283_v3 = vunpack.i.l.bf16 %v1282_v61 }
 0x21a   : > { %970 = vst.msk [vmem:[%s1547_s30] sm:$0xf] %vm969_vm1, %v1119_v62  ;;  %v981_v6 = vsel %vm979_vm3, %v1126_v63, %v980_v59  ;;  %v931_v7 = vmax.f32 %v891_v47, %v1279_v0  ;;  %v930_v8 = vmax.f32 %v890_v48, %v1278_v1 }
 0x21b   : > { %982 = vst [vmem:[%s1547_s30 + $0x1c] sm:$0xf] %v981_v6  ;;  %v933_v4 = vmax.f32 %v893_v39, %v1284_v2  ;;  %v932_v9 = vmax.f32 %v892_v40, %v1283_v3  ;;  %v1287_v10 = vpop.permute.xlu1 %1286 }
 0x21c   : > { %v1121_v11 = vpack.c.bf16 %v931_v7, %v931_v7  ;;  %v1120_v12 = vpack.c.bf16 %v930_v8, %v930_v8  ;;  %v1289_v13 = vunpack.i.h.bf16 %v1287_v10  ;;  %v1288_v14 = vunpack.i.l.bf16 %v1287_v10 }
 0x21d   : > { %v1123_v15 = vpack.c.bf16 %v933_v4, %v933_v4  ;;  %v1122_v16 = vpack.c.bf16 %v932_v9, %v932_v9 }
 0x21e   : > { %972 = vst.msk [vmem:[%s1547_s30 + $0x8] sm:$0xf] %vm969_vm1, %v1121_v11  ;;  %971 = vst.msk [vmem:[%s1547_s30 + $0x4] sm:$0xf] %vm969_vm1, %v1120_v12  ;;  %v935_v17 = vmax.f32 %v895_v49, %v1289_v13  ;;  %v934_v18 = vmax.f32 %v894_v50, %v1288_v14 }
 0x21f   : > { %974 = vst.msk [vmem:[%s1547_s30 + $0x10] sm:$0xf] %vm969_vm1, %v1123_v15  ;;  %973 = vst.msk [vmem:[%s1547_s30 + $0xc] sm:$0xf] %vm969_vm1, %v1122_v16 }
 0x220   : > { %v1125_v19 = vpack.c.bf16 %v935_v17, %v935_v17  ;;  %v1124_v20 = vpack.c.bf16 %v934_v18, %v934_v18 }
 0x222   : > { %976 = vst.msk [vmem:[%s1547_s30 + $0x18] sm:$0xf] %vm969_vm1, %v1125_v19  ;;  %975 = vst.msk [vmem:[%s1547_s30 + $0x14] sm:$0xf] %vm969_vm1, %v1124_v20 }
 0x223 PF: > { %s14_s15 = sadd.s32 1, %s1360_s15  }
 0x224   : > { %p11_p4 = scmp.ge.s32.totalorder %s14_s15, 4  }
 0x226   :  { %13 = sbr.rel (!%p11_p4) target bundleno = 1 (0x1), region = 66 }

// kernel: convnet_forward.9
= control target key start
LH: loop header
LB: loop body
LE: loop exit
PB: predicated region body
PF: predicated region fallthrough
CT: control target
= control target key end

     0   :  { %v283_v28 = vlaneseq  ;;  %v1950_v36 = vmov 1966171168   ;;  %vm1148_vm0 = vcmask 785408   ;;  %s2413_s0 = inlined_call_operand.vmem [shape: bf16[2,2016], index: 0, kind: input, shape index: {}]   ;;  %s2414_s1 = inlined_call_operand.vmem [shape: bf16[2016,10], index: 1, kind: input, shape index: {}]   ;;  %s2415_s2 = inlined_call_operand.vmem [shape: f32[1,10], index: 2, kind: input, shape index: {}]   ;;  %s2416_s3 = inlined_call_operand.hbm [shape: f32[2,10], index: 3, kind: output, shape index: {}]  }
   0x1   :  { %v1794_v0 = vld [vmem:[%s2414_s1 + $0x40] sm:$0xff]   ;;  %v1798_v4 = vld [vmem:[%s2414_s1 + $0x48] sm:$0xff]   ;;  %v1802_v8 = vld [vmem:[%s2414_s1 + $0x50] sm:$0xff]   ;;  %v281_v37 = vunpack.c.l.s4 %v1950_v36 }
   0x2   :  { %v1795_v1 = vld [vmem:[%s2414_s1 + $0xc0] sm:$0xff]   ;;  %1637 = vmatprep.subr.bf16.mxu0 %v1794_v0  ;;  %v1799_v5 = vld [vmem:[%s2414_s1 + $0xc8] sm:$0xff]   ;;  %v1803_v9 = vld [vmem:[%s2414_s1 + $0xd0] sm:$0xff]   ;;  %v284_v33 = vshrl.u32 %v283_v28, 7 }
   0x3   :  { %v1796_v2 = vld [vmem:[%s2414_s1] sm:$0xff]   ;;  %1659 = vmatprep.subr.bf16.mxu1 %v1795_v1  ;;  %v1800_v6 = vld [vmem:[%s2414_s1 + $0x8] sm:$0xff]   ;;  %v1804_v10 = vld [vmem:[%s2414_s1 + $0x10] sm:$0xff]   ;;  %v282_v40 = vunpack.c.0.s8 %v281_v37 }
   0x4   :  { %v1797_v3 = vld [vmem:[%s2414_s1 + $0x80] sm:$0xff]   ;;  %1638 = vmatpush3.bf16.msra.mxu0 %v1796_v2  ;;  %v1801_v7 = vld [vmem:[%s2414_s1 + $0x88] sm:$0xff]   ;;  %v1805_v11 = vld [vmem:[%s2414_s1 + $0x90] sm:$0xff]  }
   0x5   :  { %1660 = vmatpush3.bf16.msra.mxu1 %v1797_v3  ;;  %1639 = vmatprep.subr.bf16.mxu0 %v1798_v4  ;;  %v1806_v12 = vld [vmem:[%s2414_s1 + $0x58] sm:$0xff]   ;;  %v1810_v16 = vld [vmem:[%s2414_s1 + $0x60] sm:$0xff]   ;;  %v1814_v20 = vld [vmem:[%s2414_s1 + $0x68] sm:$0xff]   ;;  %v2078_v41 = vsub.s32 %v282_v40, %v284_v33 }
   0x6   :  { %1661 = vmatprep.subr.bf16.mxu1 %v1799_v5  ;;  %v1807_v13 = vld [vmem:[%s2414_s1 + $0xd8] sm:$0xff]   ;;  %v1811_v17 = vld [vmem:[%s2414_s1 + $0xe0] sm:$0xff]   ;;  %v1815_v21 = vld [vmem:[%s2414_s1 + $0xe8] sm:$0xff]  }
   0x7   :  { %v1808_v14 = vld [vmem:[%s2414_s1 + $0x18] sm:$0xff]   ;;  %v1812_v18 = vld [vmem:[%s2414_s1 + $0x20] sm:$0xff]   ;;  %v1816_v22 = vld [vmem:[%s2414_s1 + $0x28] sm:$0xff]  }
   0x8   :  { %1640 = vmatpush3.bf16.msra.mxu0 %v1800_v6  ;;  %v1809_v15 = vld [vmem:[%s2414_s1 + $0x98] sm:$0xff]   ;;  %v1813_v19 = vld [vmem:[%s2414_s1 + $0xa0] sm:$0xff]   ;;  %v1817_v23 = vld [vmem:[%s2414_s1 + $0xa8] sm:$0xff]  }
   0x9   :  { %1662 = vmatpush3.bf16.msra.mxu1 %v1801_v7  ;;  %1641 = vmatprep.subr.bf16.mxu0 %v1802_v8  ;;  %v1818_v24 = vld [vmem:[%s2414_s1 + $0x70] sm:$0xff]   ;;  %v1822_v29 = vld [vmem:[%s2414_s1 + $0x78] sm:$0xff]   ;;  %v16_v34 = vld [vmem:[%s2413_s0] sm:$0xff] }
   0xa   :  { %1663 = vmatprep.subr.bf16.mxu1 %v1803_v9  ;;  %v1819_v25 = vld [vmem:[%s2414_s1 + $0xf0] sm:$0xff]   ;;  %v1823_v30 = vld [vmem:[%s2414_s1 + $0xf8] sm:$0xff]   ;;  %v1827_v35 = vld [vmem:[%s2414_s1 + $0x140] sm:$0xff]   ;;  %v279_v39 = vcombine.high %v16_v34, %v16_v34  ;;  %v286_v42 = vrot.slane %v16_v34, %v2078_v41 }
   0xb   :  { %v1820_v26 = vld [vmem:[%s2414_s1 + $0x30] sm:$0xff]   ;;  %v1824_v31 = vld [vmem:[%s2414_s1 + $0x38] sm:$0xff]   ;;  %v1828_v38 = vld [vmem:[%s2414_s1 + $0x1c0] sm:$0xff]  }
   0xc   :  { %1642 = vmatpush3.bf16.msra.mxu0 %v1804_v10  ;;  %v1821_v27 = vld [vmem:[%s2414_s1 + $0xb0] sm:$0xff]   ;;  %v1825_v32 = vld [vmem:[%s2414_s1 + $0xb8] sm:$0xff]   ;;  %v2082_v43 = vrot.slane %v279_v39, %v2078_v41  ;;  %v294_v44 = vcombine.high %v286_v42, %v286_v42  ;;  %v302_v45 = vrot.slane %v286_v42, %v2078_v41  ;;  %v1829_v48 = vld [vmem:[%s2414_s1 + $0x100] sm:$0xff]  }
   0xd   :  { %1664 = vmatpush3.bf16.msra.mxu1 %v1805_v11  ;;  %1643 = vmatprep.subr.bf16.mxu0 %v1806_v12  ;;  %v1831_v51 = vld [vmem:[%s2414_s1 + $0x148] sm:$0xff]   ;;  %v1830_v53 = vld [vmem:[%s2414_s1 + $0x180] sm:$0xff]   ;;  %v1835_v57 = vld [vmem:[%s2414_s1 + $0x150] sm:$0xff]  }
   0xe   :  { %1665 = vmatprep.subr.bf16.mxu1 %v1807_v13  ;;  %v295_v46 = vcombine.high %v2082_v43, %v2082_v43  ;;  %v316_v47 = vrot.slane %v294_v44, %v2078_v41  ;;  %v324_v50 = vcombine.high %v302_v45, %v302_v45  ;;  %v1832_v54 = vld [vmem:[%s2414_s1 + $0x1c8] sm:$0xff]   ;;  %v1836_v59 = vld [vmem:[%s2414_s1 + $0x1d0] sm:$0xff]   ;;  %v1839_v61 = vld [vmem:[%s2414_s1 + $0x158] sm:$0xff]  }
   0xf   :  { %v1833_v56 = vld [vmem:[%s2414_s1 + $0x108] sm:$0xff]   ;;  %v1837_v60 = vld [vmem:[%s2414_s1 + $0x110] sm:$0xff]   ;;  %v1840_v63 = vld [vmem:[%s2414_s1 + $0x1d8] sm:$0xff]  }
  0x10   :  { %1644 = vmatpush3.bf16.msra.mxu0 %v1808_v14  ;;  %v323_v49 = vrot.slane %v295_v46, %v2078_v41  ;;  %1184 = vmatprep.mubr.bf16.mxu0 %v316_v47  ;;  %v326_v52 = vcombine.high %v316_v47, %v316_v47  ;;  %v1834_v58 = vld [vmem:[%s2414_s1 + $0x188] sm:$0xff]   ;;  %v1838_v62 = vld [vmem:[%s2414_s1 + $0x190] sm:$0xff]   ;;  %v1841_v0 = vld [vmem:[%s2414_s1 + $0x118] sm:$0xff]  }
  0x11   :  { %1666 = vmatpush3.bf16.msra.mxu1 %v1809_v15  ;;  %1645 = vmatprep.subr.bf16.mxu0 %v1810_v16  ;;  %v1843_v1 = vld [vmem:[%s2414_s1 + $0x160] sm:$0xff]   ;;  %v1842_v2 = vld [vmem:[%s2414_s1 + $0x198] sm:$0xff]   ;;  %v1847_v5 = vld [vmem:[%s2414_s1 + $0x168] sm:$0xff]  }
  0x12   :  { %1667 = vmatprep.subr.bf16.mxu1 %v1811_v17  ;;  %v327_v55 = vcombine.high %v323_v49, %v323_v49  ;;  %1224 = vmatprep.mubr.bf16.mxu1 %v326_v52  ;;  %v1844_v3 = vld [vmem:[%s2414_s1 + $0x1e0] sm:$0xff]   ;;  %v1848_v7 = vld [vmem:[%s2414_s1 + $0x1e8] sm:$0xff]   ;;  %v1851_v9 = vld [vmem:[%s2414_s1 + $0x170] sm:$0xff]   ;;  %v309_v17 = vrot.slane %v2082_v43, %v2078_v41 }
  0x13   :  { %v1845_v4 = vld [vmem:[%s2414_s1 + $0x120] sm:$0xff]   ;;  %v1849_v8 = vld [vmem:[%s2414_s1 + $0x128] sm:$0xff]   ;;  %v1852_v11 = vld [vmem:[%s2414_s1 + $0x1f0] sm:$0xff]  }
  0x14   :  { %1646 = vmatpush3.bf16.msra.mxu0 %v1812_v18  ;;  %v1846_v6 = vld [vmem:[%s2414_s1 + $0x1a0] sm:$0xff]   ;;  %v1850_v10 = vld [vmem:[%s2414_s1 + $0x1a8] sm:$0xff]   ;;  %v1853_v12 = vld [vmem:[%s2414_s1 + $0x130] sm:$0xff]  }
  0x15   :  { %1668 = vmatpush3.bf16.msra.mxu1 %v1813_v19  ;;  %1647 = vmatprep.subr.bf16.mxu0 %v1814_v20  ;;  %v1855_v13 = vld [vmem:[%s2414_s1 + $0x178] sm:$0xff]   ;;  %v1854_v14 = vld [vmem:[%s2414_s1 + $0x1b0] sm:$0xff]   ;;  %v1859_v18 = vld [vmem:[%s2414_s1 + $0x240] sm:$0xff]  }
  0x16   :  { %1669 = vmatprep.subr.bf16.mxu1 %v1815_v21  ;;  %v1856_v15 = vld [vmem:[%s2414_s1 + $0x1f8] sm:$0xff]   ;;  %v1860_v20 = vld [vmem:[%s2414_s1 + $0x2c0] sm:$0xff]   ;;  %v1866_v28 = vld [vmem:[%s2414_s1 + $0x288] sm:$0xff]  }
  0x17   :  { %v1857_v16 = vld [vmem:[%s2414_s1 + $0x138] sm:$0xff]   ;;  %v1861_v21 = vld [vmem:[%s2414_s1 + $0x200] sm:$0xff]   ;;  %v1879_v39 = vld [vmem:[%s2414_s1 + $0x268] sm:$0xff]  }
  0x18   :  { %1648 = vmatpush3.bf16.msra.mxu0 %v1816_v22  ;;  %v1858_v19 = vld [vmem:[%s2414_s1 + $0x1b8] sm:$0xff]   ;;  %v325_v22 = vcombine.high %v309_v17, %v309_v17  ;;  %v1876_v37 = vld [vmem:[%s2414_s1 + $0x2e0] sm:$0xff]   ;;  %v1880_v42 = vld [vmem:[%s2414_s1 + $0x2e8] sm:$0xff]  }
  0x19   :  { %1670 = vmatpush3.bf16.msra.mxu1 %v1817_v23  ;;  %1649 = vmatprep.subr.bf16.mxu0 %v1818_v24  ;;  %v1863_v23 = vld [vmem:[%s2414_s1 + $0x248] sm:$0xff]   ;;  %v1862_v24 = vld [vmem:[%s2414_s1 + $0x280] sm:$0xff]   ;;  %v1872_v33 = vld [vmem:[%s2414_s1 + $0x2d8] sm:$0xff]  }
  0x1a   :  { %1671 = vmatprep.subr.bf16.mxu1 %v1819_v25  ;;  %v1864_v25 = vld [vmem:[%s2414_s1 + $0x2c8] sm:$0xff]   ;;  %v1873_v34 = vld [vmem:[%s2414_s1 + $0x218] sm:$0xff]   ;;  %v1878_v40 = vld [vmem:[%s2414_s1 + $0x2a0] sm:$0xff]  }
  0x1b   :  { %v1874_v36 = vld [vmem:[%s2414_s1 + $0x298] sm:$0xff]   ;;  %v1881_v43 = vld [vmem:[%s2414_s1 + $0x228] sm:$0xff]   ;;  %v1883_v44 = vld [vmem:[%s2414_s1 + $0x270] sm:$0xff]  }
  0x1c   :  { %1650 = vmatpush3.bf16.msra.mxu0 %v1820_v26  ;;  %v1865_v26 = vld [vmem:[%s2414_s1 + $0x208] sm:$0xff]  }
  0x1d   :  { %1672 = vmatpush3.bf16.msra.mxu1 %v1821_v27  ;;  %1651 = vmatprep.subr.bf16.mxu0 %v1822_v29  ;;  %v1867_v27 = vld [vmem:[%s2414_s1 + $0x250] sm:$0xff]   ;;  %v1882_v46 = vld [vmem:[%s2414_s1 + $0x2a8] sm:$0xff]  }
  0x1e   :  { %1673 = vmatprep.subr.bf16.mxu1 %v1823_v30  ;;  %v1868_v29 = vld [vmem:[%s2414_s1 + $0x2d0] sm:$0xff]  }
  0x1f   :  { %v1869_v30 = vld [vmem:[%s2414_s1 + $0x210] sm:$0xff]  }
  0x20   :  { %1652 = vmatpush3.bf16.msra.mxu0 %v1824_v31  ;;  %v1871_v31 = vld [vmem:[%s2414_s1 + $0x258] sm:$0xff]  }
  0x21   :  { %1674 = vmatpush3.bf16.msra.mxu1 %v1825_v32  ;;  %1681 = vmatprep.subr.bf16.mxu0 %v1827_v35  ;;  %v1870_v32 = vld [vmem:[%s2414_s1 + $0x290] sm:$0xff]   ;;  %v1875_v35 = vld [vmem:[%s2414_s1 + $0x260] sm:$0xff]  }
  0x22   :  { %1703 = vmatprep.subr.bf16.mxu1 %v1828_v38  ;;  %v1877_v38 = vld [vmem:[%s2414_s1 + $0x220] sm:$0xff]  }
  0x23   :  { %1185 = vmatmul.mubr.bf16.vlgmr.msra.gmra.mrb[0].mxu0 %v302_v45  ;;  %v17_v45 = vld [vmem:[%s2413_s0 + $0x8] sm:$0xff] }
  0x24   :  { %1682 = vmatpush3.bf16.msra.mxu0 %v1829_v48  ;;  %1225 = vmatmul.mubr.bf16.vlgmr.msra.gmra.mrb[0].mxu1 %v324_v50  ;;  %v335_v47 = vrot.slane %v17_v45, %v2078_v41  ;;  %v328_v48 = vcombine.high %v17_v45, %v17_v45  ;;  %v1885_v50 = vld [vmem:[%s2414_s1 + $0x230] sm:$0xff]  }
  0x25   :  { %1683 = vmatprep.subr.bf16.mxu0 %v1831_v51  ;;  %1704 = vmatpush3.bf16.msra.mxu1 %v1830_v53  ;;  %v1887_v53 = vld [vmem:[%s2414_s1 + $0x278] sm:$0xff]  }
  0x26   :  { %1264 = vmatprep.mubr.bf16.mxu0 %v323_v49  ;;  %1705 = vmatprep.subr.bf16.mxu1 %v1832_v54  ;;  %v1884_v49 = vld [vmem:[%s2414_s1 + $0x2f0] sm:$0xff]   ;;  %v343_v51 = vcombine.high %v335_v47, %v335_v47  ;;  %v2267_v52 = vrot.slane %v328_v48, %v2078_v41 }
  0x27   :  { %1304 = vmatprep.mubr.bf16.mxu1 %v327_v55  ;;  %v1886_v54 = vld [vmem:[%s2414_s1 + $0x2b0] sm:$0xff]  }
  0x28   :  { %1684 = vmatpush3.bf16.msra.mxu0 %v1833_v56  ;;  %v365_v55 = vrot.slane %v343_v51, %v2078_v41  ;;  %v1888_v56 = vld [vmem:[%s2414_s1 + $0x2f8] sm:$0xff]  }
  0x29   :  { %1685 = vmatprep.subr.bf16.mxu0 %v1835_v57  ;;  %1706 = vmatpush3.bf16.msra.mxu1 %v1834_v58  ;;  %v1889_v57 = vld [vmem:[%s2414_s1 + $0x238] sm:$0xff]  }
  0x2a   :  { %1707 = vmatprep.subr.bf16.mxu1 %v1836_v59  ;;  %v375_v58 = vcombine.high %v365_v55, %v365_v55  ;;  %v344_v59 = vcombine.high %v2267_v52, %v2267_v52 }
  0x2c   :  { %1686 = vmatpush3.bf16.msra.mxu0 %v1837_v60  ;;  %v351_v60 = vrot.slane %v335_v47, %v2078_v41 }
  0x2d   :  { %1687 = vmatprep.subr.bf16.mxu0 %v1839_v61  ;;  %1708 = vmatpush3.bf16.msra.mxu1 %v1838_v62  ;;  %v1891_v61 = vld [vmem:[%s2414_s1 + $0x340] sm:$0xff]   ;;  %v1890_v62 = vld [vmem:[%s2414_s1 + $0x2b8] sm:$0xff]  }
  0x2e   :  { %1709 = vmatprep.subr.bf16.mxu1 %v1840_v63  ;;  %v1892_v63 = vld [vmem:[%s2414_s1 + $0x300] sm:$0xff]  }
  0x30   :  { %1688 = vmatpush3.bf16.msra.mxu0 %v1841_v0  ;;  %v372_v0 = vrot.slane %v344_v59, %v2078_v41 }
  0x31   :  { %1689 = vmatprep.subr.bf16.mxu0 %v1843_v1  ;;  %1710 = vmatpush3.bf16.msra.mxu1 %v1842_v2  ;;  %v373_v1 = vcombine.high %v351_v60, %v351_v60  ;;  %v1894_v2 = vld [vmem:[%s2414_s1 + $0x348] sm:$0xff]  }
  0x32   :  { %1711 = vmatprep.subr.bf16.mxu1 %v1844_v3  ;;  %v1893_v3 = vld [vmem:[%s2414_s1 + $0x380] sm:$0xff]  }
  0x34   :  { %1690 = vmatpush3.bf16.msra.mxu0 %v1845_v4  ;;  %v376_v4 = vcombine.high %v372_v0, %v372_v0 }
  0x35   :  { %1691 = vmatprep.subr.bf16.mxu0 %v1847_v5  ;;  %1712 = vmatpush3.bf16.msra.mxu1 %v1846_v6  ;;  %v1951_v5 = vmov 0   ;;  %v1895_v6 = vld [vmem:[%s2414_s1 + $0x308] sm:$0xff]  }
  0x36   :  { %1713 = vmatprep.subr.bf16.mxu1 %v1848_v7  ;;  %v1897_v7 = vld [vmem:[%s2414_s1 + $0x350] sm:$0xff]  }
  0x38   :  { %1692 = vmatpush3.bf16.msra.mxu0 %v1849_v8  ;;  %v1896_v8 = vld [vmem:[%s2414_s1 + $0x388] sm:$0xff]  }
  0x39   :  { %1693 = vmatprep.subr.bf16.mxu0 %v1851_v9  ;;  %1714 = vmatpush3.bf16.msra.mxu1 %v1850_v10  ;;  %v1898_v9 = vld [vmem:[%s2414_s1 + $0x310] sm:$0xff]   ;;  %v1900_v10 = vld [vmem:[%s2414_s1 + $0x358] sm:$0xff]  }
  0x3a   :  { %1715 = vmatprep.subr.bf16.mxu1 %v1852_v11  ;;  %v1899_v11 = vld [vmem:[%s2414_s1 + $0x390] sm:$0xff]  }
  0x3c   :  { %1694 = vmatpush3.bf16.msra.mxu0 %v1853_v12  ;;  %v1901_v12 = vld [vmem:[%s2414_s1 + $0x318] sm:$0xff]  }
  0x3d   :  { %1695 = vmatprep.subr.bf16.mxu0 %v1855_v13  ;;  %1716 = vmatpush3.bf16.msra.mxu1 %v1854_v14  ;;  %v1903_v13 = vld [vmem:[%s2414_s1 + $0x360] sm:$0xff]   ;;  %v1902_v14 = vld [vmem:[%s2414_s1 + $0x398] sm:$0xff]  }
  0x3e   :  { %1717 = vmatprep.subr.bf16.mxu1 %v1856_v15  ;;  %v1904_v15 = vld [vmem:[%s2414_s1 + $0x320] sm:$0xff]  }
  0x40   :  { %1696 = vmatpush3.bf16.msra.mxu0 %v1857_v16  ;;  %v1906_v16 = vld [vmem:[%s2414_s1 + $0x368] sm:$0xff]  }
  0x41   :  { %1725 = vmatprep.subr.bf16.mxu0 %v1859_v18  ;;  %1718 = vmatpush3.bf16.msra.mxu1 %v1858_v19 }
  0x42   :  { %1747 = vmatprep.subr.bf16.mxu1 %v1860_v20 }
  0x43   :  { %1265 = vmatmul.mubr.bf16.vlgmr.msra.gmra.mrb[4].mxu0 %v309_v17  ;;  %v1905_v17 = vld [vmem:[%s2414_s1 + $0x3a0] sm:$0xff]  }
  0x44   :  { %1726 = vmatpush3.bf16.msra.mxu0 %v1861_v21  ;;  %1305 = vmatmul.mubr.bf16.vlgmr.msra.gmra.mrb[4].mxu1 %v325_v22 }
  0x45   :  { %1727 = vmatprep.subr.bf16.mxu0 %v1863_v23  ;;  %1748 = vmatpush3.bf16.msra.mxu1 %v1862_v24 }
  0x46   :  { %1749 = vmatprep.subr.bf16.mxu1 %v1864_v25  ;;  %1344 = vmatprep.mubr.bf16.mxu0 %v365_v55 }
  0x47   :  { %1384 = vmatprep.mubr.bf16.mxu1 %v375_v58 }
  0x48   :  { %1728 = vmatpush3.bf16.msra.mxu0 %v1865_v26 }
  0x49   :  { %1729 = vmatprep.subr.bf16.mxu0 %v1867_v27  ;;  %1750 = vmatpush3.bf16.msra.mxu1 %v1866_v28 }
  0x4a   :  { %1751 = vmatprep.subr.bf16.mxu1 %v1868_v29 }
  0x4c   :  { %1730 = vmatpush3.bf16.msra.mxu0 %v1869_v30 }
  0x4d   :  { %1731 = vmatprep.subr.bf16.mxu0 %v1871_v31  ;;  %1752 = vmatpush3.bf16.msra.mxu1 %v1870_v32 }
  0x4e   :  { %1753 = vmatprep.subr.bf16.mxu1 %v1872_v33 }
  0x50   :  { %1732 = vmatpush3.bf16.msra.mxu0 %v1873_v34 }
  0x51   :  { %1733 = vmatprep.subr.bf16.mxu0 %v1875_v35  ;;  %1754 = vmatpush3.bf16.msra.mxu1 %v1874_v36 }
  0x52   :  { %1755 = vmatprep.subr.bf16.mxu1 %v1876_v37 }
  0x54   :  { %1734 = vmatpush3.bf16.msra.mxu0 %v1877_v38 }
  0x55   :  { %1735 = vmatprep.subr.bf16.mxu0 %v1879_v39  ;;  %1756 = vmatpush3.bf16.msra.mxu1 %v1878_v40 }
  0x56   :  { %1757 = vmatprep.subr.bf16.mxu1 %v1880_v42 }
  0x58   :  { %1736 = vmatpush3.bf16.msra.mxu0 %v1881_v43 }
  0x59   :  { %1737 = vmatprep.subr.bf16.mxu0 %v1883_v44  ;;  %1758 = vmatpush3.bf16.msra.mxu1 %v1882_v46 }
  0x5a   :  { %1759 = vmatprep.subr.bf16.mxu1 %v1884_v49 }
  0x5c   :  { %1738 = vmatpush3.bf16.msra.mxu0 %v1885_v50 }
  0x5d   :  { %1739 = vmatprep.subr.bf16.mxu0 %v1887_v53  ;;  %1760 = vmatpush3.bf16.msra.mxu1 %v1886_v54 }
  0x5e   :  { %1761 = vmatprep.subr.bf16.mxu1 %v1888_v56 }
  0x60   :  { %1740 = vmatpush3.bf16.msra.mxu0 %v1889_v57 }
  0x61   :  { %1769 = vmatprep.subr.bf16.mxu0 %v1891_v61  ;;  %1762 = vmatpush3.bf16.msra.mxu1 %v1890_v62 }
  0x62   :  { %1432 = vmatprep.subr.bf16.mxu1 %v1951_v5 }
  0x63   :  { %1345 = vmatmul.mubr.bf16.vlgmr.msra.gmra.mrb[8].mxu0 %v351_v60 }
  0x64   :  { %1770 = vmatpush3.bf16.msra.mxu0 %v1892_v63  ;;  %1424 = vmatprep.mubr.bf16.mxu0 %v372_v0 }
  0x65   :  { %1385 = vmatmul.mubr.bf16.vlgmr.msra.gmra.mrb[8].mxu1 %v373_v1  ;;  %1771 = vmatprep.subr.bf16.mxu0 %v1894_v2 }
  0x66   :  { %1433 = vmatpush1.bf16.msra.mxu1 %v1893_v3  ;;  %1636 = vmatprep.mubr.msk.bf16.mxu1 %vm1148_vm0, %v376_v4 }
  0x67   :  { %1434 = vmatprep.subr.bf16.mxu1 %v1951_v5 }
  0x68   :  { %1772 = vmatpush3.bf16.msra.mxu0 %v1895_v6 }
  0x69   :  { %1773 = vmatprep.subr.bf16.mxu0 %v1897_v7 }
  0x6a   :  { %1435 = vmatpush1.bf16.msra.mxu1 %v1896_v8 }
  0x6b   :  { %1436 = vmatprep.subr.bf16.mxu1 %v1951_v5 }
  0x6c   :  { %1774 = vmatpush3.bf16.msra.mxu0 %v1898_v9 }
  0x6d   :  { %1775 = vmatprep.subr.bf16.mxu0 %v1900_v10 }
  0x6e   :  { %1437 = vmatpush1.bf16.msra.mxu1 %v1899_v11 }
  0x6f   :  { %1438 = vmatprep.subr.bf16.mxu1 %v1951_v5 }
  0x70   :  { %1776 = vmatpush3.bf16.msra.mxu0 %v1901_v12 }
  0x71   :  { %1777 = vmatprep.subr.bf16.mxu0 %v1903_v13 }
  0x72   :  { %1439 = vmatpush1.bf16.msra.mxu1 %v1902_v14 }
  0x73   :  { %1440 = vmatprep.subr.bf16.mxu1 %v1951_v5 }
  0x74   :  { %8 = vsyncpa [#allocation3], 0  ;;  %1778 = vmatpush3.bf16.msra.mxu0 %v1904_v15  ;;  %v1907_v18 = vld [vmem:[%s2414_s1 + $0x328] sm:$0xff]   ;;  %v1909_v19 = vld [vmem:[%s2414_s1 + $0x370] sm:$0xff]   ;;  %v358_v26 = vrot.slane %v2267_v52, %v2078_v41  ;;  %vm1472_vm1 = vcmask 74752  }
  0x75   :  { %1779 = vmatprep.subr.bf16.mxu0 %v1906_v16  ;;  %v1908_v20 = vld [vmem:[%s2414_s1 + $0x3a8] sm:$0xff]   ;;  %v1910_v21 = vld [vmem:[%s2414_s1 + $0x330] sm:$0xff]   ;;  %v1912_v22 = vld [vmem:[%s2414_s1 + $0x378] sm:$0xff]  }
  0x76   :  { %1441 = vmatpush1.bf16.msra.mxu1 %v1905_v17  ;;  %v1911_v23 = vld [vmem:[%s2414_s1 + $0x3b0] sm:$0xff]   ;;  %v1913_v24 = vld [vmem:[%s2414_s1 + $0x338] sm:$0xff]   ;;  %v1916_v27 = vld [vmem:[%s2414_s1 + $0x3c0] sm:$0xff]   ;;  %v374_v32 = vcombine.high %v358_v26, %v358_v26 }
  0x77   :  { %1442 = vmatprep.subr.bf16.mxu1 %v1951_v5  ;;  %v1914_v25 = vld [vmem:[%s2414_s1 + $0x3b8] sm:$0xff]   ;;  %v1917_v28 = vld [vmem:[%s2414_s1 + $0x3c8] sm:$0xff]   ;;  %v1918_v41 = vld [vmem:[%s2414_s1 + $0x3d0] sm:$0xff]  }
  0x78   :  { %1780 = vmatpush3.bf16.msra.mxu0 %v1907_v18  ;;  %v1919_v29 = vld [vmem:[%s2414_s1 + $0x3d8] sm:$0xff]   ;;  %v1920_v30 = vld [vmem:[%s2414_s1 + $0x3e0] sm:$0xff]   ;;  %v1921_v31 = vld [vmem:[%s2414_s1 + $0x3e8] sm:$0xff]   ;;  %s1952_s1 = smov [#allocation2]  }
  0x79   :  { %1781 = vmatprep.subr.bf16.mxu0 %v1909_v19  ;;  %v1509_v34 = vld [vmem:[%s2415_s2] ss:$0 sm:$0xff]  ;;  %s1501_s2 = sshll.u32 %s1952_s1, 4  ;;  %s1502_s2 = int_to_ptr.vmem [resolvable:$true] %s1501_s2 }
  0x7a   :  { %1443 = vmatpush1.bf16.msra.mxu1 %v1908_v20  ;;  %s1926_s24 = scalar_lea.vmem %s1502_s2, 32  ;;  %p1931_p1 = scmp.lt.s32.totalorder %s1502_s2, %s1502_s2 }
  0x7b   :  { %1444 = vmatprep.subr.bf16.mxu1 %v1951_v5  ;;  %p1927_p0 = scmp.ne.s32.totalorder %s1502_s2, %s1926_s24  ;;  %p1932_p2 = scmp.lt.s32.totalorder %s1926_s24, %s1926_s24 }
  0x7c   :  { %1782 = vmatpush3.bf16.msra.mxu0 %v1910_v21 }
  0x7d   :  { %1783 = vmatprep.subr.bf16.mxu0 %v1912_v22  ;;  %p1933_p3 = por %p1932_p2, %p1931_p1 }
  0x7e   :  { %1445 = vmatpush1.bf16.msra.mxu1 %v1911_v23 }
  0x7f   :  { %1446 = vmatprep.subr.bf16.mxu1 %v1951_v5  ;;  %p1934_p4 = pnand %p1933_p3, %p1927_p0 }
  0x80   :  { %1784 = vmatpush3.bf16.msra.mxu0 %v1913_v24 }
  0x82   :  { %1447 = vmatpush1.bf16.msra.mxu1 %v1914_v25 }
  0x83   :  { %1425 = vmatmul.mubr.bf16.vlgmr.msra.gmra.mrb[12].mxu0 %v358_v26  ;;  %1448 = vmatprep.subr.bf16.mxu1 %v1951_v5 }
  0x86   :  { %1449 = vmatpush1.bf16.msra.mxu1 %v1916_v27 }
  0x87   :  { %1450 = vmatprep.subr.bf16.mxu1 %v1951_v5 }
  0x8a   :  { %1451 = vmatpush1.bf16.msra.mxu1 %v1917_v28 }
  0x8b   :  { %1452 = vmatprep.subr.bf16.mxu1 %v1951_v5 }
  0x8e   :  { %1453 = vmatpush1.bf16.msra.mxu1 %v1918_v41 }
  0x8f   :  { %1454 = vmatprep.subr.bf16.mxu1 %v1951_v5 }
  0x92   :  { %1455 = vmatpush1.bf16.msra.mxu1 %v1919_v29 }
  0x93   :  { %1456 = vmatprep.subr.bf16.mxu1 %v1951_v5 }
  0x96   :  { %1457 = vmatpush1.bf16.msra.mxu1 %v1920_v30 }
  0x97   :  { %1458 = vmatprep.subr.bf16.mxu1 %v1951_v5 }
  0x9a   :  { %1459 = vmatpush1.bf16.msra.mxu1 %v1921_v31 }
  0x9d   :  { %1465 = vmatmul.mubr.bf16.vlgmr.msra.gmra.mrb[12].mxu1 %v374_v32 }
  0xf6   :  { %v1653_v33 = vpop.f32.mrb[0].mxu0 }
  0xf7   :  { %v1654_v35 = vpop.f32.mrb[1].mxu0  ;;  %v1675_v36 = vpop.f32.mrb[0].mxu1 }
  0xf8   :  { %v1655_v37 = vadd.f32 %v1654_v35, %v1653_v33  ;;  %v1656_v38 = vpop.f32.mrb[2].mxu0  ;;  %v1676_v39 = vpop.f32.mrb[1].mxu1 }
  0xf9   :  { %v1657_v40 = vpop.f32.mrb[3].mxu0  ;;  %v1677_v43 = vadd.f32 %v1676_v39, %v1675_v36  ;;  %v1678_v44 = vpop.f32.mrb[2].mxu1 }
  0xfa   :  { %v1187_v42 = vadd.f32 %v1655_v37, %v1509_v34  ;;  %v1679_v45 = vpop.f32.mrb[3].mxu1 }
  0xfc   :  { %v1227_v46 = vadd.f32 %v1677_v43, %v1187_v42 }
 0x116   :  { %v1697_v47 = vpop.f32.mrb[4].mxu0 }
 0x117   :  { %v1698_v48 = vpop.f32.mrb[5].mxu0  ;;  %v1719_v49 = vpop.f32.mrb[4].mxu1 }
 0x118   :  { %v1699_v50 = vadd.f32 %v1698_v48, %v1697_v47  ;;  %v1700_v51 = vpop.f32.mrb[6].mxu0  ;;  %v1720_v52 = vpop.f32.mrb[5].mxu1 }
 0x119   :  { %v1701_v53 = vpop.f32.mrb[7].mxu0  ;;  %v1721_v55 = vadd.f32 %v1720_v52, %v1719_v49  ;;  %v1722_v56 = vpop.f32.mrb[6].mxu1 }
 0x11a   :  { %v1267_v54 = vadd.f32 %v1699_v50, %v1227_v46  ;;  %v1723_v57 = vpop.f32.mrb[7].mxu1 }
 0x11c   :  { %v1307_v58 = vadd.f32 %v1721_v55, %v1267_v54 }
 0x136   :  { %v1741_v59 = vpop.f32.mrb[8].mxu0 }
 0x137   :  { %v1742_v60 = vpop.f32.mrb[9].mxu0 }
 0x138   :  { %v1763_v61 = vpop.f32.mrb[8].mxu1  ;;  %v1743_v62 = vadd.f32 %v1742_v60, %v1741_v59  ;;  %v1744_v63 = vpop.f32.mrb[10].mxu0 }
 0x139   :  { %v1764_v0 = vpop.f32.mrb[9].mxu1  ;;  %v1745_v1 = vpop.f32.mrb[11].mxu0 }
 0x13a   :  { %v1347_v2 = vadd.f32 %v1743_v62, %v1307_v58  ;;  %v1765_v3 = vadd.f32 %v1764_v0, %v1763_v61  ;;  %v1766_v4 = vpop.f32.mrb[10].mxu1 }
 0x13b   :  { %v1767_v5 = vpop.f32.mrb[11].mxu1 }
 0x13c   :  { %v1387_v6 = vadd.f32 %v1765_v3, %v1347_v2 }
 0x156   :  { %v1785_v7 = vpop.f32.mrb[12].mxu0 }
 0x157   :  { %v1786_v8 = vpop.f32.mrb[13].mxu0 }
 0x158   :  { %v1787_v9 = vadd.f32 %v1786_v8, %v1785_v7  ;;  %v1788_v10 = vpop.f32.mrb[14].mxu0 }
 0x159   :  { %v1789_v11 = vpop.f32.mrb[15].mxu0 }
 0x15a   :  { %v1427_v12 = vadd.f32 %v1787_v9, %v1387_v6 }
 0x170   :  { %v1466_v13 = vpop.f32.mrb[12].mxu1 }
 0x171   :  { %v1467_v14 = vadd.f32 %v1466_v13, %v1427_v12  ;;  %v1468_v15 = vpop.f32.mrb[13].mxu1 }
 0x172   :  { %v1469_v16 = vpop.f32.mrb[14].mxu1 }
 0x173   :  { %v1470_v17 = vpop.f32.mrb[15].mxu1  ;;  %v1473_v18 = vsel %vm1472_vm1, %v1467_v14, -inf }
 0x174   :  { %v1474_v19 = vrot.slane %v1473_v18, 4 }
 0x176   :  { %v1475_v20 = vmax.f32 %v1473_v18, %v1474_v19 }
 0x178   :  { %v1476_v21 = vrot.slane %v1475_v20, 2 }
 0x17a   :  { %v1477_v22 = vmax.f32 %v1475_v20, %v1476_v21 }
 0x17c   :  { %v1478_v23 = vrot.slane %v1477_v22, 1 }
 0x17e   :  { %v1479_v24 = vmax.f32 %v1477_v22, %v1478_v23 }
 0x180   :  { %v1480_v25 = vsub.f32 %v1467_v14, %v1479_v24 }
 0x182   :  { %v1481_v26 = vmul.f32 1.442695, %v1480_v25 }
 0x184   :  { %1922 = vpow2.f32 %v1481_v26 }
 0x18e   :  { %v1923_v27 = vpop.eup %1922 }
 0x18f   :  { %v1483_v28 = vsel %vm1472_vm1, %v1923_v27, 0.0 }
 0x190   :  { %v1484_v41 = vrot.slane %v1483_v28, 4 }
 0x192   :  { %v1485_v29 = vadd.f32 %v1484_v41, %v1483_v28 }
 0x194   :  { %v1486_v30 = vrot.slane %v1485_v29, 2 }
 0x196   :  { %v1487_v31 = vadd.f32 %v1486_v30, %v1485_v29 }
 0x198   :  { %v1488_v32 = vrot.slane %v1487_v31, 1 }
 0x19a   :  { %v1489_v33 = vadd.f32 %v1488_v32, %v1487_v31 }
 0x19c   :  { %1924 = vlog2.f32 %v1489_v33 }
 0x1a6   :  { %v1925_v34 = vpop.eup %1924 }
 0x1a7   :  { %v1491_v35 = vmul.f32 0.6931472, %v1925_v34 }
 0x1a9   :  { %v1492_v36 = vadd.f32 %v1491_v35, %v1479_v24 }
 0x1ab   :  { %v1493_v37 = vsub.f32 %v1467_v14, %v1492_v36 }
 0x1ad   :  { %1494 = vst.msk [vmem:[#allocation2] sm:$0x3] %vm1472_vm1, %v1493_v37 }
 0x1ae   :  { %1937 = shalt.err (!%p1934_p4)
}
 0x1af   :  { %s1938_s27 = scalar_lea.hbm %s2416_s3, 32 }
 0x1b0   :  { %p1939_p5 = scmp.ne.s32.totalorder %s2416_s3, %s1938_s27  ;;  %p1942_p6 = scmp.lt.u32.totalorder %s1938_s27, %s2416_s3 }
 0x1b2   :  { %p1944_p7 = pnand %p1942_p6, %p1939_p5 }
 0x1b4   :  { %1947 = shalt.err (!%p1944_p7)
}
 0x1b5   :  { %1504 = dma.vmem_to_hbm [thread:$0]  %s1502_s2, 32, %s2416_s3, [#allocation3]  }
 0x1b6   :  { %1948 = dma.done.wait [#allocation3], 32  }
 0x1b7   :  { %1949 = vsyncadd [#allocation3], 4294967264 }
 0x1b8   :  { %1508 = vsyncpa [#allocation3], 1 }

</bundles_post_ra>
